<compile_context>
chip_gen: v7x
topology: tpu7x:2x2x1
jax: 0.10.0
libtpu: 0.0.40
codegen_flags: <defaults>
</compile_context>

<pallas_src>
import math

import jax
import jax.numpy as jnp
from jax.experimental import pallas as pl

# ---- model hyper-params (small, consistent with the module defaults) ----
B = 2
H_SP = 8
W_SP = 8
N = H_SP * W_SP            # 64 tokens
BN = B * N                 # 128 rows with batch fused
DIM = 32                   # dim
DIM_OUT = 32               # dim_out (None -> dim)
NUM_HEADS = 4
HEAD_DIM = DIM // NUM_HEADS
MLP_RATIO = 4.0
MLP_HIDDEN = int(DIM_OUT * MLP_RATIO)   # 128
ALPHA = 1.0
SCALE = HEAD_DIM ** (-0.5)
LN_EPS = 1e-5

assert DIM == DIM_OUT, "weight-slab packing below assumes dim == dim_out"


def _layer_norm(z, gamma, beta):
    mu = jnp.mean(z, axis=-1, keepdims=True)
    var = jnp.mean((z - mu) * (z - mu), axis=-1, keepdims=True)
    return (z - mu) * jax.lax.rsqrt(var + LN_EPS) * gamma + beta


def _gelu_exact(z):
    # PyTorch nn.GELU() default: exact erf-based GELU.
    return 0.5 * z * (1.0 + jax.lax.erf(z / math.sqrt(2.0)))


def my_block_kernel(x_ref, xs_ref, wqkvp_ref, w1_ref, w2_ref, vecs_ref, o_ref):
    x = x_ref[...]            # (BN, DIM)   batch fused on rows
    xs = xs_ref[...]          # (BN, DIM)
    vec = vecs_ref[...]       # (8, 128) packed small vectors

    g1 = vec[0:1, 0:DIM]
    b1 = vec[1:2, 0:DIM]
    bp = vec[2:3, 0:DIM_OUT]
    g2 = vec[3:4, 0:DIM_OUT]
    b2 = vec[4:5, 0:DIM_OUT]
    bm2 = vec[5:6, 0:DIM_OUT]
    bm1 = vec[6:7, 0:MLP_HIDDEN]

    # --- norm1 on x and x_source in a single pass ---
    xall = jnp.concatenate([x, xs], axis=0)          # (2*BN, DIM)
    xalln = _layer_norm(xall, g1, b1)

    # --- fused projection: (2*BN, 32) @ (32, 128) against [wq*s | wk | wv | wp].
    # One full-width MXU push; unused quarters (q rows for xs, k/v rows for x,
    # the wp columns) are discarded.
    qkv = jnp.dot(xalln, wqkvp_ref[...], preferred_element_type=jnp.float32)
    q = qkv[0:BN, 0:DIM_OUT]                         # already scaled (wq*SCALE)
    k = qkv[BN:2 * BN, DIM_OUT:2 * DIM_OUT]
    v = qkv[BN:2 * BN, 2 * DIM_OUT:3 * DIM_OUT]

    # --- head-batched attention (sr_ratio == 1) ---
    # Stack heads into the leading batch dim -> one score matmul, one softmax
    # chain, one PV matmul for all heads & batches.
    def to_heads(t):  # (BN, DIM) -> (H*B, N, HEAD_DIM)
        return jnp.concatenate(
            [t[:, h * HEAD_DIM:(h + 1) * HEAD_DIM].reshape(B, N, HEAD_DIM)
             for h in range(NUM_HEADS)], axis=0)

    qh = to_heads(q)
    kh = to_heads(k)
    vh = to_heads(v)

    s = jnp.einsum('bqd,bkd->bqk', qh, kh,
                   preferred_element_type=jnp.float32)          # (H*B, N, N)
    s_max = jnp.max(s, axis=-1, keepdims=True)
    p = jnp.exp(s - s_max)
    # denominator >= 1 after max subtraction; approx reciprocal runs on the EUP.
    p = p * pl.reciprocal(jnp.sum(p, axis=-1, keepdims=True), approx=True)
    oh = jnp.einsum('bqk,bkd->bqd', p, vh,
                    preferred_element_type=jnp.float32)         # (H*B, N, HD)

    attn = jnp.concatenate(
        [oh[h * B:(h + 1) * B].reshape(BN, HEAD_DIM) for h in range(NUM_HEADS)],
        axis=-1)                                                 # (BN, DIM_OUT)

    # --- output projection (with bias) + first residual ---
    wp = wqkvp_ref[:, 3 * DIM_OUT:4 * DIM_OUT]
    attn_out = jnp.dot(attn, wp, preferred_element_type=jnp.float32) + bp
    x1 = x + attn_out * ALPHA

    # --- norm2 + MLP (Linear -> exact GELU -> Linear) + second residual ---
    x1n = _layer_norm(x1, g2, b2)
    h1 = jnp.dot(x1n, w1_ref[...], preferred_element_type=jnp.float32) + bm1
    h1 = _gelu_exact(h1)
    h2 = jnp.dot(h1, w2_ref[...], preferred_element_type=jnp.float32) + bm2

    o_ref[...] = x1 + h2 * ALPHA


def pack_params(params):
    """One-time parameter packing (done at init, NOT per call)."""
    (g1, b1, wq, wk, wv, wp, bp, g2, b2, w1, bm1, w2, bm2) = params
    # Softmax scale folded into wq; wq|wk|wv|wp packed into one (32,128) slab.
    wqkvp = jnp.concatenate([wq * SCALE, wk, wv, wp], axis=1)
    # All small (1, D) vectors packed into one (8, 128) slab.
    vecs = jnp.zeros((8, 128), jnp.float32)
    vecs = vecs.at[0, :DIM].set(g1[0])
    vecs = vecs.at[1, :DIM].set(b1[0])
    vecs = vecs.at[2, :DIM_OUT].set(bp[0])
    vecs = vecs.at[3, :DIM_OUT].set(g2[0])
    vecs = vecs.at[4, :DIM_OUT].set(b2[0])
    vecs = vecs.at[5, :DIM_OUT].set(bm2[0])
    vecs = vecs.at[6, :MLP_HIDDEN].set(bm1[0])
    return (wqkvp, w1, w2, vecs)


def my_block(x, x_source, packed_params):
    wqkvp, w1, w2, vecs = packed_params
    # Fuse batch into the row dim (wrapper-side reshape is free).
    x2 = x.reshape(BN, DIM)
    xs2 = x_source.reshape(BN, DIM)
    # Gridless pallas_call: every operand is a full VMEM-resident block,
    # no pipeline prologue / per-step overhead; only 6 input DMAs.
    out = pl.pallas_call(
        my_block_kernel,
        out_shape=jax.ShapeDtypeStruct((BN, DIM_OUT), jnp.float32),
    )(x2, xs2, wqkvp, w1, w2, vecs)
    return out.reshape(B, N, DIM_OUT)


def reference(x, x_source, params):
    (g1, b1, wq, wk, wv, wp, bp, g2, b2, w1, bm1, w2, bm2) = params
    xn = _layer_norm(x, g1[0], b1[0])
    xsn = _layer_norm(x_source, g1[0], b1[0])
    q = (xn @ wq).reshape(B, N, NUM_HEADS, HEAD_DIM).transpose(0, 2, 1, 3)
    k = (xsn @ wk).reshape(B, N, NUM_HEADS, HEAD_DIM).transpose(0, 2, 1, 3)
    v = (xsn @ wv).reshape(B, N, NUM_HEADS, HEAD_DIM).transpose(0, 2, 1, 3)
    s = jnp.einsum("bhqd,bhkd->bhqk", q, k) * SCALE
    p = jax.nn.softmax(s, axis=-1)
    a = jnp.einsum("bhqk,bhkd->bhqd", p, v).transpose(0, 2, 1, 3).reshape(B, N, DIM_OUT)
    a = a @ wp + bp[0]
    x1 = x + a * ALPHA
    x1n = _layer_norm(x1, g2[0], b2[0])
    h1 = jax.nn.gelu(x1n @ w1 + bm1[0], approximate=False)
    h2 = h1 @ w2 + bm2[0]
    return x1 + h2 * ALPHA


if __name__ == "__main__":
    key = jax.random.PRNGKey(0)
    keys = jax.random.split(key, 16)

    x = jax.random.normal(keys[0], (B, N, DIM), jnp.float32)
    x_source = jax.random.normal(keys[1], (B, N, DIM), jnp.float32)

    def init_w(k, shape, fan_in):
        return jax.random.normal(k, shape, jnp.float32) * (1.0 / math.sqrt(fan_in))

    params = (
        jnp.ones((1, DIM), jnp.float32),                    # norm1 gamma
        jnp.zeros((1, DIM), jnp.float32),                   # norm1 beta
        init_w(keys[2], (DIM, DIM_OUT), DIM),               # wq
        init_w(keys[3], (DIM, DIM_OUT), DIM),               # wk
        init_w(keys[4], (DIM, DIM_OUT), DIM),               # wv
        init_w(keys[5], (DIM_OUT, DIM_OUT), DIM_OUT),       # proj weight
        0.01 * jax.random.normal(keys[6], (1, DIM_OUT), jnp.float32),  # proj bias
        jnp.ones((1, DIM_OUT), jnp.float32),                # norm2 gamma
        jnp.zeros((1, DIM_OUT), jnp.float32),               # norm2 beta
        init_w(keys[7], (DIM_OUT, MLP_HIDDEN), DIM_OUT),    # mlp fc1 weight
        0.01 * jax.random.normal(keys[8], (1, MLP_HIDDEN), jnp.float32),  # fc1 bias
        init_w(keys[9], (MLP_HIDDEN, DIM_OUT), MLP_HIDDEN), # mlp fc2 weight
        0.01 * jax.random.normal(keys[10], (1, DIM_OUT), jnp.float32),    # fc2 bias
    )

    packed = pack_params(params)          # one-time packing (parameter init)

    out = my_block(x, x_source, packed)
    out = jax.block_until_ready(out)

    ref = reference(x, x_source, params)
    # Tolerance slightly looser than 1e-4 because the softmax denominator uses
    # the hardware (EUP) approximate reciprocal per the perf review.
    assert jnp.allclose(out, ref, atol=2e-4, rtol=2e-4), (
        float(jnp.max(jnp.abs(out - ref))))

    # TODO(synk): sr_ratio > 1 branch (strided Conv2d + extra LayerNorm) not
    # implemented; module default sr_ratio=1 is reproduced exactly.
    print("KERNEL_OK")
</pallas_src>

<mosaic_0001>
module attributes {stable_mosaic.version = 11 : i64} {
  func.func @my_block_kernel(%arg0: memref<128x32xf32, #tpu.memory_space<vmem>>, %arg1: memref<128x32xf32, #tpu.memory_space<vmem>>, %arg2: memref<32x128xf32, #tpu.memory_space<vmem>>, %arg3: memref<32x128xf32, #tpu.memory_space<vmem>>, %arg4: memref<128x32xf32, #tpu.memory_space<vmem>>, %arg5: memref<8x128xf32, #tpu.memory_space<vmem>>, %arg6: memref<128x32xf32, #tpu.memory_space<vmem>>) attributes {dimension_semantics = [], scalar_prefetch = 0 : i64, scratch_operands = 0 : i64, tpu.core_type = #tpu.core_type<tc>} {
    %c0 = arith.constant 0 : index
    %c0_0 = arith.constant 0 : index
    %0 = vector.load %arg0[%c0, %c0_0] : memref<128x32xf32, #tpu.memory_space<vmem>>, vector<128x32xf32>
    %c0_1 = arith.constant 0 : index
    %c0_2 = arith.constant 0 : index
    %1 = vector.load %arg1[%c0_1, %c0_2] : memref<128x32xf32, #tpu.memory_space<vmem>>, vector<128x32xf32>
    %c0_3 = arith.constant 0 : index
    %c0_4 = arith.constant 0 : index
    %2 = vector.load %arg5[%c0_3, %c0_4] : memref<8x128xf32, #tpu.memory_space<vmem>>, vector<8x128xf32>
    %3 = vector.extract_strided_slice %2 {offsets = [0, 0], sizes = [1, 32], strides = [1, 1]} : vector<8x128xf32> to vector<1x32xf32>
    %4 = vector.extract_strided_slice %2 {offsets = [1, 0], sizes = [1, 32], strides = [1, 1]} : vector<8x128xf32> to vector<1x32xf32>
    %5 = vector.extract_strided_slice %2 {offsets = [2, 0], sizes = [1, 32], strides = [1, 1]} : vector<8x128xf32> to vector<1x32xf32>
    %6 = vector.extract_strided_slice %2 {offsets = [3, 0], sizes = [1, 32], strides = [1, 1]} : vector<8x128xf32> to vector<1x32xf32>
    %7 = vector.extract_strided_slice %2 {offsets = [4, 0], sizes = [1, 32], strides = [1, 1]} : vector<8x128xf32> to vector<1x32xf32>
    %8 = vector.extract_strided_slice %2 {offsets = [5, 0], sizes = [1, 32], strides = [1, 1]} : vector<8x128xf32> to vector<1x32xf32>
    %9 = vector.extract_strided_slice %2 {offsets = [6, 0], sizes = [1, 128], strides = [1, 1]} : vector<8x128xf32> to vector<1x128xf32>
    %10 = tpu.concatenate %0, %1 in 0 : vector<128x32xf32>, vector<128x32xf32> -> vector<256x32xf32>
    %cst = arith.constant dense<0.000000e+00> : vector<256xf32>
    %11 = vector.multi_reduction <add>, %10, %cst [1] : vector<256x32xf32> to vector<256xf32>
    %12 = vector.shape_cast %11 : vector<256xf32> to vector<256x1xf32>
    %cst_5 = arith.constant 3.200000e+01 : f32
    %13 = vector.broadcast %cst_5 : f32 to vector<256x1xf32>
    %14 = arith.divf %12, %13 : vector<256x1xf32>
    %15 = vector.broadcast %14 : vector<256x1xf32> to vector<256x32xf32>
    %16 = arith.subf %10, %15 : vector<256x32xf32>
    %17 = vector.broadcast %14 : vector<256x1xf32> to vector<256x32xf32>
    %18 = arith.subf %10, %17 : vector<256x32xf32>
    %19 = arith.mulf %16, %18 : vector<256x32xf32>
    %cst_6 = arith.constant dense<0.000000e+00> : vector<256xf32>
    %20 = vector.multi_reduction <add>, %19, %cst_6 [1] : vector<256x32xf32> to vector<256xf32>
    %21 = vector.shape_cast %20 : vector<256xf32> to vector<256x1xf32>
    %cst_7 = arith.constant 3.200000e+01 : f32
    %22 = vector.broadcast %cst_7 : f32 to vector<256x1xf32>
    %23 = arith.divf %21, %22 : vector<256x1xf32>
    %24 = vector.broadcast %14 : vector<256x1xf32> to vector<256x32xf32>
    %25 = arith.subf %10, %24 : vector<256x32xf32>
    %cst_8 = arith.constant 9.99999974E-6 : f32
    %26 = vector.broadcast %cst_8 : f32 to vector<256x1xf32>
    %27 = arith.addf %23, %26 : vector<256x1xf32>
    %28 = math.rsqrt %27 : vector<256x1xf32>
    %29 = vector.broadcast %28 : vector<256x1xf32> to vector<256x32xf32>
    %30 = arith.mulf %25, %29 : vector<256x32xf32>
    %31 = vector.broadcast %3 : vector<1x32xf32> to vector<256x32xf32>
    %32 = arith.mulf %30, %31 : vector<256x32xf32>
    %33 = vector.broadcast %4 : vector<1x32xf32> to vector<256x32xf32>
    %34 = arith.addf %32, %33 : vector<256x32xf32>
    %c0_9 = arith.constant 0 : index
    %c0_10 = arith.constant 0 : index
    %35 = vector.load %arg2[%c0_9, %c0_10] : memref<32x128xf32, #tpu.memory_space<vmem>>, vector<32x128xf32>
    %cst_11 = arith.constant dense<0.000000e+00> : vector<256x128xf32>
    %36 = tpu.matmul %34, %35, %cst_11 {dimension_numbers = #tpu.dot_dimension_numbers<[1], [0], [0], [1], [0, 0, 1, 1], [], []>} : vector<256x32xf32>, vector<32x128xf32>, vector<256x128xf32> -> vector<256x128xf32>
    %37 = vector.extract_strided_slice %36 {offsets = [0, 0], sizes = [128, 32], strides = [1, 1]} : vector<256x128xf32> to vector<128x32xf32>
    %38 = vector.extract_strided_slice %36 {offsets = [128, 32], sizes = [128, 32], strides = [1, 1]} : vector<256x128xf32> to vector<128x32xf32>
    %39 = vector.extract_strided_slice %36 {offsets = [128, 64], sizes = [128, 32], strides = [1, 1]} : vector<256x128xf32> to vector<128x32xf32>
    %40 = vector.extract_strided_slice %37 {offsets = [0, 0], sizes = [128, 8], strides = [1, 1]} : vector<128x32xf32> to vector<128x8xf32>
    %41 = vector.shape_cast %40 : vector<128x8xf32> to vector<2x64x8xf32>
    %42 = vector.extract_strided_slice %37 {offsets = [0, 8], sizes = [128, 8], strides = [1, 1]} : vector<128x32xf32> to vector<128x8xf32>
    %43 = vector.shape_cast %42 : vector<128x8xf32> to vector<2x64x8xf32>
    %44 = vector.extract_strided_slice %37 {offsets = [0, 16], sizes = [128, 8], strides = [1, 1]} : vector<128x32xf32> to vector<128x8xf32>
    %45 = vector.shape_cast %44 : vector<128x8xf32> to vector<2x64x8xf32>
    %46 = vector.extract_strided_slice %37 {offsets = [0, 24], sizes = [128, 8], strides = [1, 1]} : vector<128x32xf32> to vector<128x8xf32>
    %47 = vector.shape_cast %46 : vector<128x8xf32> to vector<2x64x8xf32>
    %48 = tpu.concatenate %41, %43, %45, %47 in 0 : vector<2x64x8xf32>, vector<2x64x8xf32>, vector<2x64x8xf32>, vector<2x64x8xf32> -> vector<8x64x8xf32>
    %49 = vector.extract_strided_slice %38 {offsets = [0, 0], sizes = [128, 8], strides = [1, 1]} : vector<128x32xf32> to vector<128x8xf32>
    %50 = vector.shape_cast %49 : vector<128x8xf32> to vector<2x64x8xf32>
    %51 = vector.extract_strided_slice %38 {offsets = [0, 8], sizes = [128, 8], strides = [1, 1]} : vector<128x32xf32> to vector<128x8xf32>
    %52 = vector.shape_cast %51 : vector<128x8xf32> to vector<2x64x8xf32>
    %53 = vector.extract_strided_slice %38 {offsets = [0, 16], sizes = [128, 8], strides = [1, 1]} : vector<128x32xf32> to vector<128x8xf32>
    %54 = vector.shape_cast %53 : vector<128x8xf32> to vector<2x64x8xf32>
    %55 = vector.extract_strided_slice %38 {offsets = [0, 24], sizes = [128, 8], strides = [1, 1]} : vector<128x32xf32> to vector<128x8xf32>
    %56 = vector.shape_cast %55 : vector<128x8xf32> to vector<2x64x8xf32>
    %57 = tpu.concatenate %50, %52, %54, %56 in 0 : vector<2x64x8xf32>, vector<2x64x8xf32>, vector<2x64x8xf32>, vector<2x64x8xf32> -> vector<8x64x8xf32>
    %58 = vector.extract_strided_slice %39 {offsets = [0, 0], sizes = [128, 8], strides = [1, 1]} : vector<128x32xf32> to vector<128x8xf32>
    %59 = vector.shape_cast %58 : vector<128x8xf32> to vector<2x64x8xf32>
    %60 = vector.extract_strided_slice %39 {offsets = [0, 8], sizes = [128, 8], strides = [1, 1]} : vector<128x32xf32> to vector<128x8xf32>
    %61 = vector.shape_cast %60 : vector<128x8xf32> to vector<2x64x8xf32>
    %62 = vector.extract_strided_slice %39 {offsets = [0, 16], sizes = [128, 8], strides = [1, 1]} : vector<128x32xf32> to vector<128x8xf32>
    %63 = vector.shape_cast %62 : vector<128x8xf32> to vector<2x64x8xf32>
    %64 = vector.extract_strided_slice %39 {offsets = [0, 24], sizes = [128, 8], strides = [1, 1]} : vector<128x32xf32> to vector<128x8xf32>
    %65 = vector.shape_cast %64 : vector<128x8xf32> to vector<2x64x8xf32>
    %66 = tpu.concatenate %59, %61, %63, %65 in 0 : vector<2x64x8xf32>, vector<2x64x8xf32>, vector<2x64x8xf32>, vector<2x64x8xf32> -> vector<8x64x8xf32>
    "tpu.trace_start"() <{level = 10 : i32, message = "bqd,bkd->bqk"}> : () -> ()
    %cst_12 = arith.constant dense<0.000000e+00> : vector<8x64x64xf32>
    %67 = tpu.matmul %48, %57, %cst_12 {dimension_numbers = #tpu.dot_dimension_numbers<[2], [2], [1], [1], [0, 0, 0, 1, 1, 1], [0], [0]>} : vector<8x64x8xf32>, vector<8x64x8xf32>, vector<8x64x64xf32> -> vector<8x64x64xf32>
    "tpu.trace_stop"() : () -> ()
    %cst_13 = arith.constant dense<0xFF800000> : vector<8x64xf32>
    %68 = vector.multi_reduction <maximumf>, %67, %cst_13 [2] : vector<8x64x64xf32> to vector<8x64xf32>
    %69 = vector.shape_cast %68 : vector<8x64xf32> to vector<8x64x1xf32>
    %70 = vector.broadcast %69 : vector<8x64x1xf32> to vector<8x64x64xf32>
    %71 = arith.subf %67, %70 : vector<8x64x64xf32>
    %72 = math.exp %71 : vector<8x64x64xf32>
    %cst_14 = arith.constant dense<0.000000e+00> : vector<8x64xf32>
    %73 = vector.multi_reduction <add>, %72, %cst_14 [2] : vector<8x64x64xf32> to vector<8x64xf32>
    %74 = vector.shape_cast %73 : vector<8x64xf32> to vector<8x64x1xf32>
    %75 = tpu.reciprocal %74 {approx = true} : vector<8x64x1xf32> -> vector<8x64x1xf32>
    %76 = vector.broadcast %75 : vector<8x64x1xf32> to vector<8x64x64xf32>
    %77 = arith.mulf %72, %76 : vector<8x64x64xf32>
    "tpu.trace_start"() <{level = 10 : i32, message = "bqk,bkd->bqd"}> : () -> ()
    %cst_15 = arith.constant dense<0.000000e+00> : vector<8x64x8xf32>
    %78 = tpu.matmul %77, %66, %cst_15 {dimension_numbers = #tpu.dot_dimension_numbers<[2], [1], [1], [2], [0, 0, 0, 1, 1, 2], [0], [0]>} : vector<8x64x64xf32>, vector<8x64x8xf32>, vector<8x64x8xf32> -> vector<8x64x8xf32>
    "tpu.trace_stop"() : () -> ()
    %79 = vector.extract_strided_slice %78 {offsets = [0, 0, 0], sizes = [2, 64, 8], strides = [1, 1, 1]} : vector<8x64x8xf32> to vector<2x64x8xf32>
    %80 = vector.shape_cast %79 : vector<2x64x8xf32> to vector<128x8xf32>
    %81 = vector.extract_strided_slice %78 {offsets = [2, 0, 0], sizes = [2, 64, 8], strides = [1, 1, 1]} : vector<8x64x8xf32> to vector<2x64x8xf32>
    %82 = vector.shape_cast %81 : vector<2x64x8xf32> to vector<128x8xf32>
    %83 = vector.extract_strided_slice %78 {offsets = [4, 0, 0], sizes = [2, 64, 8], strides = [1, 1, 1]} : vector<8x64x8xf32> to vector<2x64x8xf32>
    %84 = vector.shape_cast %83 : vector<2x64x8xf32> to vector<128x8xf32>
    %85 = vector.extract_strided_slice %78 {offsets = [6, 0, 0], sizes = [2, 64, 8], strides = [1, 1, 1]} : vector<8x64x8xf32> to vector<2x64x8xf32>
    %86 = vector.shape_cast %85 : vector<2x64x8xf32> to vector<128x8xf32>
    %87 = tpu.concatenate %80, %82, %84, %86 in 1 : vector<128x8xf32>, vector<128x8xf32>, vector<128x8xf32>, vector<128x8xf32> -> vector<128x32xf32>
    %c0_16 = arith.constant 0 : index
    %c96 = arith.constant 96 : index
    %88 = vector.load %arg2[%c0_16, %c96] : memref<32x128xf32, #tpu.memory_space<vmem>>, vector<32x32xf32>
    %cst_17 = arith.constant dense<0.000000e+00> : vector<128x32xf32>
    %89 = tpu.matmul %87, %88, %cst_17 {dimension_numbers = #tpu.dot_dimension_numbers<[1], [0], [0], [1], [0, 0, 1, 1], [], []>} : vector<128x32xf32>, vector<32x32xf32>, vector<128x32xf32> -> vector<128x32xf32>
    %90 = vector.broadcast %5 : vector<1x32xf32> to vector<128x32xf32>
    %91 = arith.addf %89, %90 : vector<128x32xf32>
    %cst_18 = arith.constant 1.000000e+00 : f32
    %92 = vector.broadcast %cst_18 : f32 to vector<128x32xf32>
    %93 = arith.mulf %91, %92 : vector<128x32xf32>
    %94 = arith.addf %0, %93 : vector<128x32xf32>
    %cst_19 = arith.constant dense<0.000000e+00> : vector<128xf32>
    %95 = vector.multi_reduction <add>, %94, %cst_19 [1] : vector<128x32xf32> to vector<128xf32>
    %96 = vector.shape_cast %95 : vector<128xf32> to vector<128x1xf32>
    %cst_20 = arith.constant 3.200000e+01 : f32
    %97 = vector.broadcast %cst_20 : f32 to vector<128x1xf32>
    %98 = arith.divf %96, %97 : vector<128x1xf32>
    %99 = vector.broadcast %98 : vector<128x1xf32> to vector<128x32xf32>
    %100 = arith.subf %94, %99 : vector<128x32xf32>
    %101 = vector.broadcast %98 : vector<128x1xf32> to vector<128x32xf32>
    %102 = arith.subf %94, %101 : vector<128x32xf32>
    %103 = arith.mulf %100, %102 : vector<128x32xf32>
    %cst_21 = arith.constant dense<0.000000e+00> : vector<128xf32>
    %104 = vector.multi_reduction <add>, %103, %cst_21 [1] : vector<128x32xf32> to vector<128xf32>
    %105 = vector.shape_cast %104 : vector<128xf32> to vector<128x1xf32>
    %cst_22 = arith.constant 3.200000e+01 : f32
    %106 = vector.broadcast %cst_22 : f32 to vector<128x1xf32>
    %107 = arith.divf %105, %106 : vector<128x1xf32>
    %108 = vector.broadcast %98 : vector<128x1xf32> to vector<128x32xf32>
    %109 = arith.subf %94, %108 : vector<128x32xf32>
    %cst_23 = arith.constant 9.99999974E-6 : f32
    %110 = vector.broadcast %cst_23 : f32 to vector<128x1xf32>
    %111 = arith.addf %107, %110 : vector<128x1xf32>
    %112 = math.rsqrt %111 : vector<128x1xf32>
    %113 = vector.broadcast %112 : vector<128x1xf32> to vector<128x32xf32>
    %114 = arith.mulf %109, %113 : vector<128x32xf32>
    %115 = vector.broadcast %6 : vector<1x32xf32> to vector<128x32xf32>
    %116 = arith.mulf %114, %115 : vector<128x32xf32>
    %117 = vector.broadcast %7 : vector<1x32xf32> to vector<128x32xf32>
    %118 = arith.addf %116, %117 : vector<128x32xf32>
    %c0_24 = arith.constant 0 : index
    %c0_25 = arith.constant 0 : index
    %119 = vector.load %arg3[%c0_24, %c0_25] : memref<32x128xf32, #tpu.memory_space<vmem>>, vector<32x128xf32>
    %cst_26 = arith.constant dense<0.000000e+00> : vector<128x128xf32>
    %120 = tpu.matmul %118, %119, %cst_26 {dimension_numbers = #tpu.dot_dimension_numbers<[1], [0], [0], [1], [0, 0, 1, 1], [], []>} : vector<128x32xf32>, vector<32x128xf32>, vector<128x128xf32> -> vector<128x128xf32>
    %121 = vector.broadcast %9 : vector<1x128xf32> to vector<128x128xf32>
    %122 = arith.addf %120, %121 : vector<128x128xf32>
    %cst_27 = arith.constant 5.000000e-01 : f32
    %123 = vector.broadcast %cst_27 : f32 to vector<128x128xf32>
    %124 = arith.mulf %123, %122 : vector<128x128xf32>
    %cst_28 = arith.constant 1.41421354 : f32
    %125 = vector.broadcast %cst_28 : f32 to vector<128x128xf32>
    %126 = arith.divf %122, %125 : vector<128x128xf32>
    %127 = math.erf %126 : vector<128x128xf32>
    %cst_29 = arith.constant 1.000000e+00 : f32
    %128 = vector.broadcast %cst_29 : f32 to vector<128x128xf32>
    %129 = arith.addf %128, %127 : vector<128x128xf32>
    %130 = arith.mulf %124, %129 : vector<128x128xf32>
    %c0_30 = arith.constant 0 : index
    %c0_31 = arith.constant 0 : index
    %131 = vector.load %arg4[%c0_30, %c0_31] : memref<128x32xf32, #tpu.memory_space<vmem>>, vector<128x32xf32>
    %cst_32 = arith.constant dense<0.000000e+00> : vector<128x32xf32>
    %132 = tpu.matmul %130, %131, %cst_32 {dimension_numbers = #tpu.dot_dimension_numbers<[1], [0], [0], [1], [0, 0, 1, 1], [], []>} : vector<128x128xf32>, vector<128x32xf32>, vector<128x32xf32> -> vector<128x32xf32>
    %133 = vector.broadcast %8 : vector<1x32xf32> to vector<128x32xf32>
    %134 = arith.addf %132, %133 : vector<128x32xf32>
    %cst_33 = arith.constant 1.000000e+00 : f32
    %135 = vector.broadcast %cst_33 : f32 to vector<128x32xf32>
    %136 = arith.mulf %134, %135 : vector<128x32xf32>
    %137 = arith.addf %94, %136 : vector<128x32xf32>
    %c0_34 = arith.constant 0 : index
    %c0_35 = arith.constant 0 : index
    %138 = vector.load %arg6[%c0_34, %c0_35] : memref<128x32xf32, #tpu.memory_space<vmem>>, vector<128x32xf32>
    tpu.vector_store %arg6[%c0_34, %c0_35], %137 {strides = array<i32>} : memref<128x32xf32, #tpu.memory_space<vmem>>, vector<128x32xf32>,
    return
  }
}

</mosaic_0001>

<bundles_post_ra>
// kernel: tpu_custom_call.1
= control target key start
LH: loop header
LB: loop body
LE: loop exit
PB: predicated region body
PF: predicated region fallthrough
CT: control target
= control target key end

     0   :  { %vm56_vm0 = vcmask 261120   ;;  %vm1111_vm1 = vcmask 64512   ;;  %s7952_s22 = smov 120   ;;  %s7953_s23 = smov 112   ;;  %vm2320_vm3 = vcmask 523264   ;;  %vm4457_vm4 = vcmask 130048   ;;  %s10806_s0 = inlined_call_operand.vmem [shape: f32[128,32], index: 0, kind: input, shape index: {}]   ;;  %s10807_s1 = inlined_call_operand.vmem [shape: f32[128,32], index: 1, kind: input, shape index: {}]   ;;  %s10808_s2 = inlined_call_operand.vmem [shape: f32[32,128], index: 2, kind: input, shape index: {}]   ;;  %s10809_s5 = inlined_call_operand.vmem [shape: f32[8,128], index: 5, kind: input, shape index: {}]   ;;  %s10810_s3 = inlined_call_operand.vmem [shape: f32[32,128], index: 3, kind: input, shape index: {}]   ;;  %s10811_s4 = inlined_call_operand.vmem [shape: f32[128,32], index: 4, kind: input, shape index: {}]   ;;  %s10812_s6 = inlined_call_operand.vmem [shape: f32[128,32], index: 6, kind: output, shape index: {}]  }
   0x1   :  { %v7999_v0 = vld [vmem:[%s10806_s0] sm:$0xff]  ;;  %v8004_v1 = vld [vmem:[%s10806_s0 + $0x10] sm:$0xff]  ;;  %v8009_v2 = vld [vmem:[%s10806_s0 + $0x8] sm:$0xff]  ;;  %s7954_s24 = smov 96   ;;  %s7955_s25 = smov 104   ;;  %vm4474_vm5 = vcmask 195584  }
   0x2   :  { %v57_v3 = vsel %vm56_vm0, %v7999_v0, 0.0  ;;  %v63_v4 = vsel %vm56_vm0, %v8004_v1, 0.0  ;;  %v8018_v5 = vld [vmem:[%s10806_s0 + $0x18] sm:$0xff]  ;;  %v60_v6 = vsel %vm56_vm0, %v8009_v2, 0.0  ;;  %v8027_v8 = vld [vmem:[%s10806_s0 + $0x20] sm:$0xff]  ;;  %v8032_v9 = vld [vmem:[%s10806_s0 + $0x28] sm:$0xff] }
   0x3   :  { %58 = vadd.xlane.f32.xlu0 %v57_v3  ;;  %64 = vadd.xlane.f32.xlu1 %v63_v4  ;;  %v66_v7 = vsel %vm56_vm0, %v8018_v5, 0.0  ;;  %v69_v10 = vsel %vm56_vm0, %v8027_v8, 0.0  ;;  %v72_v11 = vsel %vm56_vm0, %v8032_v9, 0.0  ;;  %v8041_v12 = vld [vmem:[%s10806_s0 + $0x30] sm:$0xff]  ;;  %v8046_v13 = vld [vmem:[%s10806_s0 + $0x38] sm:$0xff]  ;;  %v8055_v16 = vld [vmem:[%s10806_s0 + $0x40] sm:$0xff] }
   0x4   :  { %v75_v14 = vsel %vm56_vm0, %v8041_v12, 0.0  ;;  %v78_v15 = vsel %vm56_vm0, %v8046_v13, 0.0  ;;  %v8060_v17 = vld [vmem:[%s10806_s0 + $0x48] sm:$0xff]  ;;  %v81_v18 = vsel %vm56_vm0, %v8055_v16, 0.0  ;;  %v8069_v20 = vld [vmem:[%s10806_s0 + $0x50] sm:$0xff]  ;;  %v8074_v21 = vld [vmem:[%s10806_s0 + $0x58] sm:$0xff] }
   0x5   :  { %v84_v19 = vsel %vm56_vm0, %v8060_v17, 0.0  ;;  %v87_v22 = vsel %vm56_vm0, %v8069_v20, 0.0  ;;  %v90_v23 = vsel %vm56_vm0, %v8074_v21, 0.0  ;;  %v8083_v24 = vld [vmem:[%s10806_s0 + $0x60] sm:$0xff]  ;;  %v8088_v25 = vld [vmem:[%s10806_s0 + $0x68] sm:$0xff]  ;;  %v8097_v28 = vld [vmem:[%s10806_s0 + $0x70] sm:$0xff] }
   0x6   :  { %v93_v26 = vsel %vm56_vm0, %v8083_v24, 0.0  ;;  %v96_v27 = vsel %vm56_vm0, %v8088_v25, 0.0  ;;  %v8102_v29 = vld [vmem:[%s10806_s0 + $0x78] sm:$0xff]  ;;  %v99_v30 = vsel %vm56_vm0, %v8097_v28, 0.0  ;;  %v8111_v32 = vld [vmem:[%s10807_s1] sm:$0xff]  ;;  %v8116_v33 = vld [vmem:[%s10807_s1 + $0x8] sm:$0xff] }
   0x7   :  { %61 = vadd.xlane.f32.xlu0 %v60_v6  ;;  %67 = vadd.xlane.f32.xlu1 %v66_v7  ;;  %v102_v31 = vsel %vm56_vm0, %v8102_v29, 0.0  ;;  %v105_v34 = vsel %vm56_vm0, %v8111_v32, 0.0  ;;  %v108_v35 = vsel %vm56_vm0, %v8116_v33, 0.0  ;;  %v8125_v36 = vld [vmem:[%s10807_s1 + $0x10] sm:$0xff]  ;;  %v8130_v37 = vld [vmem:[%s10807_s1 + $0x18] sm:$0xff]  ;;  %v8139_v40 = vld [vmem:[%s10807_s1 + $0x20] sm:$0xff] }
   0x8   :  { %v111_v38 = vsel %vm56_vm0, %v8125_v36, 0.0  ;;  %v114_v39 = vsel %vm56_vm0, %v8130_v37, 0.0  ;;  %v8144_v41 = vld [vmem:[%s10807_s1 + $0x28] sm:$0xff]  ;;  %v117_v42 = vsel %vm56_vm0, %v8139_v40, 0.0  ;;  %v8153_v44 = vld [vmem:[%s10807_s1 + $0x30] sm:$0xff]  ;;  %v8158_v45 = vld [vmem:[%s10807_s1 + $0x38] sm:$0xff] }
   0x9   :  { %v120_v43 = vsel %vm56_vm0, %v8144_v41, 0.0  ;;  %v123_v46 = vsel %vm56_vm0, %v8153_v44, 0.0  ;;  %v126_v47 = vsel %vm56_vm0, %v8158_v45, 0.0  ;;  %v8167_v48 = vld [vmem:[%s10807_s1 + $0x40] sm:$0xff]  ;;  %v8172_v49 = vld [vmem:[%s10807_s1 + $0x48] sm:$0xff]  ;;  %v8181_v52 = vld [vmem:[%s10807_s1 + $0x50] sm:$0xff] }
   0xa   :  { %v129_v50 = vsel %vm56_vm0, %v8167_v48, 0.0  ;;  %v132_v51 = vsel %vm56_vm0, %v8172_v49, 0.0  ;;  %v8186_v53 = vld [vmem:[%s10807_s1 + $0x58] sm:$0xff]  ;;  %v135_v54 = vsel %vm56_vm0, %v8181_v52, 0.0  ;;  %v8195_v56 = vld [vmem:[%s10807_s1 + $0x60] sm:$0xff]  ;;  %v8200_v57 = vld [vmem:[%s10807_s1 + $0x68] sm:$0xff] }
   0xb   :  { %70 = vadd.xlane.f32.xlu0 %v69_v10  ;;  %73 = vadd.xlane.f32.xlu1 %v72_v11  ;;  %v138_v55 = vsel %vm56_vm0, %v8186_v53, 0.0  ;;  %v141_v58 = vsel %vm56_vm0, %v8195_v56, 0.0  ;;  %v144_v59 = vsel %vm56_vm0, %v8200_v57, 0.0  ;;  %v8209_v60 = vld [vmem:[%s10807_s1 + $0x70] sm:$0xff]  ;;  %v8214_v61 = vld [vmem:[%s10807_s1 + $0x78] sm:$0xff]  ;;  %vm8776_vm2 = vmpackc.low %vm1111_vm1, %vm1111_vm1  ;;  %s7956_s26 = smov 64  }
   0xc   :  { %v147_v62 = vsel %vm56_vm0, %v8209_v60, 0.0  ;;  %v150_v63 = vsel %vm56_vm0, %v8214_v61, 0.0  ;;  %s7957_s11 = smov 32   ;;  %s7959_s12 = smov 16  }
   0xd   :  { %s7960_s1 = smov 24  }
   0xf   :  { %76 = vadd.xlane.f32.xlu0 %v75_v14  ;;  %79 = vadd.xlane.f32.xlu1 %v78_v15 }
  0x13   :  { %82 = vadd.xlane.f32.xlu0 %v81_v18  ;;  %85 = vadd.xlane.f32.xlu1 %v84_v19 }
  0x17   :  { %88 = vadd.xlane.f32.xlu0 %v87_v22  ;;  %91 = vadd.xlane.f32.xlu1 %v90_v23 }
  0x1b   :  { %94 = vadd.xlane.f32.xlu0 %v93_v26  ;;  %97 = vadd.xlane.f32.xlu1 %v96_v27 }
  0x1f   :  { %100 = vadd.xlane.f32.xlu0 %v99_v30  ;;  %103 = vadd.xlane.f32.xlu1 %v102_v31 }
  0x23   :  { %106 = vadd.xlane.f32.xlu0 %v105_v34  ;;  %109 = vadd.xlane.f32.xlu1 %v108_v35 }
  0x27   :  { %112 = vadd.xlane.f32.xlu0 %v111_v38  ;;  %115 = vadd.xlane.f32.xlu1 %v114_v39 }
  0x2b   :  { %118 = vadd.xlane.f32.xlu0 %v117_v42  ;;  %121 = vadd.xlane.f32.xlu1 %v120_v43 }
  0x2f   :  { %124 = vadd.xlane.f32.xlu0 %v123_v46  ;;  %127 = vadd.xlane.f32.xlu1 %v126_v47 }
  0x33   :  { %130 = vadd.xlane.f32.xlu0 %v129_v50  ;;  %133 = vadd.xlane.f32.xlu1 %v132_v51 }
  0x37   :  { %136 = vadd.xlane.f32.xlu0 %v135_v54  ;;  %139 = vadd.xlane.f32.xlu1 %v138_v55 }
  0x3b   :  { %142 = vadd.xlane.f32.xlu0 %v141_v58  ;;  %145 = vadd.xlane.f32.xlu1 %v144_v59 }
  0x3f   :  { %148 = vadd.xlane.f32.xlu0 %v147_v62  ;;  %151 = vadd.xlane.f32.xlu1 %v150_v63 }
  0x90   :  { %v59_v3 = vpop.xlane.xlu0 %58  ;;  %v65_v4 = vpop.xlane.xlu1 %64 }
  0x91   :  { %v154_v6 = vmul.f32 0.03125, %v59_v3  ;;  %v156_v7 = vmul.f32 0.03125, %v65_v4 }
  0x93   :  { %v8221_v10 = vsub.f32 %v7999_v0, %v154_v6  ;;  %v8224_v11 = vsub.f32 %v8004_v1, %v156_v7 }
  0x94   :  { %v62_v14 = vpop.xlane.xlu0 %61  ;;  %v68_v15 = vpop.xlane.xlu1 %67 }
  0x95   :  { %v155_v18 = vmul.f32 0.03125, %v62_v14  ;;  %v157_v19 = vmul.f32 0.03125, %v68_v15  ;;  %v218_v22 = vmul.f32 %v8221_v10, %v8221_v10  ;;  %v220_v23 = vmul.f32 %v8224_v11, %v8224_v11 }
  0x97   :  { %v8231_v26 = vsub.f32 %v8009_v2, %v155_v18  ;;  %v8234_v27 = vsub.f32 %v8018_v5, %v157_v19  ;;  %v250_v0 = vsel %vm56_vm0, %v218_v22, 0.0  ;;  %v256_v31 = vsel %vm56_vm0, %v220_v23, 0.0 }
  0x98   :  { %251 = vadd.xlane.f32.xlu0 %v250_v0  ;;  %v71_v1 = vpop.xlane.xlu0 %70  ;;  %v74_v30 = vpop.xlane.xlu1 %73 }
  0x99   :  { %v158_v34 = vmul.f32 0.03125, %v71_v1  ;;  %v159_v35 = vmul.f32 0.03125, %v74_v30  ;;  %v219_v38 = vmul.f32 %v8231_v26, %v8231_v26  ;;  %v221_v39 = vmul.f32 %v8234_v27, %v8234_v27 }
  0x9b   :  { %v8243_v2 = vsub.f32 %v8027_v8, %v158_v34  ;;  %v8246_v5 = vsub.f32 %v8032_v9, %v159_v35  ;;  %v253_v42 = vsel %vm56_vm0, %v219_v38, 0.0  ;;  %v259_v47 = vsel %vm56_vm0, %v221_v39, 0.0 }
  0x9c   :  { %257 = vadd.xlane.f32.xlu0 %v256_v31  ;;  %254 = vadd.xlane.f32.xlu1 %v253_v42  ;;  %v77_v43 = vpop.xlane.xlu0 %76  ;;  %v80_v46 = vpop.xlane.xlu1 %79 }
  0x9d   :  { %v160_v50 = vmul.f32 0.03125, %v77_v43  ;;  %v161_v51 = vmul.f32 0.03125, %v80_v46  ;;  %v222_v54 = vmul.f32 %v8243_v2, %v8243_v2  ;;  %v223_v8 = vmul.f32 %v8246_v5, %v8246_v5 }
  0x9f   :  { %v8255_v55 = vsub.f32 %v8041_v12, %v160_v50  ;;  %v8258_v9 = vsub.f32 %v8046_v13, %v161_v51  ;;  %v262_v58 = vsel %vm56_vm0, %v222_v54, 0.0  ;;  %v265_v63 = vsel %vm56_vm0, %v223_v8, 0.0 }
  0xa0   :  { %260 = vadd.xlane.f32.xlu1 %v259_v47  ;;  %263 = vadd.xlane.f32.xlu0 %v262_v58  ;;  %v83_v59 = vpop.xlane.xlu0 %82  ;;  %v86_v62 = vpop.xlane.xlu1 %85 }
  0xa1   :  { %v162_v3 = vmul.f32 0.03125, %v83_v59  ;;  %v163_v4 = vmul.f32 0.03125, %v86_v62  ;;  %v224_v6 = vmul.f32 %v8255_v55, %v8255_v55  ;;  %v225_v12 = vmul.f32 %v8258_v9, %v8258_v9 }
  0xa3   :  { %v8267_v7 = vsub.f32 %v8055_v16, %v162_v3  ;;  %v8270_v13 = vsub.f32 %v8060_v17, %v163_v4  ;;  %v268_v14 = vsel %vm56_vm0, %v224_v6, 0.0  ;;  %v271_v19 = vsel %vm56_vm0, %v225_v12, 0.0 }
  0xa4   :  { %266 = vadd.xlane.f32.xlu1 %v265_v63  ;;  %269 = vadd.xlane.f32.xlu0 %v268_v14  ;;  %v89_v15 = vpop.xlane.xlu0 %88  ;;  %v92_v18 = vpop.xlane.xlu1 %91 }
  0xa5   :  { %v164_v22 = vmul.f32 0.03125, %v89_v15  ;;  %v165_v23 = vmul.f32 0.03125, %v92_v18  ;;  %v226_v0 = vmul.f32 %v8267_v7, %v8267_v7  ;;  %v227_v16 = vmul.f32 %v8270_v13, %v8270_v13 }
  0xa7   :  { %v8279_v1 = vsub.f32 %v8069_v20, %v164_v22  ;;  %v8282_v17 = vsub.f32 %v8074_v21, %v165_v23  ;;  %v274_v30 = vsel %vm56_vm0, %v226_v0, 0.0  ;;  %v277_v35 = vsel %vm56_vm0, %v227_v16, 0.0 }
  0xa8   :  { %272 = vadd.xlane.f32.xlu1 %v271_v19  ;;  %275 = vadd.xlane.f32.xlu0 %v274_v30  ;;  %v95_v31 = vpop.xlane.xlu0 %94  ;;  %v98_v34 = vpop.xlane.xlu1 %97 }
  0xa9   :  { %v166_v38 = vmul.f32 0.03125, %v95_v31  ;;  %v167_v39 = vmul.f32 0.03125, %v98_v34  ;;  %v228_v42 = vmul.f32 %v8279_v1, %v8279_v1  ;;  %v229_v20 = vmul.f32 %v8282_v17, %v8282_v17  ;;  %v547_v31 = vld [vmem:[%s10808_s2 + $0x8] sm:$0xff] }
  0xab   :  { %v8291_v43 = vsub.f32 %v8083_v24, %v166_v38  ;;  %v8294_v21 = vsub.f32 %v8088_v25, %v167_v39  ;;  %v280_v46 = vsel %vm56_vm0, %v228_v42, 0.0  ;;  %v283_v51 = vsel %vm56_vm0, %v229_v20, 0.0 }
  0xac   :  { %278 = vadd.xlane.f32.xlu1 %v277_v35  ;;  %281 = vadd.xlane.f32.xlu0 %v280_v46  ;;  %v101_v47 = vpop.xlane.xlu0 %100  ;;  %v104_v50 = vpop.xlane.xlu1 %103 }
  0xad   :  { %v168_v54 = vmul.f32 0.03125, %v101_v47  ;;  %v169_v8 = vmul.f32 0.03125, %v104_v50  ;;  %v230_v58 = vmul.f32 %v8291_v43, %v8291_v43  ;;  %v231_v24 = vmul.f32 %v8294_v21, %v8294_v21 }
  0xaf   :  { %v8303_v59 = vsub.f32 %v8097_v28, %v168_v54  ;;  %v8306_v25 = vsub.f32 %v8102_v29, %v169_v8  ;;  %v286_v62 = vsel %vm56_vm0, %v230_v58, 0.0  ;;  %v289_v4 = vsel %vm56_vm0, %v231_v24, 0.0  ;;  %v549_v54 = vld [vmem:[%s10808_s2 + $0x18] sm:$0xff] }
  0xb0   :  { %284 = vadd.xlane.f32.xlu1 %v283_v51  ;;  %287 = vadd.xlane.f32.xlu0 %v286_v62  ;;  %v107_v63 = vpop.xlane.xlu0 %106  ;;  %v110_v3 = vpop.xlane.xlu1 %109 }
  0xb1   :  { %v170_v6 = vmul.f32 0.03125, %v107_v63  ;;  %v171_v12 = vmul.f32 0.03125, %v110_v3  ;;  %v232_v14 = vmul.f32 %v8303_v59, %v8303_v59  ;;  %v233_v28 = vmul.f32 %v8306_v25, %v8306_v25 }
  0xb3   :  { %v8315_v15 = vsub.f32 %v8111_v32, %v170_v6  ;;  %v8318_v29 = vsub.f32 %v8116_v33, %v171_v12  ;;  %v292_v18 = vsel %vm56_vm0, %v232_v14, 0.0  ;;  %v295_v23 = vsel %vm56_vm0, %v233_v28, 0.0  ;;  %v546_v33 = vld [vmem:[%s10808_s2] sm:$0xff] }
  0xb4   :  { %290 = vadd.xlane.f32.xlu1 %v289_v4  ;;  %293 = vadd.xlane.f32.xlu0 %v292_v18  ;;  %v113_v19 = vpop.xlane.xlu0 %112  ;;  %v116_v22 = vpop.xlane.xlu1 %115  ;;  %v6699_v34 = vpack.c.bf16 %v547_v31, %v546_v33 }
  0xb5   :  { %v172_v0 = vmul.f32 0.03125, %v113_v19  ;;  %v173_v16 = vmul.f32 0.03125, %v116_v22  ;;  %v234_v30 = vmul.f32 %v8315_v15, %v8315_v15  ;;  %v235_v32 = vmul.f32 %v8318_v29, %v8318_v29 }
  0xb6   :  { %6700 = vmatprep.subr.bf16.mxu0 %v6699_v34 }
  0xb7   :  { %v8333_v35 = vsub.f32 %v8125_v36, %v172_v0  ;;  %v8336_v38 = vsub.f32 %v8130_v37, %v173_v16  ;;  %v298_v39 = vsel %vm56_vm0, %v234_v30, 0.0  ;;  %v301_v46 = vsel %vm56_vm0, %v235_v32, 0.0  ;;  %v548_v37 = vld [vmem:[%s10808_s2 + $0x10] sm:$0xff]  ;;  %6702 = vmatpush3.bf16.msra.mxu0 %v6699_v34 }
  0xb8   :  { %296 = vadd.xlane.f32.xlu1 %v295_v23  ;;  %299 = vadd.xlane.f32.xlu0 %v298_v39  ;;  %v119_v42 = vpop.xlane.xlu0 %118  ;;  %v122_v20 = vpop.xlane.xlu1 %121  ;;  %v6703_v8 = vpack.c.bf16 %v549_v54, %v548_v37 }
  0xb9   :  { %v174_v47 = vmul.f32 0.03125, %v119_v42  ;;  %v175_v50 = vmul.f32 0.03125, %v122_v20  ;;  %v236_v51 = vmul.f32 %v8333_v35, %v8333_v35  ;;  %v237_v36 = vmul.f32 %v8336_v38, %v8336_v38 }
  0xba   :  { %6704 = vmatprep.subr.bf16.mxu0 %v6703_v8 }
  0xbb   :  { %v8351_v58 = vsub.f32 %v8139_v40, %v174_v47  ;;  %v8354_v24 = vsub.f32 %v8144_v41, %v175_v50  ;;  %v304_v62 = vsel %vm56_vm0, %v236_v51, 0.0  ;;  %v307_v4 = vsel %vm56_vm0, %v237_v36, 0.0  ;;  %6706 = vmatpush3.bf16.msra.mxu0 %v6703_v8 }
  0xbc   :  { %302 = vadd.xlane.f32.xlu1 %v301_v46  ;;  %305 = vadd.xlane.f32.xlu0 %v304_v62  ;;  %v125_v63 = vpop.xlane.xlu0 %124  ;;  %v128_v3 = vpop.xlane.xlu1 %127 }
  0xbd   :  { %v176_v6 = vmul.f32 0.03125, %v125_v63  ;;  %v177_v12 = vmul.f32 0.03125, %v128_v3  ;;  %v238_v14 = vmul.f32 %v8351_v58, %v8351_v58  ;;  %v239_v40 = vmul.f32 %v8354_v24, %v8354_v24 }
  0xbf   :  { %v8363_v41 = vsub.f32 %v8153_v44, %v176_v6  ;;  %v8366_v28 = vsub.f32 %v8158_v45, %v177_v12  ;;  %v310_v18 = vsel %vm56_vm0, %v238_v14, 0.0  ;;  %v313_v23 = vsel %vm56_vm0, %v239_v40, 0.0 }
  0xc0   :  { %308 = vadd.xlane.f32.xlu1 %v307_v4  ;;  %311 = vadd.xlane.f32.xlu0 %v310_v18  ;;  %v131_v19 = vpop.xlane.xlu0 %130  ;;  %v134_v22 = vpop.xlane.xlu1 %133 }
  0xc1   :  { %v178_v0 = vmul.f32 0.03125, %v131_v19  ;;  %v179_v16 = vmul.f32 0.03125, %v134_v22  ;;  %v240_v30 = vmul.f32 %v8363_v41, %v8363_v41  ;;  %v241_v44 = vmul.f32 %v8366_v28, %v8366_v28 }
  0xc3   :  { %v8375_v32 = vsub.f32 %v8167_v48, %v178_v0  ;;  %v8378_v45 = vsub.f32 %v8172_v49, %v179_v16  ;;  %v316_v33 = vsel %vm56_vm0, %v240_v30, 0.0  ;;  %v319_v39 = vsel %vm56_vm0, %v241_v44, 0.0 }
  0xc4   :  { %314 = vadd.xlane.f32.xlu1 %v313_v23  ;;  %317 = vadd.xlane.f32.xlu0 %v316_v33  ;;  %v137_v31 = vpop.xlane.xlu0 %136  ;;  %v140_v34 = vpop.xlane.xlu1 %139  ;;  %v474_v33 = vlaneseq }
  0xc5   :  { %v180_v42 = vmul.f32 0.03125, %v137_v31  ;;  %v181_v20 = vmul.f32 0.03125, %v140_v34  ;;  %v242_v46 = vmul.f32 %v8375_v32, %v8375_v32  ;;  %v243_v48 = vmul.f32 %v8378_v45, %v8378_v45 }
  0xc7   :  { %v8387_v47 = vsub.f32 %v8181_v52, %v180_v42  ;;  %v8390_v49 = vsub.f32 %v8186_v53, %v181_v20  ;;  %v322_v50 = vsel %vm56_vm0, %v242_v46, 0.0  ;;  %v325_v37 = vsel %vm56_vm0, %v243_v48, 0.0 }
  0xc8   :  { %320 = vadd.xlane.f32.xlu1 %v319_v39  ;;  %323 = vadd.xlane.f32.xlu0 %v322_v50  ;;  %v143_v51 = vpop.xlane.xlu0 %142  ;;  %v146_v36 = vpop.xlane.xlu1 %145  ;;  %v8424_v46 = vshrl.u32 %v474_v33, 7 }
  0xc9   :  { %v182_v54 = vmul.f32 0.03125, %v143_v51  ;;  %v183_v8 = vmul.f32 0.03125, %v146_v36  ;;  %v244_v62 = vmul.f32 %v8387_v47, %v8387_v47  ;;  %v245_v52 = vmul.f32 %v8390_v49, %v8390_v49 }
  0xca   :  { %10856 = vst [vmem:[#allocation2_spill] sm:$0xff] %v8424_v46 }
  0xcb   :  { %v8399_v63 = vsub.f32 %v8195_v56, %v182_v54  ;;  %v8402_v53 = vsub.f32 %v8200_v57, %v183_v8  ;;  %v328_v3 = vsel %vm56_vm0, %v244_v62, 0.0  ;;  %v331_v12 = vsel %vm56_vm0, %v245_v52, 0.0 }
  0xcc   :  { %326 = vadd.xlane.f32.xlu1 %v325_v37  ;;  %329 = vadd.xlane.f32.xlu0 %v328_v3  ;;  %v149_v4 = vpop.xlane.xlu0 %148  ;;  %v152_v6 = vpop.xlane.xlu1 %151  ;;  %v476_v8 = vsub.s32 0, %v8424_v46  ;;  %v55_v3 = vld [vmem:[%s10809_s5] sm:$0xff] }
  0xcd   :  { %v184_v14 = vmul.f32 0.03125, %v149_v4  ;;  %v185_v40 = vmul.f32 0.03125, %v152_v6  ;;  %v246_v18 = vmul.f32 %v8399_v63, %v8399_v63  ;;  %v247_v56 = vmul.f32 %v8402_v53, %v8402_v53 }
  0xcf   :  { %v8411_v19 = vsub.f32 %v8209_v60, %v184_v14  ;;  %v8414_v57 = vsub.f32 %v8214_v61, %v185_v40  ;;  %v334_v22 = vsel %vm56_vm0, %v246_v18, 0.0  ;;  %v337_v23 = vsel %vm56_vm0, %v247_v56, 0.0 }
  0xd0   :  { %332 = vadd.xlane.f32.xlu1 %v331_v12  ;;  %335 = vadd.xlane.f32.xlu0 %v334_v22  ;;  %v512_v12 = vsub.s32 1, %v8424_v46  ;;  %v8431_v18 = vrot.slane %v55_v3, %v476_v8 }
  0xd1   :  { %v248_v0 = vmul.f32 %v8411_v19, %v8411_v19  ;;  %v249_v16 = vmul.f32 %v8414_v57, %v8414_v57 }
  0xd3   :  { %v340_v30 = vsel %vm56_vm0, %v248_v0, 0.0  ;;  %v343_v60 = vsel %vm56_vm0, %v249_v16, 0.0 }
  0xd4   :  { %338 = vadd.xlane.f32.xlu1 %v337_v23  ;;  %341 = vadd.xlane.f32.xlu0 %v340_v30 }
  0xd8   :  { %344 = vadd.xlane.f32.xlu1 %v343_v60  ;;  %v8434_v60 = vrot.slane %v55_v3, %v512_v12 }
 0x125   :  { %v252_v61 = vpop.xlane.xlu0 %251 }
 0x126   :  { %v346_v44 = vmul.f32 0.03125, %v252_v61 }
 0x128   :  { %v378_v31 = vadd.f32 1e-05, %v346_v44 }
 0x129   :  { %v255_v34 = vpop.xlane.xlu1 %254  ;;  %v258_v39 = vpop.xlane.xlu0 %257 }
 0x12a   :  { %7550 = vrsqrt.f32 %v378_v31  ;;  %v347_v42 = vmul.f32 0.03125, %v255_v34  ;;  %v348_v20 = vmul.f32 0.03125, %v258_v39 }
 0x12c   :  { %v379_v48 = vadd.f32 1e-05, %v347_v42  ;;  %v380_v50 = vadd.f32 1e-05, %v348_v20 }
 0x12d   :  { %v261_v51 = vpop.xlane.xlu1 %260  ;;  %v264_v36 = vpop.xlane.xlu0 %263 }
 0x12e   :  { %7552 = vrsqrt.f32 %v379_v48  ;;  %v349_v37 = vmul.f32 0.03125, %v261_v51  ;;  %v350_v54 = vmul.f32 0.03125, %v264_v36 }
 0x12f   :  { %7554 = vrsqrt.f32 %v380_v50 }
 0x130   :  { %v381_v62 = vadd.f32 1e-05, %v349_v37  ;;  %v382_v52 = vadd.f32 1e-05, %v350_v54 }
 0x131   :  { %v267_v4 = vpop.xlane.xlu1 %266  ;;  %v270_v6 = vpop.xlane.xlu0 %269 }
 0x132   :  { %7556 = vrsqrt.f32 %v381_v62  ;;  %v351_v14 = vmul.f32 0.03125, %v267_v4  ;;  %v352_v40 = vmul.f32 0.03125, %v270_v6 }
 0x133   :  { %7558 = vrsqrt.f32 %v382_v52 }
 0x134   :  { %v7551_v56 = vpop.eup %7550  ;;  %v383_v22 = vadd.f32 1e-05, %v351_v14  ;;  %v384_v23 = vadd.f32 1e-05, %v352_v40 }
 0x135   :  { %v273_v0 = vpop.xlane.xlu1 %272  ;;  %v276_v16 = vpop.xlane.xlu0 %275  ;;  %v442_v30 = vmul.f32 %v7551_v56, %v8221_v10 }
 0x136   :  { %7560 = vrsqrt.f32 %v383_v22  ;;  %v353_v61 = vmul.f32 0.03125, %v273_v0  ;;  %v354_v44 = vmul.f32 0.03125, %v276_v16 }
 0x137   :  { %7562 = vrsqrt.f32 %v384_v23  ;;  %v478_v33 = vmul.f32 %v8431_v18, %v442_v30 }
 0x138   :  { %v7553_v31 = vpop.eup %7552  ;;  %v385_v34 = vadd.f32 1e-05, %v353_v61  ;;  %v386_v39 = vadd.f32 1e-05, %v354_v44 }
 0x139   :  { %v7555_v42 = vpop.eup %7554  ;;  %v279_v20 = vpop.xlane.xlu1 %278  ;;  %v514_v50 = vadd.f32 %v8434_v60, %v478_v33  ;;  %v443_v51 = vmul.f32 %v7553_v31, %v8231_v26 }
 0x13a   :  { %v282_v48 = vpop.xlane.xlu0 %281  ;;  %7564 = vrsqrt.f32 %v385_v34  ;;  %v355_v10 = vmul.f32 0.03125, %v279_v20  ;;  %v444_v37 = vmul.f32 %v7555_v42, %v8224_v11 }
 0x13b   :  { %v356_v36 = vmul.f32 0.03125, %v282_v48  ;;  %7566 = vrsqrt.f32 %v386_v39  ;;  %6083 = vmatprep.mubr.msk.f32.mxu0 %vm56_vm0, %v514_v50  ;;  %v479_v54 = vmul.f32 %v8431_v18, %v443_v51 }
 0x13c   :  { %v7557_v8 = vpop.eup %7556  ;;  %v387_v62 = vadd.f32 1e-05, %v355_v10  ;;  %v480_v3 = vmul.f32 %v8431_v18, %v444_v37 }
 0x13d   :  { %v388_v52 = vadd.f32 1e-05, %v356_v36  ;;  %v7559_v4 = vpop.eup %7558  ;;  %v285_v6 = vpop.xlane.xlu1 %284  ;;  %v515_v26 = vadd.f32 %v8434_v60, %v479_v54  ;;  %v445_v14 = vmul.f32 %v7557_v8, %v8234_v27 }
 0x13e   :  { %v288_v12 = vpop.xlane.xlu0 %287  ;;  %7568 = vrsqrt.f32 %v387_v62  ;;  %v357_v40 = vmul.f32 0.03125, %v285_v6  ;;  %v516_v56 = vadd.f32 %v8434_v60, %v480_v3  ;;  %v446_v23 = vmul.f32 %v7559_v4, %v8243_v2 }
 0x13f   :  { %v358_v11 = vmul.f32 0.03125, %v288_v12  ;;  %7570 = vrsqrt.f32 %v388_v52  ;;  %6084 = vmatmul.mubr.msk.f32.vlgmr.msra.gmra.mrb[0].mxu0 %vm56_vm0, %v515_v26  ;;  %v481_v22 = vmul.f32 %v8431_v18, %v445_v14 }
 0x140   :  { %v7561_v0 = vpop.eup %7560  ;;  %v389_v16 = vadd.f32 1e-05, %v357_v40  ;;  %6086 = vmatprep.mubr.msk.f32.mxu0 %vm56_vm0, %v516_v56  ;;  %v482_v31 = vmul.f32 %v8431_v18, %v446_v23 }
 0x141   :  { %v390_v30 = vadd.f32 1e-05, %v358_v11  ;;  %v7563_v61 = vpop.eup %7562  ;;  %v291_v44 = vpop.xlane.xlu1 %290  ;;  %v517_v33 = vadd.f32 %v8434_v60, %v481_v22  ;;  %v447_v34 = vmul.f32 %v7561_v0, %v8246_v5 }
 0x142   :  { %v294_v27 = vpop.xlane.xlu0 %293  ;;  %7572 = vrsqrt.f32 %v389_v16  ;;  %v359_v39 = vmul.f32 0.03125, %v291_v44  ;;  %v448_v20 = vmul.f32 %v7563_v61, %v8255_v55  ;;  %v518_v2 = vadd.f32 %v8434_v60, %v482_v31 }
 0x143   :  { %v360_v42 = vmul.f32 0.03125, %v294_v27  ;;  %7574 = vrsqrt.f32 %v390_v30  ;;  %6087 = vmatmul.mubr.msk.f32.gmra.mrb[2].mxu0 %vm56_vm0, %v517_v33  ;;  %v483_v48 = vmul.f32 %v8431_v18, %v447_v34 }
 0x144   :  { %v7565_v50 = vpop.eup %7564  ;;  %v391_v51 = vadd.f32 1e-05, %v359_v39  ;;  %v484_v36 = vmul.f32 %v8431_v18, %v448_v20  ;;  %6089 = vmatprep.mubr.msk.f32.mxu0 %vm56_vm0, %v518_v2 }
 0x145   :  { %v392_v10 = vadd.f32 1e-05, %v360_v42  ;;  %v7567_v37 = vpop.eup %7566  ;;  %v297_v5 = vpop.xlane.xlu1 %296  ;;  %v519_v8 = vadd.f32 %v8434_v60, %v483_v48  ;;  %v449_v55 = vmul.f32 %v7565_v50, %v8258_v9 }
 0x146   :  { %v300_v54 = vpop.xlane.xlu0 %299  ;;  %7576 = vrsqrt.f32 %v391_v51  ;;  %v361_v62 = vmul.f32 0.03125, %v297_v5  ;;  %v520_v3 = vadd.f32 %v8434_v60, %v484_v36  ;;  %v450_v6 = vmul.f32 %v7567_v37, %v8267_v7 }
 0x147   :  { %v362_v52 = vmul.f32 0.03125, %v300_v54  ;;  %7578 = vrsqrt.f32 %v392_v10  ;;  %6090 = vmatmul.mubr.msk.f32.gmra.mrb[4].mxu0 %vm56_vm0, %v519_v8  ;;  %v485_v4 = vmul.f32 %v8431_v18, %v449_v55 }
 0x148   :  { %v7569_v12 = vpop.eup %7568  ;;  %v393_v26 = vadd.f32 1e-05, %v361_v62  ;;  %6092 = vmatprep.mubr.msk.f32.mxu0 %vm56_vm0, %v520_v3  ;;  %v486_v22 = vmul.f32 %v8431_v18, %v450_v6 }
 0x149   :  { %v394_v14 = vadd.f32 1e-05, %v362_v52  ;;  %v7571_v40 = vpop.eup %7570  ;;  %v303_v11 = vpop.xlane.xlu1 %302  ;;  %v521_v56 = vadd.f32 %v8434_v60, %v485_v4  ;;  %v451_v23 = vmul.f32 %v7569_v12, %v8270_v13 }
 0x14a   :  { %v306_v9 = vpop.xlane.xlu0 %305  ;;  %7580 = vrsqrt.f32 %v393_v26  ;;  %v363_v0 = vmul.f32 0.03125, %v303_v11  ;;  %v452_v30 = vmul.f32 %v7571_v40, %v8279_v1  ;;  %v522_v7 = vadd.f32 %v8434_v60, %v486_v22 }
 0x14b   :  { %v364_v16 = vmul.f32 0.03125, %v306_v9  ;;  %7582 = vrsqrt.f32 %v394_v14  ;;  %6093 = vmatmul.mubr.msk.f32.gmra.mrb[6].mxu0 %vm56_vm0, %v521_v56  ;;  %v487_v61 = vmul.f32 %v8431_v18, %v451_v23 }
 0x14c   :  { %v7573_v44 = vpop.eup %7572  ;;  %v395_v27 = vadd.f32 1e-05, %v363_v0  ;;  %v488_v31 = vmul.f32 %v8431_v18, %v452_v30  ;;  %6095 = vmatprep.mubr.msk.f32.mxu0 %vm56_vm0, %v522_v7 }
 0x14d   :  { %v396_v33 = vadd.f32 1e-05, %v364_v16  ;;  %v7575_v34 = vpop.eup %7574  ;;  %v309_v13 = vpop.xlane.xlu1 %308  ;;  %v523_v42 = vadd.f32 %v8434_v60, %v487_v61  ;;  %v453_v1 = vmul.f32 %v7573_v44, %v8282_v17 }
 0x14e   :  { %v312_v39 = vpop.xlane.xlu0 %311  ;;  %7584 = vrsqrt.f32 %v395_v27  ;;  %v365_v20 = vmul.f32 0.03125, %v309_v13  ;;  %v524_v48 = vadd.f32 %v8434_v60, %v488_v31  ;;  %v454_v51 = vmul.f32 %v7575_v34, %v8291_v43 }
 0x14f   :  { %v366_v2 = vmul.f32 0.03125, %v312_v39  ;;  %7586 = vrsqrt.f32 %v396_v33  ;;  %6096 = vmatmul.mubr.msk.f32.gmra.mrb[8].mxu0 %vm56_vm0, %v523_v42  ;;  %v489_v50 = vmul.f32 %v8431_v18, %v453_v1 }
 0x150   :  { %v7577_v10 = vpop.eup %7576  ;;  %v397_v36 = vadd.f32 1e-05, %v365_v20  ;;  %6098 = vmatprep.mubr.msk.f32.mxu0 %vm56_vm0, %v524_v48  ;;  %v490_v55 = vmul.f32 %v8431_v18, %v454_v51 }
 0x151   :  { %v398_v37 = vadd.f32 1e-05, %v366_v2  ;;  %v7579_v5 = vpop.eup %7578  ;;  %v315_v54 = vpop.xlane.xlu1 %314  ;;  %v525_v8 = vadd.f32 %v8434_v60, %v489_v50  ;;  %v455_v62 = vmul.f32 %v7577_v10, %v8294_v21 }
 0x152   :  { %v318_v17 = vpop.xlane.xlu0 %317  ;;  %7588 = vrsqrt.f32 %v397_v36  ;;  %v367_v52 = vmul.f32 0.03125, %v315_v54  ;;  %v456_v4 = vmul.f32 %v7579_v5, %v8303_v59  ;;  %v526_v43 = vadd.f32 %v8434_v60, %v490_v55 }
 0x153   :  { %v368_v3 = vmul.f32 0.03125, %v318_v17  ;;  %7590 = vrsqrt.f32 %v398_v37  ;;  %6099 = vmatmul.mubr.msk.f32.gmra.mrb[10].mxu0 %vm56_vm0, %v525_v8  ;;  %v491_v6 = vmul.f32 %v8431_v18, %v455_v62 }
 0x154   :  { %v7581_v12 = vpop.eup %7580  ;;  %v399_v26 = vadd.f32 1e-05, %v367_v52  ;;  %v492_v40 = vmul.f32 %v8431_v18, %v456_v4  ;;  %6101 = vmatprep.mubr.msk.f32.mxu0 %vm56_vm0, %v526_v43 }
 0x155   :  { %v400_v14 = vadd.f32 1e-05, %v368_v3  ;;  %v7583_v11 = vpop.eup %7582  ;;  %v321_v21 = vpop.xlane.xlu1 %320  ;;  %v527_v56 = vadd.f32 %v8434_v60, %v491_v6  ;;  %v457_v59 = vmul.f32 %v7581_v12, %v8306_v25 }
 0x156   :  { %v324_v9 = vpop.xlane.xlu0 %323  ;;  %7592 = vrsqrt.f32 %v399_v26  ;;  %v369_v22 = vmul.f32 0.03125, %v321_v21  ;;  %v528_v0 = vadd.f32 %v8434_v60, %v492_v40  ;;  %v458_v30 = vmul.f32 %v7583_v11, %v8315_v15 }
 0x157   :  { %v370_v23 = vmul.f32 0.03125, %v324_v9  ;;  %7594 = vrsqrt.f32 %v400_v14  ;;  %6102 = vmatmul.mubr.msk.f32.gmra.mrb[12].mxu0 %vm56_vm0, %v527_v56  ;;  %v493_v16 = vmul.f32 %v8431_v18, %v457_v59 }
 0x158   :  { %v7585_v7 = vpop.eup %7584  ;;  %v401_v61 = vadd.f32 1e-05, %v369_v22  ;;  %6104 = vmatprep.mubr.msk.f32.mxu0 %vm56_vm0, %v528_v0  ;;  %v494_v34 = vmul.f32 %v8431_v18, %v458_v30 }
 0x159   :  { %v402_v44 = vadd.f32 1e-05, %v370_v23  ;;  %v7587_v27 = vpop.eup %7586  ;;  %v327_v33 = vpop.xlane.xlu1 %326  ;;  %v529_v31 = vadd.f32 %v8434_v60, %v493_v16  ;;  %v459_v13 = vmul.f32 %v7585_v7, %v8318_v29 }
 0x15a   :  { %v330_v25 = vpop.xlane.xlu0 %329  ;;  %7596 = vrsqrt.f32 %v401_v61  ;;  %v371_v39 = vmul.f32 0.03125, %v327_v33  ;;  %v460_v1 = vmul.f32 %v7587_v27, %v8333_v35  ;;  %v530_v15 = vadd.f32 %v8434_v60, %v494_v34 }
 0x15b   :  { %v372_v42 = vmul.f32 0.03125, %v330_v25  ;;  %7598 = vrsqrt.f32 %v402_v44  ;;  %6105 = vmatmul.mubr.msk.f32.gmra.mrb[14].mxu0 %vm56_vm0, %v529_v31  ;;  %v495_v20 = vmul.f32 %v8431_v18, %v459_v13 }
 0x15c   :  { %v7589_v2 = vpop.eup %7588  ;;  %v403_v48 = vadd.f32 1e-05, %v371_v39  ;;  %v496_v51 = vmul.f32 %v8431_v18, %v460_v1  ;;  %6107 = vmatprep.mubr.msk.f32.mxu0 %vm56_vm0, %v530_v15 }
 0x15d   :  { %v404_v50 = vadd.f32 1e-05, %v372_v42  ;;  %v7591_v10 = vpop.eup %7590  ;;  %v333_v29 = vpop.xlane.xlu1 %332  ;;  %v531_v37 = vadd.f32 %v8434_v60, %v495_v20  ;;  %v461_v35 = vmul.f32 %v7589_v2, %v8336_v38 }
 0x15e   :  { %v336_v36 = vpop.xlane.xlu0 %335  ;;  %7600 = vrsqrt.f32 %v403_v48  ;;  %v373_v5 = vmul.f32 0.03125, %v333_v29  ;;  %v532_v17 = vadd.f32 %v8434_v60, %v496_v51  ;;  %v462_v55 = vmul.f32 %v7591_v10, %v8351_v58 }
 0x15f   :  { %v374_v54 = vmul.f32 0.03125, %v336_v36  ;;  %7602 = vrsqrt.f32 %v404_v50  ;;  %6108 = vmatmul.mubr.msk.f32.gmra.mrb[16].mxu0 %vm56_vm0, %v531_v37  ;;  %v497_v8 = vmul.f32 %v8431_v18, %v461_v35 }
 0x160   :  { %v7593_v62 = vpop.eup %7592  ;;  %v405_v52 = vadd.f32 1e-05, %v373_v5  ;;  %6110 = vmatprep.mubr.msk.f32.mxu0 %vm56_vm0, %v532_v17  ;;  %v498_v12 = vmul.f32 %v8431_v18, %v462_v55 }
 0x161   :  { %v406_v3 = vadd.f32 1e-05, %v374_v54  ;;  %v7595_v4 = vpop.eup %7594  ;;  %v339_v43 = vpop.xlane.xlu1 %338  ;;  %v533_v6 = vadd.f32 %v8434_v60, %v497_v8  ;;  %v463_v26 = vmul.f32 %v7593_v62, %v8354_v24 }
 0x162   :  { %v342_v38 = vpop.xlane.xlu0 %341  ;;  %7604 = vrsqrt.f32 %v405_v52  ;;  %v375_v14 = vmul.f32 0.03125, %v339_v43  ;;  %v464_v11 = vmul.f32 %v7595_v4, %v8363_v41  ;;  %v534_v58 = vadd.f32 %v8434_v60, %v498_v12 }
 0x163   :  { %v376_v40 = vmul.f32 0.03125, %v342_v38  ;;  %7606 = vrsqrt.f32 %v406_v3  ;;  %6111 = vmatmul.mubr.msk.f32.gmra.mrb[18].mxu0 %vm56_vm0, %v533_v6  ;;  %v499_v21 = vmul.f32 %v8431_v18, %v463_v26 }
 0x164   :  { %v7597_v9 = vpop.eup %7596  ;;  %v407_v56 = vadd.f32 1e-05, %v375_v14  ;;  %v500_v22 = vmul.f32 %v8431_v18, %v464_v11  ;;  %6113 = vmatprep.mubr.msk.f32.mxu0 %vm56_vm0, %v534_v58 }
 0x165   :  { %v408_v59 = vadd.f32 1e-05, %v376_v40  ;;  %v7599_v23 = vpop.eup %7598  ;;  %v345_v24 = vpop.xlane.xlu1 %344  ;;  %v535_v0 = vadd.f32 %v8434_v60, %v499_v21  ;;  %v465_v41 = vmul.f32 %v7597_v9, %v8366_v28 }
 0x166   :  { %7608 = vrsqrt.f32 %v407_v56  ;;  %v377_v16 = vmul.f32 0.03125, %v345_v24  ;;  %v536_v30 = vadd.f32 %v8434_v60, %v500_v22  ;;  %v466_v7 = vmul.f32 %v7599_v23, %v8375_v32 }
 0x167   :  { %7610 = vrsqrt.f32 %v408_v59  ;;  %6114 = vmatmul.mubr.msk.f32.gmra.mrb[20].mxu0 %vm56_vm0, %v535_v0  ;;  %v501_v61 = vmul.f32 %v8431_v18, %v465_v41 }
 0x168   :  { %v7601_v44 = vpop.eup %7600  ;;  %v409_v27 = vadd.f32 1e-05, %v377_v16  ;;  %6116 = vmatprep.mubr.msk.f32.mxu0 %vm56_vm0, %v536_v30  ;;  %v502_v33 = vmul.f32 %v8431_v18, %v466_v7 }
 0x169   :  { %v7603_v25 = vpop.eup %7602  ;;  %v537_v28 = vadd.f32 %v8434_v60, %v501_v61  ;;  %v467_v31 = vmul.f32 %v7601_v44, %v8378_v45 }
 0x16a   :  { %7612 = vrsqrt.f32 %v409_v27  ;;  %v538_v34 = vadd.f32 %v8434_v60, %v502_v33  ;;  %v468_v32 = vmul.f32 %v7603_v25, %v8387_v47 }
 0x16b   :  { %6117 = vmatmul.mubr.msk.f32.gmra.mrb[22].mxu0 %vm56_vm0, %v537_v28  ;;  %v503_v13 = vmul.f32 %v8431_v18, %v467_v31 }
 0x16c   :  { %v7605_v39 = vpop.eup %7604  ;;  %6119 = vmatprep.mubr.msk.f32.mxu0 %vm56_vm0, %v538_v34  ;;  %v504_v42 = vmul.f32 %v8431_v18, %v468_v32 }
 0x16d   :  { %v7607_v1 = vpop.eup %7606  ;;  %v539_v15 = vadd.f32 %v8434_v60, %v503_v13  ;;  %v469_v20 = vmul.f32 %v7605_v39, %v8390_v49 }
 0x16e   :  { %v540_v45 = vadd.f32 %v8434_v60, %v504_v42  ;;  %v470_v2 = vmul.f32 %v7607_v1, %v8399_v63 }
 0x16f   :  { %6120 = vmatmul.mubr.msk.f32.gmra.mrb[24].mxu0 %vm56_vm0, %v539_v15  ;;  %v505_v47 = vmul.f32 %v8431_v18, %v469_v20 }
 0x170   :  { %v7609_v48 = vpop.eup %7608  ;;  %6122 = vmatprep.mubr.msk.f32.mxu0 %vm56_vm0, %v540_v45  ;;  %v506_v50 = vmul.f32 %v8431_v18, %v470_v2 }
 0x171   :  { %v7611_v51 = vpop.eup %7610  ;;  %v541_v10 = vadd.f32 %v8434_v60, %v505_v47  ;;  %v471_v29 = vmul.f32 %v7609_v48, %v8402_v53 }
 0x172   :  { %v542_v49 = vadd.f32 %v8434_v60, %v506_v50  ;;  %v472_v36 = vmul.f32 %v7611_v51, %v8411_v19 }
 0x173   :  { %6123 = vmatmul.mubr.msk.f32.gmra.mrb[26].mxu0 %vm56_vm0, %v541_v10  ;;  %v507_v63 = vmul.f32 %v8431_v18, %v471_v29 }
 0x174   :  { %v7613_v37 = vpop.eup %7612  ;;  %6125 = vmatprep.mubr.msk.f32.mxu0 %vm56_vm0, %v542_v49  ;;  %v508_v35 = vmul.f32 %v8431_v18, %v472_v36 }
 0x175   :  { %v543_v5 = vadd.f32 %v8434_v60, %v507_v63  ;;  %v473_v54 = vmul.f32 %v7613_v37, %v8414_v57 }
 0x176   :  { %v544_v17 = vadd.f32 %v8434_v60, %v508_v35 }
 0x177   :  { %6126 = vmatmul.mubr.msk.f32.gmra.mrb[28].mxu0 %vm56_vm0, %v543_v5  ;;  %v509_v53 = vmul.f32 %v8431_v18, %v473_v54 }
 0x178   :  { %6128 = vmatprep.mubr.msk.f32.mxu0 %vm56_vm0, %v544_v17 }
 0x179   :  { %v545_v19 = vadd.f32 %v8434_v60, %v509_v53 }
 0x17b   :  { %6129 = vmatmul.mubr.msk.f32.gmra.mrb[30].mxu0 %vm56_vm0, %v545_v19 }
 0x212   :  { %v8563_v8 = vpop.f32.mrb[0].mxu0 }
 0x213   :  { %889 = vrot.lane.b32.xlu1 %v8563_v8, %s7952_s22  ;;  %v8567_v57 = vpop.f32.mrb[1].mxu0 }
 0x214   :  { %887 = vrot.lane.b32.xlu0 %v8567_v57, %s7952_s22  ;;  %6147 = vmatprep.mubr.msk.f32.mxu1 %vm1111_vm1, %v8567_v57 }
 0x216   :  { %v8573_v18 = vpop.f32.mrb[2].mxu0 }
 0x217   :  { %921 = vrot.lane.b32.xlu1 %v8563_v8, %s7953_s23  ;;  %v8577_v60 = vpop.f32.mrb[3].mxu0 }
 0x218   :  { %919 = vrot.lane.b32.xlu0 %v8567_v57, %s7953_s23 }
 0x21a   :  { %v8581_v55 = vpop.f32.mrb[4].mxu0 }
 0x21b   :  { %893 = vrot.lane.b32.xlu1 %v8573_v18, %s7952_s22  ;;  %v8585_v62 = vpop.f32.mrb[5].mxu0 }
 0x21c   :  { %891 = vrot.lane.b32.xlu0 %v8577_v60, %s7952_s22 }
 0x21e   :  { %v8589_v52 = vpop.f32.mrb[6].mxu0 }
 0x21f   :  { %925 = vrot.lane.b32.xlu1 %v8573_v18, %s7953_s23  ;;  %v8593_v3 = vpop.f32.mrb[7].mxu0 }
 0x220   :  { %923 = vrot.lane.b32.xlu0 %v8577_v60, %s7953_s23 }
 0x222   :  { %v8597_v4 = vpop.f32.mrb[8].mxu0 }
 0x223   :  { %897 = vrot.lane.b32.xlu1 %v8581_v55, %s7952_s22  ;;  %v8601_v43 = vpop.f32.mrb[9].mxu0 }
 0x224   :  { %895 = vrot.lane.b32.xlu0 %v8585_v62, %s7952_s22 }
 0x226   :  { %v8605_v38 = vpop.f32.mrb[10].mxu0 }
 0x227   :  { %901 = vrot.lane.b32.xlu1 %v8589_v52, %s7952_s22  ;;  %v8609_v6 = vpop.f32.mrb[11].mxu0 }
 0x228   :  { %927 = vrot.lane.b32.xlu0 %v8585_v62, %s7953_s23 }
 0x22a   :  { %v8613_v12 = vpop.f32.mrb[12].mxu0 }
 0x22b   :  { %905 = vrot.lane.b32.xlu1 %v8597_v4, %s7952_s22  ;;  %v8617_v26 = vpop.f32.mrb[13].mxu0 }
 0x22c   :  { %899 = vrot.lane.b32.xlu0 %v8593_v3, %s7952_s22 }
 0x22e   :  { %v8621_v14 = vpop.f32.mrb[14].mxu0 }
 0x22f   :  { %937 = vrot.lane.b32.xlu1 %v8597_v4, %s7953_s23  ;;  %v8625_v40 = vpop.f32.mrb[15].mxu0 }
 0x230   :  { %903 = vrot.lane.b32.xlu0 %v8601_v43, %s7952_s22 }
 0x232   :  { %v6109_v11 = vpop.f32.mrb[16].mxu0 }
 0x233   :  { %909 = vrot.lane.b32.xlu1 %v8605_v38, %s7952_s22  ;;  %v792_v58 = vpop.f32.mrb[17].mxu0 }
 0x234   :  { %935 = vrot.lane.b32.xlu0 %v8601_v43, %s7953_s23  ;;  %v8633_v21 = vpack.i.bf16 %v6109_v11, %v792_v58 }
 0x236   :  { %v6112_v9 = vpop.f32.mrb[18].mxu0 }
 0x237   :  { %913 = vrot.lane.b32.xlu1 %v8613_v12, %s7952_s22  ;;  %v802_v56 = vpop.f32.mrb[19].mxu0 }
 0x238   :  { %907 = vrot.lane.b32.xlu0 %v8609_v6, %s7952_s22  ;;  %v8639_v59 = vpack.i.bf16 %v6112_v9, %v802_v56 }
 0x23a   :  { %v6115_v22 = vpop.f32.mrb[20].mxu0 }
 0x23b   :  { %917 = vrot.lane.b32.xlu1 %v8621_v14, %s7952_s22  ;;  %v812_v23 = vpop.f32.mrb[21].mxu0 }
 0x23c   :  { %911 = vrot.lane.b32.xlu0 %v8617_v26, %s7952_s22  ;;  %v8645_v24 = vpack.i.bf16 %v6115_v22, %v812_v23 }
 0x23e   :  { %v6118_v0 = vpop.f32.mrb[22].mxu0 }
 0x23f   :  { %7106 = vrot.lane.b32.xlu1 %v8633_v21, %s7954_s24  ;;  %v822_v41 = vpop.f32.mrb[23].mxu0 }
 0x240   :  { %915 = vrot.lane.b32.xlu0 %v8625_v40, %s7952_s22  ;;  %v8651_v16 = vpack.i.bf16 %v6118_v0, %v822_v41 }
 0x242   :  { %v6121_v30 = vpop.f32.mrb[24].mxu0 }
 0x243   :  { %7116 = vrot.lane.b32.xlu1 %v8633_v21, %s7955_s25  ;;  %v832_v7 = vpop.f32.mrb[25].mxu0 }
 0x244   :  { %7101 = vrot.lane.b32.xlu0 %v8633_v21, %s7952_s22  ;;  %v8657_v61 = vpack.i.bf16 %v6121_v30, %v832_v7 }
 0x246   :  { %v6124_v44 = vpop.f32.mrb[26].mxu0 }
 0x247   :  { %7121 = vrot.lane.b32.xlu1 %v8639_v59, %s7952_s22  ;;  %v842_v27 = vpop.f32.mrb[27].mxu0 }
 0x248   :  { %7111 = vrot.lane.b32.xlu0 %v8633_v21, %s7953_s23  ;;  %v8663_v33 = vpack.i.bf16 %v6124_v44, %v842_v27 }
 0x24a   :  { %v6127_v25 = vpop.f32.mrb[28].mxu0 }
 0x24b   :  { %7126 = vrot.lane.b32.xlu1 %v8639_v59, %s7954_s24  ;;  %v852_v28 = vpop.f32.mrb[29].mxu0 }
 0x24c   :  { %7146 = vrot.lane.b32.xlu0 %v8645_v24, %s7954_s24  ;;  %v8669_v31 = vpack.i.bf16 %v6127_v25, %v852_v28 }
 0x24e   :  { %v6130_v34 = vpop.f32.mrb[30].mxu0 }
 0x24f   :  { %7131 = vrot.lane.b32.xlu1 %v8639_v59, %s7953_s23  ;;  %v862_v32 = vpop.f32.mrb[31].mxu0 }
 0x250   :  { %7156 = vrot.lane.b32.xlu0 %v8645_v24, %s7955_s25  ;;  %v8675_v13 = vpack.i.bf16 %v6130_v34, %v862_v32 }
 0x253   :  { %7136 = vrot.lane.b32.xlu1 %v8639_v59, %s7955_s25 }
 0x254   :  { %7161 = vrot.lane.b32.xlu0 %v8651_v16, %s7952_s22 }
 0x257   :  { %7141 = vrot.lane.b32.xlu1 %v8645_v24, %s7952_s22 }
 0x258   :  { %7171 = vrot.lane.b32.xlu0 %v8651_v16, %s7953_s23 }
 0x25b   :  { %7151 = vrot.lane.b32.xlu1 %v8645_v24, %s7953_s23 }
 0x25c   :  { %7176 = vrot.lane.b32.xlu0 %v8651_v16, %s7955_s25 }
 0x25f   :  { %7166 = vrot.lane.b32.xlu1 %v8651_v16, %s7954_s24 }
 0x260   :  { %7181 = vrot.lane.b32.xlu0 %v8657_v61, %s7952_s22 }
 0x263   :  { %7196 = vrot.lane.b32.xlu1 %v8657_v61, %s7955_s25 }
 0x264   :  { %7186 = vrot.lane.b32.xlu0 %v8657_v61, %s7954_s24 }
 0x267   :  { %7201 = vrot.lane.b32.xlu1 %v8663_v33, %s7952_s22 }
 0x268   :  { %7191 = vrot.lane.b32.xlu0 %v8657_v61, %s7953_s23 }
 0x26b   :  { %7206 = vrot.lane.b32.xlu1 %v8663_v33, %s7954_s24 }
 0x26c   :  { %931 = vrot.lane.b32.xlu0 %v8593_v3, %s7953_s23 }
 0x26f   :  { %7211 = vrot.lane.b32.xlu1 %v8663_v33, %s7953_s23 }
 0x270   :  { %7226 = vrot.lane.b32.xlu0 %v8669_v31, %s7954_s24 }
 0x273   :  { %7216 = vrot.lane.b32.xlu1 %v8663_v33, %s7955_s25 }
 0x274   :  { %7231 = vrot.lane.b32.xlu0 %v8669_v31, %s7953_s23 }
 0x277   :  { %7221 = vrot.lane.b32.xlu1 %v8669_v31, %s7952_s22 }
 0x278   :  { %7236 = vrot.lane.b32.xlu0 %v8669_v31, %s7955_s25 }
 0x27b   :  { %929 = vrot.lane.b32.xlu1 %v8581_v55, %s7953_s23 }
 0x27c   :  { %7241 = vrot.lane.b32.xlu0 %v8675_v13, %s7952_s22 }
 0x27f   :  { %933 = vrot.lane.b32.xlu1 %v8589_v52, %s7953_s23 }
 0x280   :  { %7246 = vrot.lane.b32.xlu0 %v8675_v13, %s7954_s24 }
 0x283   :  { %7256 = vrot.lane.b32.xlu1 %v8675_v13, %s7955_s25 }
 0x284   :  { %7251 = vrot.lane.b32.xlu0 %v8675_v13, %s7953_s23 }
 0x285   :  { %v8729_v39 = vpop.permute.xlu1 %889 }
 0x286   :  { %v888_v42 = vpop.permute.xlu0 %887 }
 0x287   :  { %6203 = vmatprep.mubr.msk.f32.mxu0 %vm1111_vm1, %v888_v42 }
 0x289   :  { %v8732_v1 = vpop.permute.xlu1 %921 }
 0x28a   :  { %v8734_v15 = vpop.permute.xlu0 %919 }
 0x28d   :  { %v8736_v20 = vpop.permute.xlu1 %893 }
 0x28e   :  { %v8738_v45 = vpop.permute.xlu0 %891 }
 0x291   :  { %v8740_v2 = vpop.permute.xlu1 %925 }
 0x292   :  { %10857 = vst [vmem:[#allocation3_spill] sm:$0xff] %v8740_v2  ;;  %v8742_v47 = vpop.permute.xlu0 %923 }
 0x295   :  { %v8744_v48 = vpop.permute.xlu1 %897 }
 0x296   :  { %v8746_v50 = vpop.permute.xlu0 %895 }
 0x299   :  { %v8748_v51 = vpop.permute.xlu1 %901 }
 0x29a   :  { %v8750_v10 = vpop.permute.xlu0 %927 }
 0x29b   :  { %10858 = vst [vmem:[#allocation4_spill] sm:$0xff] %v8750_v10 }
 0x29d   :  { %v8752_v29 = vpop.permute.xlu1 %905 }
 0x29e   :  { %v8754_v49 = vpop.permute.xlu0 %899 }
 0x2a1   :  { %v8756_v36 = vpop.permute.xlu1 %937 }
 0x2a2   :  { %10859 = vst [vmem:[#allocation5_spill] sm:$0xff] %v8756_v36  ;;  %v8758_v63 = vpop.permute.xlu0 %903 }
 0x2a5   :  { %v8760_v37 = vpop.permute.xlu1 %909 }
 0x2a6   :  { %10860 = vst [vmem:[#allocation6_spill] sm:$0xff] %v8760_v37  ;;  %v8762_v35 = vpop.permute.xlu0 %935 }
 0x2a7   :  { %10861 = vst [vmem:[#allocation7_spill] sm:$0xff] %v8762_v35 }
 0x2a9   :  { %v8764_v5 = vpop.permute.xlu1 %913 }
 0x2aa   :  { %10862 = vst [vmem:[#allocation8_spill] sm:$0xff] %v8764_v5  ;;  %v8766_v54 = vpop.permute.xlu0 %907 }
 0x2ad   :  { %v8768_v17 = vpop.permute.xlu1 %917 }
 0x2ae   :  { %10863 = vst [vmem:[#allocation9_spill] sm:$0xff] %v8768_v17  ;;  %v8770_v53 = vpop.permute.xlu0 %911 }
 0x2af   :  { %10864 = vst [vmem:[#allocation10_spill] sm:$0xff] %v8770_v53 }
 0x2b1   :  { %v7107_v19 = vpop.permute.xlu1 %7106 }
 0x2b2   :  { %v8772_v11 = vpop.permute.xlu0 %915  ;;  %v7109_v58 = vunpack.i.h.bf16 %v7107_v19  ;;  %v7108_v9 = vunpack.i.l.bf16 %v7107_v19 }
 0x2b3   :  { %10865 = vst [vmem:[#allocation11_spill] sm:$0xff] %v8772_v11 }
 0x2b4   :  { %v6707_v22 = vpack.c.bf16 %v7109_v58, %v7108_v9 }
 0x2b5   :  { %v8780_v23 = vpop.permute.xlu1 %7116 }
 0x2b6   :  { %6709 = vmatprep.subr.msk.bf16.mxu1 %vm8776_vm2, %v6707_v22  ;;  %v8784_v0 = vpop.permute.xlu0 %7101 }
 0x2b7   :  { %6712 = vmatpush3.bf16.xpose.msk.msra.mxu1 %vm8776_vm2, %v6707_v22  ;;  %7261 = vrot.lane.b32.xlu1 %v8784_v0, %s7954_s24 }
 0x2b9   :  { %v8788_v41 = vpop.permute.xlu1 %7121 }
 0x2ba   :  { %v8790_v30 = vpop.permute.xlu0 %7111 }
 0x2bb   :  { %7266 = vrot.lane.b32.xlu1 %v8790_v30, %s7954_s24 }
 0x2bd   :  { %v7127_v7 = vpop.permute.xlu1 %7126 }
 0x2be   :  { %v7129_v44 = vunpack.i.h.bf16 %v7127_v7  ;;  %v7128_v27 = vunpack.i.l.bf16 %v7127_v7  ;;  %v7147_v25 = vpop.permute.xlu0 %7146 }
 0x2bf   :  { %v7149_v28 = vunpack.i.h.bf16 %v7147_v25  ;;  %v7148_v34 = vunpack.i.l.bf16 %v7147_v25  ;;  %7271 = vrot.lane.b32.xlu1 %v8780_v23, %s7954_s24 }
 0x2c0   :  { %v6713_v32 = vpack.c.bf16 %v7129_v44, %v7128_v27 }
 0x2c1   :  { %v6719_v42 = vpack.c.bf16 %v7149_v28, %v7148_v34  ;;  %v8796_v19 = vpop.permute.xlu1 %7131 }
 0x2c2   :  { %6715 = vmatprep.subr.msk.bf16.mxu1 %vm8776_vm2, %v6713_v32  ;;  %v8800_v58 = vpop.permute.xlu0 %7156  ;;  %7281 = vrot.lane.b32.xlu0 %v8796_v19, %s7954_s24 }
 0x2c3   :  { %6718 = vmatpush3.bf16.xpose.msk.msra.mxu1 %vm8776_vm2, %v6713_v32  ;;  %7276 = vrot.lane.b32.xlu1 %v8788_v41, %s7954_s24 }
 0x2c4   :  { %6721 = vmatprep.subr.msk.bf16.mxu1 %vm8776_vm2, %v6719_v42 }
 0x2c5   :  { %v8808_v9 = vpop.permute.xlu1 %7136 }
 0x2c6   :  { %v8812_v22 = vpop.permute.xlu0 %7161 }
 0x2c7   :  { %7286 = vrot.lane.b32.xlu1 %v8808_v9, %s7954_s24 }
 0x2c9   :  { %v8816_v7 = vpop.permute.xlu1 %7141 }
 0x2ca   :  { %v8818_v44 = vpop.permute.xlu0 %7171  ;;  %7291 = vrot.lane.b32.xlu0 %v8816_v7, %s7954_s24 }
 0x2cb   :  { %6724 = vmatpush3.bf16.xpose.msk.msra.mxu1 %vm8776_vm2, %v6719_v42 }
 0x2cd   :  { %v8824_v27 = vpop.permute.xlu1 %7151 }
 0x2ce   :  { %v8828_v25 = vpop.permute.xlu0 %7176  ;;  %7296 = vrot.lane.b32.xlu0 %v8824_v27, %s7954_s24 }
 0x2cf   :  { %10868 = vst [vmem:[#allocation12_spill] sm:$0xff] %v8828_v25 }
 0x2d1   :  { %v7167_v28 = vpop.permute.xlu1 %7166 }
 0x2d2   :  { %v7169_v34 = vunpack.i.h.bf16 %v7167_v28  ;;  %v7168_v32 = vunpack.i.l.bf16 %v7167_v28  ;;  %v8832_v46 = vpop.permute.xlu0 %7181  ;;  %7301 = vrot.lane.b32.xlu0 %v8800_v58, %s7954_s24 }
 0x2d3   :  { %7321 = vrot.lane.b32.xlu1 %v8832_v46, %s7954_s24 }
 0x2d4   :  { %v6725_v36 = vpack.c.bf16 %v7169_v34, %v7168_v32 }
 0x2d5   :  { %v8834_v42 = vpop.permute.xlu1 %7196 }
 0x2d6   :  { %10869 = vst [vmem:[#allocation13_spill] sm:$0xff] %v8834_v42  ;;  %v7187_v35 = vpop.permute.xlu0 %7186  ;;  %6727 = vmatprep.subr.msk.bf16.mxu1 %vm8776_vm2, %v6725_v36  ;;  %7306 = vrot.lane.b32.xlu0 %v8812_v22, %s7954_s24 }
 0x2d7   :  { %v7189_v17 = vunpack.i.h.bf16 %v7187_v35  ;;  %v7188_v11 = vunpack.i.l.bf16 %v7187_v35  ;;  %6730 = vmatpush3.bf16.xpose.msk.msra.mxu1 %vm8776_vm2, %v6725_v36 }
 0x2d9   :  { %v6731_v28 = vpack.c.bf16 %v7189_v17, %v7188_v11  ;;  %v8844_v5 = vpop.permute.xlu1 %7201 }
 0x2da   :  { %v8846_v34 = vpop.permute.xlu0 %7191  ;;  %7311 = vrot.lane.b32.xlu0 %v8818_v44, %s7954_s24 }
 0x2db   :  { %6733 = vmatprep.subr.msk.bf16.mxu1 %vm8776_vm2, %v6731_v28  ;;  %7326 = vrot.lane.b32.xlu1 %v8846_v34, %s7954_s24 }
 0x2dd   :  { %v7207_v32 = vpop.permute.xlu1 %7206 }
 0x2de   :  { %v7209_v10 = vunpack.i.h.bf16 %v7207_v32  ;;  %v7208_v35 = vunpack.i.l.bf16 %v7207_v32  ;;  %v8852_v2 = vpop.permute.xlu0 %931  ;;  %6148 = vmatmul.mubr.msk.f32.vlgmr.msra.gmra.mrb[0].mxu1 %vm1111_vm1, %v8563_v8  ;;  %7316 = vrot.lane.b32.xlu0 %v8828_v25, %s7954_s24 }
 0x2df   :  { %10870 = vst [vmem:[#allocation14_spill] sm:$0xff] %v8852_v2  ;;  %6150 = vmatprep.mubr.msk.f32.mxu1 %vm1111_vm1, %v8577_v60  ;;  %6736 = vmatpush3.bf16.xpose.msk.msra.mxu1 %vm8776_vm2, %v6731_v28 }
 0x2e0   :  { %v6737_v36 = vpack.c.bf16 %v7209_v10, %v7208_v35  ;;  %7331 = vrot.lane.b32.xlu1 %v8834_v42, %s7954_s24 }
 0x2e1   :  { %v8864_v17 = vpop.permute.xlu1 %7211 }
 0x2e2   :  { %v7227_v11 = vpop.permute.xlu0 %7226  ;;  %6151 = vmatmul.mubr.msk.f32.gmra.mrb[2].mxu1 %vm1111_vm1, %v8573_v18  ;;  %6739 = vmatprep.subr.msk.bf16.mxu1 %vm8776_vm2, %v6737_v36 }
 0x2e3   :  { %v7229_v32 = vunpack.i.h.bf16 %v7227_v11  ;;  %v7228_v2 = vunpack.i.l.bf16 %v7227_v11  ;;  %6153 = vmatprep.mubr.msk.f32.mxu1 %vm1111_vm1, %v8585_v62  ;;  %953 = vrot.lane.b32.xlu0 %v8563_v8, %s7955_s25 }
 0x2e4   :  { %7336 = vrot.lane.b32.xlu1 %v8844_v5, %s7954_s24 }
 0x2e5   :  { %v6743_v10 = vpack.c.bf16 %v7229_v32, %v7228_v2  ;;  %v8876_v28 = vpop.permute.xlu1 %7216 }
 0x2e6   :  { %10871 = vst [vmem:[#allocation15_spill] sm:$0xff] %v8876_v28  ;;  %v8878_v35 = vpop.permute.xlu0 %7231  ;;  %6154 = vmatmul.mubr.msk.f32.gmra.mrb[4].mxu1 %vm1111_vm1, %v8581_v55 }
 0x2e7   :  { %6156 = vmatprep.mubr.msk.f32.mxu1 %vm1111_vm1, %v8593_v3  ;;  %6742 = vmatpush3.bf16.xpose.msk.msra.mxu1 %vm8776_vm2, %v6737_v36 }
 0x2e8   :  { %6745 = vmatprep.subr.msk.bf16.mxu1 %vm8776_vm2, %v6743_v10  ;;  %951 = vrot.lane.b32.xlu1 %v8567_v57, %s7955_s25 }
 0x2e9   :  { %v8892_v2 = vpop.permute.xlu1 %7221 }
 0x2ea   :  { %v8894_v11 = vpop.permute.xlu0 %7236  ;;  %6157 = vmatmul.mubr.msk.f32.gmra.mrb[6].mxu1 %vm1111_vm1, %v8589_v52  ;;  %7351 = vrot.lane.b32.xlu0 %v8892_v2, %s7954_s24 }
 0x2eb   :  { %10872 = vst [vmem:[#allocation16_spill] sm:$0xff] %v8894_v11  ;;  %6175 = vmatprep.mubr.msk.f32.mxu1 %vm1111_vm1, %v8601_v43 }
 0x2ec   :  { %7341 = vrot.lane.b32.xlu1 %v8864_v17, %s7954_s24 }
 0x2ed   :  { %v8902_v8 = vpop.permute.xlu1 %929 }
 0x2ee   :  { %10873 = vst [vmem:[#allocation17_spill] sm:$0xff] %v8902_v8  ;;  %v8904_v36 = vpop.permute.xlu0 %7241  ;;  %7356 = vrot.lane.b32.xlu0 %v8878_v35, %s7954_s24 }
 0x2ef   :  { %6748 = vmatpush3.bf16.xpose.msk.msra.mxu1 %vm8776_vm2, %v6743_v10 }
 0x2f0   :  { %7346 = vrot.lane.b32.xlu1 %v8876_v28, %s7954_s24 }
 0x2f1   :  { %v8912_v32 = vpop.permute.xlu1 %933 }
 0x2f2   :  { %v7247_v42 = vpop.permute.xlu0 %7246  ;;  %7361 = vrot.lane.b32.xlu0 %v8894_v11, %s7954_s24 }
 0x2f3   :  { %v7249_v57 = vunpack.i.h.bf16 %v7247_v42  ;;  %v7248_v25 = vunpack.i.l.bf16 %v7247_v42 }
 0x2f4   :  { %7366 = vrot.lane.b32.xlu1 %v8904_v36, %s7954_s24 }
 0x2f5   :  { %v6749_v8 = vpack.c.bf16 %v7249_v57, %v7248_v25  ;;  %v8918_v53 = vpop.permute.xlu1 %7256 }
 0x2f6   :  { %10874 = vst [vmem:[#allocation18_spill] sm:$0xff] %v8918_v53  ;;  %v8920_v37 = vpop.permute.xlu0 %7251  ;;  %955 = vrot.lane.b32.xlu0 %v8577_v60, %s7955_s25 }
 0x2f7   :  { %10875 = vst [vmem:[#allocation19_spill] sm:$0xff] %v8920_v37  ;;  %6751 = vmatprep.subr.msk.bf16.mxu1 %vm8776_vm2, %v6749_v8 }
 0x2f8   :  { %6754 = vmatpush3.bf16.xpose.msk.msra.mxu1 %vm8776_vm2, %v6749_v8  ;;  %939 = vrot.lane.b32.xlu1 %v8609_v6, %s7953_s23 }
 0x2fa   :  { %957 = vrot.lane.b32.xlu0 %v8573_v18, %s7955_s25 }
 0x2fc   :  { %941 = vrot.lane.b32.xlu1 %v8605_v38, %s7953_s23 }
 0x2fe   :  { %943 = vrot.lane.b32.xlu0 %v8617_v26, %s7953_s23 }
 0x2ff   :  { %6176 = vmatmul.mubr.msk.f32.vlgmr.msra.gmra.mrb[8].mxu1 %vm1111_vm1, %v8597_v4 }
 0x300   :  { %6178 = vmatprep.mubr.msk.f32.mxu1 %vm1111_vm1, %v8609_v6  ;;  %959 = vrot.lane.b32.xlu1 %v8585_v62, %s7955_s25 }
 0x302   :  { %945 = vrot.lane.b32.xlu0 %v8613_v12, %s7953_s23 }
 0x303   :  { %6179 = vmatmul.mubr.msk.f32.gmra.mrb[10].mxu1 %vm1111_vm1, %v8605_v38 }
 0x304   :  { %6181 = vmatprep.mubr.msk.f32.mxu1 %vm1111_vm1, %v8617_v26  ;;  %961 = vrot.lane.b32.xlu1 %v8581_v55, %s7955_s25 }
 0x306   :  { %947 = vrot.lane.b32.xlu0 %v8625_v40, %s7953_s23 }
 0x307   :  { %6182 = vmatmul.mubr.msk.f32.gmra.mrb[12].mxu1 %vm1111_vm1, %v8613_v12 }
 0x308   :  { %6184 = vmatprep.mubr.msk.f32.mxu1 %vm1111_vm1, %v8625_v40  ;;  %963 = vrot.lane.b32.xlu1 %v8593_v3, %s7955_s25 }
 0x30a   :  { %949 = vrot.lane.b32.xlu0 %v8621_v14, %s7953_s23 }
 0x30b   :  { %6185 = vmatmul.mubr.msk.f32.gmra.mrb[14].mxu1 %vm1111_vm1, %v8621_v14 }
 0x30c   :  { %6231 = vmatprep.mubr.msk.f32.mxu1 %vm1111_vm1, %v8758_v63  ;;  %965 = vrot.lane.b32.xlu1 %v8589_v52, %s7955_s25 }
 0x30e   :  { %967 = vrot.lane.b32.xlu0 %v8601_v43, %s7955_s25 }
 0x310   :  { %969 = vrot.lane.b32.xlu1 %v8597_v4, %s7955_s25 }
 0x312   :  { %971 = vrot.lane.b32.xlu0 %v8609_v6, %s7955_s25 }
 0x314   :  { %973 = vrot.lane.b32.xlu1 %v8605_v38, %s7955_s25 }
 0x316   :  { %7371 = vrot.lane.b32.xlu0 %v8920_v37, %s7954_s24 }
 0x318   :  { %977 = vrot.lane.b32.xlu1 %v8613_v12, %s7955_s25 }
 0x31a   :  { %975 = vrot.lane.b32.xlu0 %v8617_v26, %s7955_s25 }
 0x31c   :  { %981 = vrot.lane.b32.xlu1 %v8621_v14, %s7955_s25 }
 0x31e   :  { %979 = vrot.lane.b32.xlu0 %v8625_v40, %s7955_s25 }
 0x320   :  { %7381 = vrot.lane.b32.xlu1 %v8639_v59, %s7956_s26 }
 0x322   :  { %7376 = vrot.lane.b32.xlu0 %v8633_v21, %s7956_s26 }
 0x324   :  { %7391 = vrot.lane.b32.xlu1 %v8651_v16, %s7956_s26 }
 0x326   :  { %7386 = vrot.lane.b32.xlu0 %v8645_v24, %s7956_s26 }
 0x328   :  { %7401 = vrot.lane.b32.xlu1 %v8784_v0, %s7956_s26 }
 0x329   :  { %v7262_v18 = vpop.permute.xlu1 %7261 }
 0x32a   :  { %v7264_v60 = vunpack.i.h.bf16 %v7262_v18  ;;  %v7263_v55 = vunpack.i.l.bf16 %v7262_v18  ;;  %7396 = vrot.lane.b32.xlu0 %v8657_v61, %s7956_s26 }
 0x32c   :  { %v6755_v62 = vpack.c.bf16 %v7264_v60, %v7263_v55  ;;  %7411 = vrot.lane.b32.xlu1 %v8788_v41, %s7956_s26 }
 0x32d   :  { %v7267_v52 = vpop.permute.xlu1 %7266 }
 0x32e   :  { %7406 = vrot.lane.b32.xlu0 %v8663_v33, %s7956_s26  ;;  %6757 = vmatprep.subr.msk.bf16.mxu0 %vm8776_vm2, %v6755_v62  ;;  %v7269_v63 = vunpack.i.h.bf16 %v7267_v52 }
 0x32f   :  { %6760 = vmatpush3.bf16.xpose.msk.msra.mxu0 %vm8776_vm2, %v6755_v62 }
 0x330   :  { %7421 = vrot.lane.b32.xlu1 %v8816_v7, %s7956_s26 }
 0x331   :  { %v9010_v3 = vpop.permute.xlu1 %7271 }
 0x332   :  { %7416 = vrot.lane.b32.xlu0 %v8669_v31, %s7956_s26 }
 0x334   :  { %7431 = vrot.lane.b32.xlu1 %v8918_v53, %s7954_s24  ;;  %v7282_v6 = vpop.permute.xlu0 %7281 }
 0x335   :  { %v7277_v4 = vpop.permute.xlu1 %7276 }
 0x336   :  { %v7279_v43 = vunpack.i.h.bf16 %v7277_v4  ;;  %v7278_v38 = vunpack.i.l.bf16 %v7277_v4  ;;  %7426 = vrot.lane.b32.xlu0 %v8675_v13, %s7956_s26 }
 0x338   :  { %v6761_v12 = vpack.c.bf16 %v7279_v43, %v7278_v38  ;;  %7436 = vrot.lane.b32.xlu1 %v8812_v22, %s7956_s26 }
 0x339   :  { %v9032_v59 = vpop.permute.xlu1 %7286 }
 0x33a   :  { %7441 = vrot.lane.b32.xlu0 %v8832_v46, %s7956_s26  ;;  %6763 = vmatprep.subr.msk.bf16.mxu0 %vm8776_vm2, %v6761_v12 }
 0x33b   :  { %6766 = vmatpush3.bf16.xpose.msk.msra.mxu0 %vm8776_vm2, %v6761_v12  ;;  %v7273_v12 = vunpack.i.l.bf16 %v9010_v3 }
 0x33c   :  { %7446 = vrot.lane.b32.xlu1 %v8790_v30, %s7956_s26  ;;  %v7292_v26 = vpop.permute.xlu0 %7291 }
 0x33d   :  { %v7294_v14 = vunpack.i.h.bf16 %v7292_v26  ;;  %v7293_v40 = vunpack.i.l.bf16 %v7292_v26 }
 0x33e   :  { %7451 = vrot.lane.b32.xlu0 %v8844_v5, %s7956_s26  ;;  %v7268_v5 = vunpack.i.l.bf16 %v7267_v52 }
 0x33f   :  { %v6767_v21 = vpack.c.bf16 %v7294_v14, %v7293_v40 }
 0x340   :  { %7456 = vrot.lane.b32.xlu1 %v8796_v19, %s7956_s26  ;;  %v7297_v46 = vpop.permute.xlu0 %7296  ;;  %v6803_v22 = vpack.c.bf16 %v7269_v63, %v7268_v5 }
 0x341   :  { %6769 = vmatprep.subr.msk.bf16.mxu0 %vm8776_vm2, %v6767_v21 }
 0x342   :  { %7461 = vrot.lane.b32.xlu0 %v8892_v2, %s7956_s26 }
 0x343   :  { %6772 = vmatpush3.bf16.xpose.msk.msra.mxu0 %vm8776_vm2, %v6767_v21 }
 0x344   :  { %7466 = vrot.lane.b32.xlu1 %v8824_v27, %s7956_s26  ;;  %v9042_v24 = vpop.permute.xlu0 %7301 }
 0x345   :  { %v7322_v16 = vpop.permute.xlu1 %7321 }
 0x346   :  { %v7324_v61 = vunpack.i.h.bf16 %v7322_v16  ;;  %v7323_v33 = vunpack.i.l.bf16 %v7322_v16  ;;  %7476 = vrot.lane.b32.xlu0 %v8846_v34, %s7956_s26 }
 0x348   :  { %v6779_v31 = vpack.c.bf16 %v7324_v61, %v7323_v33  ;;  %7471 = vrot.lane.b32.xlu1 %v8818_v44, %s7956_s26  ;;  %v7307_v13 = vpop.permute.xlu0 %7306  ;;  %v7284_v44 = vunpack.i.h.bf16 %v7282_v6 }
 0x349   :  { %v7309_v0 = vunpack.i.h.bf16 %v7307_v13  ;;  %v7308_v41 = vunpack.i.l.bf16 %v7307_v13  ;;  %v7288_v13 = vunpack.i.l.bf16 %v9032_v59 }
 0x34a   :  { %7486 = vrot.lane.b32.xlu0 %v8864_v17, %s7956_s26  ;;  %6781 = vmatprep.subr.msk.bf16.mxu1 %vm8776_vm2, %v6779_v31 }
 0x34b   :  { %v6773_v30 = vpack.c.bf16 %v7309_v0, %v7308_v41  ;;  %6784 = vmatpush3.bf16.xpose.msk.msra.mxu1 %vm8776_vm2, %v6779_v31  ;;  %v7289_v31 = vunpack.i.h.bf16 %v9032_v59 }
 0x34c   :  { %7481 = vrot.lane.b32.xlu1 %v8780_v23, %s7956_s26  ;;  %v7312_v19 = vpop.permute.xlu0 %7311  ;;  %v7283_v23 = vunpack.i.l.bf16 %v7282_v6 }
 0x34d   :  { %6775 = vmatprep.subr.msk.bf16.mxu0 %vm8776_vm2, %v6773_v30  ;;  %v7327_v7 = vpop.permute.xlu1 %7326  ;;  %v7314_v60 = vunpack.i.h.bf16 %v7312_v19  ;;  %v7313_v55 = vunpack.i.l.bf16 %v7312_v19  ;;  %v6857_v41 = vpack.c.bf16 %v7289_v31, %v7288_v13  ;;  %v10877_v19 = vld [vmem:[#allocation10_spill] sm:$0xff]  ;;  %v10886_v31 = vld [vmem:[#allocation5_spill] sm:$0xff] }
 0x34e   :  { %7496 = vrot.lane.b32.xlu0 %v8878_v35, %s7956_s26  ;;  %6778 = vmatpush3.bf16.xpose.msk.msra.mxu0 %vm8776_vm2, %v6773_v30  ;;  %v6809_v42 = vpack.c.bf16 %v7284_v44, %v7283_v23  ;;  %v7299_v35 = vunpack.i.h.bf16 %v7297_v46  ;;  %v7329_v4 = vunpack.i.h.bf16 %v7327_v7  ;;  %v10876_v30 = vld [vmem:[#allocation6_spill] sm:$0xff]  ;;  %v10879_v23 = vld [vmem:[#allocation4_spill] sm:$0xff] }
 0x34f   :  { %6805 = vmatprep.subr.msk.bf16.mxu0 %vm8776_vm2, %v6803_v22  ;;  %v6821_v62 = vpack.c.bf16 %v7314_v60, %v7313_v55 }
 0x350   :  { %7491 = vrot.lane.b32.xlu1 %v8808_v9, %s7956_s26  ;;  %v9066_v27 = vpop.permute.xlu0 %7316 }
 0x352   :  { %v9068_v25 = vpop.permute.xlu1 %7331  ;;  %7506 = vrot.lane.b32.xlu0 %v8904_v36, %s7956_s26 }
 0x354   :  { %7501 = vrot.lane.b32.xlu1 %v8800_v58, %s7956_s26  ;;  %v7298_v58 = vunpack.i.l.bf16 %v7297_v46 }
 0x355   :  { %6204 = vmatmul.mubr.msk.f32.vlgmr.msra.gmra.mrb[32].mxu0 %vm1111_vm1, %v8729_v39  ;;  %v9082_v10 = vpop.permute.xlu0 %953 }
 0x356   :  { %v7337_v34 = vpop.permute.xlu1 %7336  ;;  %6206 = vmatprep.mubr.msk.f32.mxu0 %vm1111_vm1, %v8738_v45  ;;  %6808 = vmatpush3.bf16.xpose.msk.msra.mxu0 %vm8776_vm2, %v6803_v22  ;;  %v6815_v8 = vpack.c.bf16 %v7299_v35, %v7298_v58  ;;  %v7304_v22 = vunpack.i.h.bf16 %v9042_v24  ;;  %v10882_v35 = vld [vmem:[#allocation17_spill] sm:$0xff] }
 0x357   :  { %v7339_v9 = vunpack.i.h.bf16 %v7337_v34  ;;  %v7338_v17 = vunpack.i.l.bf16 %v7337_v34  ;;  %6811 = vmatprep.subr.msk.bf16.mxu0 %vm8776_vm2, %v6809_v42  ;;  %v10880_v34 = vld [vmem:[#allocation8_spill] sm:$0xff] }
 0x359   :  { %v6785_v2 = vpack.c.bf16 %v7339_v9, %v7338_v17  ;;  %6207 = vmatmul.mubr.msk.f32.gmra.mrb[34].mxu0 %vm1111_vm1, %v8736_v20  ;;  %v10881_v9 = vld [vmem:[#allocation11_spill] sm:$0xff] }
 0x35a   :  { %v9086_v39 = vpop.permute.xlu1 %951  ;;  %6209 = vmatprep.mubr.msk.f32.mxu0 %vm1111_vm1, %v8746_v50 }
 0x35b   :  { %6787 = vmatprep.subr.msk.bf16.mxu1 %vm8776_vm2, %v6785_v2 }
 0x35c   :  { %6790 = vmatpush3.bf16.xpose.msk.msra.mxu1 %vm8776_vm2, %v6785_v2  ;;  %v7352_v45 = vpop.permute.xlu0 %7351  ;;  %v10883_v2 = vld [vmem:[#allocation14_spill] sm:$0xff] }
 0x35d   :  { %v7354_v36 = vunpack.i.h.bf16 %v7352_v45  ;;  %v7353_v57 = vunpack.i.l.bf16 %v7352_v45  ;;  %6210 = vmatmul.mubr.msk.f32.gmra.mrb[36].mxu0 %vm1111_vm1, %v8744_v48  ;;  %v10884_v45 = vld [vmem:[#allocation9_spill] sm:$0xff] }
 0x35e   :  { %v7342_v18 = vpop.permute.xlu1 %7341  ;;  %6212 = vmatprep.mubr.msk.f32.mxu0 %vm1111_vm1, %v8754_v49  ;;  %6814 = vmatpush3.bf16.xpose.msk.msra.mxu0 %vm8776_vm2, %v6809_v42 }
 0x35f   :  { %v6791_v20 = vpack.c.bf16 %v7354_v36, %v7353_v57  ;;  %6817 = vmatprep.subr.msk.bf16.mxu0 %vm8776_vm2, %v6815_v8  ;;  %v7343_v61 = vunpack.i.l.bf16 %v7342_v18  ;;  %v7319_v57 = vunpack.i.h.bf16 %v9066_v27 }
 0x360   :  { %v7357_v50 = vpop.permute.xlu0 %7356 }
 0x361   :  { %6213 = vmatmul.mubr.msk.f32.gmra.mrb[38].mxu0 %vm1111_vm1, %v8748_v51  ;;  %6793 = vmatprep.subr.msk.bf16.mxu1 %vm8776_vm2, %v6791_v20  ;;  %v7328_v51 = vunpack.i.l.bf16 %v7327_v7  ;;  %v10878_v7 = vld [vmem:[#allocation3_spill] sm:$0xff] }
 0x362   :  { %v9106_v48 = vpop.permute.xlu1 %7346  ;;  %6259 = vmatprep.mubr.msk.f32.mxu0 %vm1111_vm1, %v8734_v15  ;;  %v7274_v15 = vunpack.i.h.bf16 %v9010_v3  ;;  %v7344_v3 = vunpack.i.h.bf16 %v7342_v18  ;;  %v7318_v18 = vunpack.i.l.bf16 %v9066_v27  ;;  %v7334_v27 = vunpack.i.h.bf16 %v9068_v25 }
 0x363   :  { %v6827_v40 = vpack.c.bf16 %v7329_v4, %v7328_v51 }
 0x364   :  { %6796 = vmatpush3.bf16.xpose.msk.msra.mxu1 %vm8776_vm2, %v6791_v20  ;;  %v9112_v49 = vpop.permute.xlu0 %7361  ;;  %v6851_v46 = vpack.c.bf16 %v7274_v15, %v7273_v12  ;;  %v6833_v5 = vpack.c.bf16 %v7344_v3, %v7343_v61  ;;  %v6869_v60 = vpack.c.bf16 %v7319_v57, %v7318_v18  ;;  %v7349_v12 = vunpack.i.h.bf16 %v9106_v48 }
 0x366   :  { %v7367_v52 = vpop.permute.xlu1 %7366  ;;  %6820 = vmatpush3.bf16.xpose.msk.msra.mxu0 %vm8776_vm2, %v6815_v8  ;;  %v10885_v8 = vld [vmem:[#allocation7_spill] sm:$0xff] }
 0x367   :  { %v7369_v43 = vunpack.i.h.bf16 %v7367_v52  ;;  %v7368_v38 = vunpack.i.l.bf16 %v7367_v52  ;;  %6823 = vmatprep.subr.msk.bf16.mxu0 %vm8776_vm2, %v6821_v62 }
 0x368   :  { %v9118_v6 = vpop.permute.xlu0 %955 }
 0x369   :  { %v6797_v26 = vpack.c.bf16 %v7369_v43, %v7368_v38 }
 0x36a   :  { %v9122_v14 = vpop.permute.xlu1 %939 }
 0x36b   :  { %6799 = vmatprep.subr.msk.bf16.mxu1 %vm8776_vm2, %v6797_v26 }
 0x36c   :  { %6802 = vmatpush3.bf16.xpose.msk.msra.mxu1 %vm8776_vm2, %v6797_v26  ;;  %v9128_v21 = vpop.permute.xlu0 %957  ;;  %v7348_v26 = vunpack.i.l.bf16 %v9106_v48 }
 0x36d   :  { %6829 = vmatprep.subr.msk.bf16.mxu1 %vm8776_vm2, %v6827_v40 }
 0x36e   :  { %v9132_v16 = vpop.permute.xlu1 %941  ;;  %6826 = vmatpush3.bf16.xpose.msk.msra.mxu0 %vm8776_vm2, %v6821_v62  ;;  %v7333_v62 = vunpack.i.l.bf16 %v9068_v25  ;;  %v6881_v13 = vpack.c.bf16 %v7349_v12, %v7348_v26 }
 0x36f   :  { %6853 = vmatprep.subr.msk.bf16.mxu0 %vm8776_vm2, %v6851_v46 }
 0x370   :  { %v9138_v33 = vpop.permute.xlu0 %943  ;;  %v6875_v38 = vpack.c.bf16 %v7334_v27, %v7333_v62 }
 0x372   :  { %v9142_v63 = vpop.permute.xlu1 %959 }
 0x373   :  { %6232 = vmatmul.mubr.msk.f32.vlgmr.msra.gmra.mrb[16].mxu1 %vm1111_vm1, %v8752_v29  ;;  %v7359_v29 = vunpack.i.h.bf16 %v7357_v50 }
 0x374   :  { %6234 = vmatprep.mubr.msk.f32.mxu1 %vm1111_vm1, %v8766_v54  ;;  %6832 = vmatpush3.bf16.xpose.msk.msra.mxu1 %vm8776_vm2, %v6827_v40  ;;  %v9150_v0 = vpop.permute.xlu0 %945  ;;  %v7358_v54 = vunpack.i.l.bf16 %v7357_v50 }
 0x375   :  { %6835 = vmatprep.subr.msk.bf16.mxu1 %vm8776_vm2, %v6833_v5  ;;  %6260 = vmatmul.mubr.msk.f32.vlgmr.msra.gmra.mrb[40].mxu0 %vm1111_vm1, %v8732_v1 }
 0x376   :  { %v9156_v59 = vpop.permute.xlu1 %961  ;;  %6262 = vmatprep.mubr.msk.f32.mxu0 %vm1111_vm1, %v8742_v47  ;;  %6856 = vmatpush3.bf16.xpose.msk.msra.mxu0 %vm8776_vm2, %v6851_v46  ;;  %v7303_v47 = vunpack.i.l.bf16 %v9042_v24  ;;  %v6839_v42 = vpack.c.bf16 %v7359_v29, %v7358_v54 }
 0x377   :  { %6235 = vmatmul.mubr.msk.f32.gmra.mrb[18].mxu1 %vm1111_vm1, %v10876_v30  ;;  %6859 = vmatprep.subr.msk.bf16.mxu0 %vm8776_vm2, %v6857_v41 }
 0x378   :  { %6237 = vmatprep.mubr.msk.f32.mxu1 %vm1111_vm1, %v10877_v19  ;;  %v9168_v1 = vpop.permute.xlu0 %947  ;;  %v6863_v24 = vpack.c.bf16 %v7304_v22, %v7303_v47 }
 0x379   :  { %6263 = vmatmul.mubr.msk.f32.gmra.mrb[42].mxu0 %vm1111_vm1, %v10878_v7 }
 0x37a   :  { %v9174_v44 = vpop.permute.xlu1 %963  ;;  %6265 = vmatprep.mubr.msk.f32.mxu0 %vm1111_vm1, %v10879_v23 }
 0x37b   :  { %6238 = vmatmul.mubr.msk.f32.gmra.mrb[20].mxu1 %vm1111_vm1, %v10880_v34 }
 0x37c   :  { %6240 = vmatprep.mubr.msk.f32.mxu1 %vm1111_vm1, %v10881_v9  ;;  %6838 = vmatpush3.bf16.xpose.msk.msra.mxu1 %vm8776_vm2, %v6833_v5  ;;  %v9184_v17 = vpop.permute.xlu0 %949 }
 0x37d   :  { %6841 = vmatprep.subr.msk.bf16.mxu1 %vm8776_vm2, %v6839_v42  ;;  %6266 = vmatmul.mubr.msk.f32.gmra.mrb[44].mxu0 %vm1111_vm1, %v10882_v35 }
 0x37e   :  { %v9190_v58 = vpop.permute.xlu1 %965  ;;  %6268 = vmatprep.mubr.msk.f32.mxu0 %vm1111_vm1, %v10883_v2  ;;  %6862 = vmatpush3.bf16.xpose.msk.msra.mxu0 %vm8776_vm2, %v6857_v41 }
 0x37f   :  { %6241 = vmatmul.mubr.msk.f32.gmra.mrb[22].mxu1 %vm1111_vm1, %v10884_v45  ;;  %6865 = vmatprep.subr.msk.bf16.mxu0 %vm8776_vm2, %v6863_v24 }
 0x380   :  { %6287 = vmatprep.mubr.msk.f32.mxu1 %vm1111_vm1, %v10885_v8  ;;  %v9202_v36 = vpop.permute.xlu0 %967 }
 0x381   :  { %6269 = vmatmul.mubr.msk.f32.gmra.mrb[46].mxu0 %vm1111_vm1, %v8912_v32 }
 0x382   :  { %v9208_v20 = vpop.permute.xlu1 %969  ;;  %6315 = vmatprep.mubr.msk.f32.mxu0 %vm1111_vm1, %v9086_v39 }
 0x384   :  { %6844 = vmatpush3.bf16.xpose.msk.msra.mxu1 %vm8776_vm2, %v6839_v42  ;;  %v9214_v50 = vpop.permute.xlu0 %971 }
 0x386   :  { %v9216_v55 = vpop.permute.xlu1 %973  ;;  %6868 = vmatpush3.bf16.xpose.msk.msra.mxu0 %vm8776_vm2, %v6863_v24 }
 0x387   :  { %6871 = vmatprep.subr.msk.bf16.mxu0 %vm8776_vm2, %v6869_v60 }
 0x388   :  { %v7372_v32 = vpop.permute.xlu0 %7371 }
 0x389   :  { %v7374_v39 = vunpack.i.h.bf16 %v7372_v32  ;;  %v7373_v52 = vunpack.i.l.bf16 %v7372_v32 }
 0x38a   :  { %v9224_v4 = vpop.permute.xlu1 %977 }
 0x38b   :  { %v6845_v51 = vpack.c.bf16 %v7374_v39, %v7373_v52 }
 0x38c   :  { %v9226_v43 = vpop.permute.xlu0 %975 }
 0x38d   :  { %6847 = vmatprep.subr.msk.bf16.mxu1 %vm8776_vm2, %v6845_v51 }
 0x38e   :  { %v9230_v15 = vpop.permute.xlu1 %981  ;;  %6850 = vmatpush3.bf16.xpose.msk.msra.mxu1 %vm8776_vm2, %v6845_v51  ;;  %6874 = vmatpush3.bf16.xpose.msk.msra.mxu0 %vm8776_vm2, %v6869_v60 }
 0x38f   :  { %6877 = vmatprep.subr.msk.bf16.mxu1 %vm8776_vm2, %v6875_v38 }
 0x390   :  { %v9238_v25 = vpop.permute.xlu0 %979 }
 0x392   :  { %v7382_v40 = vpop.permute.xlu1 %7381 }
 0x393   :  { %v7384_v5 = vunpack.i.h.bf16 %v7382_v40  ;;  %v7383_v41 = vunpack.i.l.bf16 %v7382_v40 }
 0x394   :  { %v7377_v46 = vpop.permute.xlu0 %7376 }
 0x395   :  { %v7379_v3 = vunpack.i.h.bf16 %v7377_v46  ;;  %v7378_v61 = vunpack.i.l.bf16 %v7377_v46  ;;  %6288 = vmatmul.mubr.msk.f32.vlgmr.msra.gmra.mrb[24].mxu1 %vm1111_vm1, %v10886_v31  ;;  %6316 = vmatmul.mubr.msk.f32.vlgmr.msra.gmra.mrb[48].mxu0 %vm1111_vm1, %v9082_v10  ;;  %v7364_v10 = vunpack.i.h.bf16 %v9112_v49  ;;  %v6903_v22 = vpack.c.bf16 %v7384_v5, %v7383_v41 }
 0x396   :  { %v7392_v29 = vpop.permute.xlu1 %7391  ;;  %6290 = vmatprep.mubr.msk.f32.mxu1 %vm1111_vm1, %v9122_v14  ;;  %6318 = vmatprep.mubr.msk.f32.mxu0 %vm1111_vm1, %v9118_v6  ;;  %v7363_v14 = vunpack.i.l.bf16 %v9112_v49 }
 0x397   :  { %6880 = vmatpush3.bf16.xpose.msk.msra.mxu1 %vm8776_vm2, %v6875_v38  ;;  %v6899_v48 = vpack.c.bf16 %v7379_v3, %v7378_v61 }
 0x398   :  { %6883 = vmatprep.subr.msk.bf16.mxu1 %vm8776_vm2, %v6881_v13  ;;  %v7387_v54 = vpop.permute.xlu0 %7386  ;;  %v6887_v49 = vpack.c.bf16 %v7364_v10, %v7363_v14 }
 0x399   :  { %6291 = vmatmul.mubr.msk.f32.gmra.mrb[26].mxu1 %vm1111_vm1, %v9132_v16  ;;  %6319 = vmatmul.mubr.msk.f32.gmra.mrb[50].mxu0 %vm1111_vm1, %v9128_v21  ;;  %v7389_v30 = vunpack.i.h.bf16 %v7387_v54  ;;  %v7388_v6 = vunpack.i.l.bf16 %v7387_v54  ;;  %v7394_v21 = vunpack.i.h.bf16 %v7392_v29  ;;  %v7393_v16 = vunpack.i.l.bf16 %v7392_v29 }
 0x39a   :  { %v7402_v19 = vpop.permute.xlu1 %7401  ;;  %6900 = vmatprep.subr.bf16.mxu0 %v6899_v48  ;;  %6293 = vmatprep.mubr.msk.f32.mxu1 %vm1111_vm1, %v9138_v33 }
 0x39b   :  { %6321 = vmatprep.mubr.msk.f32.mxu0 %vm1111_vm1, %v9142_v63  ;;  %6902 = vmatpush3.bf16.msra.mxu0 %v6899_v48  ;;  %v6907_v33 = vpack.c.bf16 %v7389_v30, %v7388_v6  ;;  %v6911_v7 = vpack.c.bf16 %v7394_v21, %v7393_v16  ;;  %v7403_v24 = vunpack.i.l.bf16 %v7402_v19 }
 0x39c   :  { %6904 = vmatprep.subr.bf16.mxu0 %v6903_v22  ;;  %v7397_v63 = vpop.permute.xlu0 %7396 }
 0x39d   :  { %6294 = vmatmul.mubr.msk.f32.gmra.mrb[28].mxu1 %vm1111_vm1, %v9150_v0  ;;  %6322 = vmatmul.mubr.msk.f32.gmra.mrb[52].mxu0 %vm1111_vm1, %v9156_v59  ;;  %v7399_v0 = vunpack.i.h.bf16 %v7397_v63  ;;  %v7398_v59 = vunpack.i.l.bf16 %v7397_v63 }
 0x39e   :  { %v7412_v47 = vpop.permute.xlu1 %7411  ;;  %6296 = vmatprep.mubr.msk.f32.mxu1 %vm1111_vm1, %v9168_v1  ;;  %6324 = vmatprep.mubr.msk.f32.mxu0 %vm1111_vm1, %v9174_v44 }
 0x39f   :  { %6886 = vmatpush3.bf16.xpose.msk.msra.mxu1 %vm8776_vm2, %v6881_v13  ;;  %6906 = vmatpush3.bf16.msra.mxu0 %v6903_v22  ;;  %v9282_v23 = vpack.c.bf16 %v7399_v0, %v7398_v59  ;;  %v7414_v57 = vunpack.i.h.bf16 %v7412_v47  ;;  %v7413_v18 = vunpack.i.l.bf16 %v7412_v47 }
 0x3a0   :  { %6889 = vmatprep.subr.msk.bf16.mxu1 %vm8776_vm2, %v6887_v49  ;;  %6908 = vmatprep.subr.bf16.mxu0 %v6907_v33 }
 0x3a1   :  { %6297 = vmatmul.mubr.msk.f32.gmra.mrb[30].mxu1 %vm1111_vm1, %v9184_v17  ;;  %6325 = vmatmul.mubr.msk.f32.gmra.mrb[54].mxu0 %vm1111_vm1, %v9190_v58  ;;  %v7404_v17 = vunpack.i.h.bf16 %v7402_v19  ;;  %v6935_v38 = vpack.c.bf16 %v7414_v57, %v7413_v18 }
 0x3a2   :  { %v7422_v1 = vpop.permute.xlu1 %7421  ;;  %6343 = vmatprep.mubr.msk.f32.mxu1 %vm1111_vm1, %v9202_v36 }
 0x3a3   :  { %6910 = vmatpush3.bf16.msra.mxu0 %v6907_v33  ;;  %v6931_v45 = vpack.c.bf16 %v7404_v17, %v7403_v24  ;;  %v7424_v56 = vunpack.i.h.bf16 %v7422_v1  ;;  %v7423_v39 = vunpack.i.l.bf16 %v7422_v1  ;;  %v9372_v33 = vpop.permute.xlu0 %7406 }
 0x3a4   :  { %6912 = vmatprep.subr.bf16.mxu0 %v6911_v7 }
 0x3a6   :  { %v7432_v44 = vpop.permute.xlu1 %7431 }
 0x3a7   :  { %v7434_v42 = vunpack.i.h.bf16 %v7432_v44  ;;  %v7433_v34 = vunpack.i.l.bf16 %v7432_v44  ;;  %6892 = vmatpush3.bf16.xpose.msk.msra.mxu1 %vm8776_vm2, %v6887_v49  ;;  %6914 = vmatpush3.bf16.msra.mxu0 %v6911_v7  ;;  %v9374_v63 = vpop.permute.xlu0 %7416 }
 0x3a8   :  { %6916 = vmatprep.subr.bf16.mxu0 %v9282_v23 }
 0x3a9   :  { %v6893_v9 = vpack.c.bf16 %v7434_v42, %v7433_v34 }
 0x3aa   :  { %v7437_v27 = vpop.permute.xlu1 %7436 }
 0x3ab   :  { %6895 = vmatprep.subr.msk.bf16.mxu1 %vm8776_vm2, %v6893_v9  ;;  %v7439_v40 = vunpack.i.h.bf16 %v7437_v27  ;;  %v9376_v0 = vpop.permute.xlu0 %7426 }
 0x3ac   :  { %10888 = vst [vmem:[#allocation10_spill] sm:$0xff] %v9376_v0 }
 0x3ae   :  { %v7447_v61 = vpop.permute.xlu1 %7446 }
 0x3af   :  { %6898 = vmatpush3.bf16.xpose.msk.msra.mxu1 %vm8776_vm2, %v6893_v9  ;;  %v7449_v13 = vunpack.i.h.bf16 %v7447_v61  ;;  %v7448_v5 = vunpack.i.l.bf16 %v7447_v61  ;;  %v9378_v59 = vpop.permute.xlu0 %7441 }
 0x3b0   :  { %6932 = vmatprep.subr.bf16.mxu1 %v6931_v45  ;;  %10889 = vst [vmem:[#allocation3_spill] sm:$0xff] %v9378_v59 }
 0x3b1   :  { %v9289_v35 = vpop.f32.mrb[0].mxu1  ;;  %v9337_v41 = vpack.c.bf16 %v7449_v13, %v7448_v5 }
 0x3b2   :  { %v9291_v58 = vpop.f32.mrb[1].mxu1  ;;  %v2324_v2 = vsel %vm2320_vm3, %v9289_v35, -inf  ;;  %v9380_v1 = vpop.permute.xlu1 %7456 }
 0x3b3   :  { %2325 = vmax.xlane.f32.xlu1 %v2324_v2  ;;  %v2321_v8 = vsel %vm2320_vm3, %v9291_v58, -inf  ;;  %10887 = vst [vmem:[#allocation6_spill] sm:$0xff] %v9337_v41  ;;  %10890 = vst [vmem:[#allocation4_spill] sm:$0xff] %v9380_v1  ;;  %v9382_v7 = vpop.permute.xlu0 %7451 }
 0x3b4   :  { %2322 = vmax.xlane.f32.xlu0 %v2321_v8  ;;  %10891 = vst [vmem:[#allocation8_spill] sm:$0xff] %v9382_v7 }
 0x3b5   :  { %v9299_v36 = vpop.f32.mrb[2].mxu1 }
 0x3b6   :  { %v9301_v60 = vpop.f32.mrb[3].mxu1  ;;  %v2330_v32 = vsel %vm2320_vm3, %v9299_v36, -inf  ;;  %6344 = vmatmul.mubr.msk.f32.vlgmr.msra.gmra.mrb[32].mxu1 %vm1111_vm1, %v9208_v20  ;;  %v7438_v20 = vunpack.i.l.bf16 %v7437_v27  ;;  %v9390_v9 = vpop.permute.xlu1 %7466 }
 0x3b7   :  { %6346 = vmatprep.mubr.msk.f32.mxu1 %vm1111_vm1, %v9214_v50  ;;  %6934 = vmatpush3.bf16.msra.mxu1 %v6931_v45  ;;  %v2327_v12 = vsel %vm2320_vm3, %v9301_v60, -inf  ;;  %v6939_v50 = vpack.c.bf16 %v7424_v56, %v7423_v39  ;;  %10892 = vst [vmem:[#allocation11_spill] sm:$0xff] %v9390_v9  ;;  %v9394_v24 = vpop.permute.xlu0 %7461 }
 0x3b8   :  { %2331 = vmax.xlane.f32.xlu0 %v2330_v32  ;;  %6936 = vmatprep.subr.bf16.mxu1 %v6935_v38  ;;  %10893 = vst [vmem:[#allocation17_spill] sm:$0xff] %v9394_v24 }
 0x3b9   :  { %v9305_v62 = vpop.f32.mrb[4].mxu1 }
 0x3ba   :  { %v9309_v52 = vpop.f32.mrb[5].mxu1  ;;  %v2336_v51 = vsel %vm2320_vm3, %v9305_v62, -inf  ;;  %6347 = vmatmul.mubr.msk.f32.gmra.mrb[34].mxu1 %vm1111_vm1, %v9216_v55  ;;  %v6943_v55 = vpack.c.bf16 %v7439_v40, %v7438_v20  ;;  %v9406_v32 = vpop.permute.xlu1 %7471 }
 0x3bb   :  { %2337 = vmax.xlane.f32.xlu1 %v2336_v51  ;;  %6349 = vmatprep.mubr.msk.f32.mxu1 %vm1111_vm1, %v9226_v43  ;;  %v2333_v31 = vsel %vm2320_vm3, %v9309_v52, -inf  ;;  %10894 = vst [vmem:[#allocation14_spill] sm:$0xff] %v9406_v32  ;;  %v9408_v27 = vpop.permute.xlu0 %7476 }
 0x3bc   :  { %2328 = vmax.xlane.f32.xlu0 %v2327_v12  ;;  %6938 = vmatpush3.bf16.msra.mxu1 %v6935_v38  ;;  %10895 = vst [vmem:[#allocation9_spill] sm:$0xff] %v9408_v27 }
 0x3bd   :  { %v9317_v26 = vpop.f32.mrb[6].mxu1  ;;  %6940 = vmatprep.subr.bf16.mxu1 %v6939_v50 }
 0x3be   :  { %v9321_v46 = vpop.f32.mrb[7].mxu1  ;;  %v2342_v3 = vsel %vm2320_vm3, %v9317_v26, -inf  ;;  %6350 = vmatmul.mubr.msk.f32.gmra.mrb[36].mxu1 %vm1111_vm1, %v9224_v4  ;;  %v9416_v38 = vpop.permute.xlu1 %7481 }
 0x3bf   :  { %2343 = vmax.xlane.f32.xlu1 %v2342_v3  ;;  %6352 = vmatprep.mubr.msk.f32.mxu1 %vm1111_vm1, %v9238_v25  ;;  %v2339_v43 = vsel %vm2320_vm3, %v9321_v46, -inf  ;;  %10896 = vst [vmem:[#allocation7_spill] sm:$0xff] %v9416_v38  ;;  %v9418_v12 = vpop.permute.xlu0 %7486 }
 0x3c0   :  { %2334 = vmax.xlane.f32.xlu0 %v2333_v31  ;;  %6942 = vmatpush3.bf16.msra.mxu1 %v6939_v50  ;;  %10897 = vst [vmem:[#allocation5_spill] sm:$0xff] %v9418_v12 }
 0x3c1   :  { %6944 = vmatprep.subr.bf16.mxu1 %v6943_v55 }
 0x3c2   :  { %6353 = vmatmul.mubr.msk.f32.gmra.mrb[38].mxu1 %vm1111_vm1, %v9230_v15  ;;  %v9424_v3 = vpop.permute.xlu1 %7491 }
 0x3c3   :  { %10898 = vst [vmem:[#allocation20_spill] sm:$0xff] %v9424_v3  ;;  %v9426_v50 = vpop.permute.xlu0 %7496 }
 0x3c4   :  { %2340 = vmax.xlane.f32.xlu0 %v2339_v43  ;;  %6946 = vmatpush3.bf16.msra.mxu1 %v6943_v55  ;;  %10899 = vst [vmem:[#allocation21_spill] sm:$0xff] %v9426_v50 }
 0x3c5   :  { %6964 = vmatprep.subr.bf16.mxu1 %v9337_v41 }
 0x3c6   :  { %v9430_v31 = vpop.permute.xlu1 %7501 }
 0x3c7   :  { %10900 = vst [vmem:[#allocation22_spill] sm:$0xff] %v9430_v31  ;;  %v9432_v13 = vpop.permute.xlu0 %7506 }
 0x3c8   :  { %10901 = vst [vmem:[#allocation23_spill] sm:$0xff] %v9432_v13 }
 0x3d2   :  { %v9340_v29 = vpop.f32.mrb[8].mxu1 }
 0x3d3   :  { %v9342_v4 = vpop.f32.mrb[9].mxu1  ;;  %v2348_v25 = vsel %vm2320_vm3, %v9340_v29, -inf }
 0x3d4   :  { %2349 = vmax.xlane.f32.xlu0 %v2348_v25  ;;  %v2345_v15 = vsel %vm2320_vm3, %v9342_v4, -inf }
 0x3d6   :  { %v9346_v48 = vpop.f32.mrb[10].mxu1 }
 0x3d7   :  { %v9348_v54 = vpop.f32.mrb[11].mxu1  ;;  %v2354_v30 = vsel %vm2320_vm3, %v9346_v48, -inf }
 0x3d8   :  { %2346 = vmax.xlane.f32.xlu0 %v2345_v15  ;;  %v2351_v22 = vsel %vm2320_vm3, %v9348_v54, -inf }
 0x3da   :  { %v9352_v10 = vpop.f32.mrb[12].mxu1 }
 0x3db   :  { %v9354_v14 = vpop.f32.mrb[13].mxu1  ;;  %v2360_v49 = vsel %vm2320_vm3, %v9352_v10, -inf }
 0x3dc   :  { %2355 = vmax.xlane.f32.xlu0 %v2354_v30  ;;  %v2357_v21 = vsel %vm2320_vm3, %v9354_v14, -inf }
 0x3de   :  { %v9358_v6 = vpop.f32.mrb[14].mxu1 }
 0x3df   :  { %v9360_v19 = vpop.f32.mrb[15].mxu1  ;;  %v2366_v16 = vsel %vm2320_vm3, %v9358_v6, -inf }
 0x3e0   :  { %2352 = vmax.xlane.f32.xlu0 %v2351_v22  ;;  %v2363_v47 = vsel %vm2320_vm3, %v9360_v19, -inf }
 0x3e4   :  { %2361 = vmax.xlane.f32.xlu0 %v2360_v49 }
 0x3e8   :  { %2358 = vmax.xlane.f32.xlu0 %v2357_v21 }
 0x3ec   :  { %2367 = vmax.xlane.f32.xlu0 %v2366_v16 }
 0x3f0   :  { %2364 = vmax.xlane.f32.xlu0 %v2363_v47 }
 0x428   :  { %v9384_v44 = vpop.f32.mrb[32].mxu0 }
 0x429   :  { %v9386_v42 = vpop.f32.mrb[33].mxu0  ;;  %v2372_v34 = vsel %vm2320_vm3, %v9384_v44, -inf }
 0x42a   :  { %2373 = vmax.xlane.f32.xlu1 %v2372_v34  ;;  %v2369_v45 = vsel %vm2320_vm3, %v9386_v42, -inf }
 0x42c   :  { %v9392_v17 = vpop.f32.mrb[34].mxu0 }
 0x42d   :  { %v9396_v2 = vpop.f32.mrb[35].mxu0  ;;  %v2378_v18 = vsel %vm2320_vm3, %v9392_v17, -inf }
 0x42e   :  { %2370 = vmax.xlane.f32.xlu1 %v2369_v45  ;;  %v2375_v51 = vsel %vm2320_vm3, %v9396_v2, -inf }
 0x430   :  { %v9400_v8 = vpop.f32.mrb[36].mxu0 }
 0x431   :  { %v9402_v57 = vpop.f32.mrb[37].mxu0  ;;  %v2384_v40 = vsel %vm2320_vm3, %v9400_v8, -inf }
 0x432   :  { %2379 = vmax.xlane.f32.xlu1 %v2378_v18  ;;  %v2381_v20 = vsel %vm2320_vm3, %v9402_v57, -inf }
 0x434   :  { %v9410_v56 = vpop.f32.mrb[38].mxu0 }
 0x435   :  { %v9412_v39 = vpop.f32.mrb[39].mxu0  ;;  %v2390_v61 = vsel %vm2320_vm3, %v9410_v56, -inf }
 0x436   :  { %2376 = vmax.xlane.f32.xlu1 %v2375_v51  ;;  %v2387_v5 = vsel %vm2320_vm3, %v9412_v39, -inf }
 0x43a   :  { %2385 = vmax.xlane.f32.xlu1 %v2384_v40 }
 0x43e   :  { %2382 = vmax.xlane.f32.xlu1 %v2381_v20 }
 0x440   :  { %v2326_v15 = vpop.xlane.xlu1 %2325 }
 0x441   :  { %v2323_v22 = vpop.xlane.xlu0 %2322  ;;  %v2514_v45 = vsub.f32 %v9289_v35, %v2326_v15 }
 0x442   :  { %2391 = vmax.xlane.f32.xlu1 %v2390_v61  ;;  %v2513_v31 = vsub.f32 %v9291_v58, %v2323_v22 }
 0x444   :  { %v2577_v50 = vmul.f32 1.442695, %v2513_v31 }
 0x445   :  { %v2332_v61 = vpop.xlane.xlu0 %2331 }
 0x446   :  { %v9436_v55 = vpop.f32.mrb[16].mxu1  ;;  %2388 = vmax.xlane.f32.xlu1 %v2387_v5 }
 0x447   :  { %v9438_v43 = vpop.f32.mrb[17].mxu1  ;;  %v2396_v25 = vsel %vm2320_vm3, %v9436_v55, -inf }
 0x448   :  { %2397 = vmax.xlane.f32.xlu0 %v2396_v25  ;;  %v9442_v30 = vpop.f32.mrb[40].mxu0  ;;  %v2393_v34 = vsel %vm2320_vm3, %v9438_v43, -inf  ;;  %v2338_v58 = vpop.xlane.xlu1 %2337 }
 0x449   :  { %v9444_v49 = vpop.f32.mrb[41].mxu0  ;;  %v2420_v21 = vsel %vm2320_vm3, %v9442_v30, -inf }
 0x44a   :  { %v9448_v16 = vpop.f32.mrb[18].mxu1  ;;  %2421 = vmax.xlane.f32.xlu1 %v2420_v21  ;;  %v2417_v40 = vsel %vm2320_vm3, %v9444_v49, -inf  ;;  %v2579_v21 = vmul.f32 1.442695, %v2514_v45 }
 0x44b   :  { %v9450_v47 = vpop.f32.mrb[19].mxu1  ;;  %v2402_v25 = vsel %vm2320_vm3, %v9448_v16, -inf }
 0x44c   :  { %2394 = vmax.xlane.f32.xlu0 %v2393_v34  ;;  %v9455_v18 = vpop.f32.mrb[42].mxu0  ;;  %v2399_v53 = vsel %vm2320_vm3, %v9450_v47, -inf  ;;  %7614 = vpow2.f32 %v2579_v21  ;;  %v2344_v32 = vpop.xlane.xlu1 %2343 }
 0x44d   :  { %v9457_v51 = vpop.f32.mrb[43].mxu0  ;;  %v2426_v34 = vsel %vm2320_vm3, %v9455_v18, -inf  ;;  %7616 = vpow2.f32 %v2577_v50 }
 0x44e   :  { %v9461_v20 = vpop.f32.mrb[20].mxu1  ;;  %2418 = vmax.xlane.f32.xlu1 %v2417_v40  ;;  %v2423_v28 = vsel %vm2320_vm3, %v9457_v51, -inf }
 0x44f   :  { %v9463_v5 = vpop.f32.mrb[21].mxu1  ;;  %v2408_v22 = vsel %vm2320_vm3, %v9461_v20, -inf }
 0x450   :  { %2403 = vmax.xlane.f32.xlu0 %v2402_v25  ;;  %v9467_v35 = vpop.f32.mrb[44].mxu0  ;;  %v2329_v25 = vpop.xlane.xlu0 %2328  ;;  %v2405_v38 = vsel %vm2320_vm3, %v9463_v5, -inf }
 0x451   :  { %v9469_v15 = vpop.f32.mrb[45].mxu0  ;;  %v2515_v21 = vsub.f32 %v9301_v60, %v2329_v25  ;;  %v2520_v25 = vsub.f32 %v9317_v26, %v2344_v32 }
 0x452   :  { %v9474_v3 = vpop.f32.mrb[22].mxu1  ;;  %2427 = vmax.xlane.f32.xlu1 %v2426_v34  ;;  %v2516_v34 = vsub.f32 %v9299_v36, %v2332_v61  ;;  %v2429_v36 = vsel %vm2320_vm3, %v9469_v15, -inf }
 0x453   :  { %v9476_v40 = vpop.f32.mrb[23].mxu1  ;;  %v2414_v60 = vsel %vm2320_vm3, %v9474_v3, -inf }
 0x454   :  { %2400 = vmax.xlane.f32.xlu0 %v2399_v53  ;;  %v9480_v45 = vpop.f32.mrb[46].mxu0  ;;  %v2432_v53 = vsel %vm2320_vm3, %v9467_v35, -inf  ;;  %v2335_v12 = vpop.xlane.xlu0 %2334  ;;  %v2583_v31 = vmul.f32 1.442695, %v2516_v34 }
 0x455   :  { %v9482_v11 = vpop.f32.mrb[47].mxu0  ;;  %v2438_v26 = vsel %vm2320_vm3, %v9480_v45, -inf  ;;  %v2517_v32 = vsub.f32 %v9309_v52, %v2335_v12 }
 0x456   :  { %2424 = vmax.xlane.f32.xlu1 %v2423_v28  ;;  %v2518_v28 = vsub.f32 %v9305_v62, %v2338_v58  ;;  %v9497_v61 = vpop.eup %7614  ;;  %7618 = vpow2.f32 %v2583_v31 }
 0x457   :  { %v2708_v62 = vsel %vm2320_vm3, %v9497_v61, 0.0  ;;  %v9506_v58 = vpop.eup %7616  ;;  %v2585_v12 = vmul.f32 1.442695, %v2517_v32 }
 0x458   :  { %2409 = vmax.xlane.f32.xlu0 %v2408_v22  ;;  %v2581_v22 = vmul.f32 1.442695, %v2515_v21  ;;  %v2587_v50 = vmul.f32 1.442695, %v2518_v28  ;;  %v2341_v34 = vpop.xlane.xlu0 %2340  ;;  %v2705_v31 = vsel %vm2320_vm3, %v9506_v58, 0.0 }
 0x459   :  { %v2519_v21 = vsub.f32 %v9321_v46, %v2341_v34  ;;  %v2435_v46 = vsel %vm2320_vm3, %v9482_v11, -inf }
 0x45a   :  { %2433 = vmax.xlane.f32.xlu1 %v2432_v53  ;;  %7620 = vpow2.f32 %v2581_v22  ;;  %v2591_v53 = vmul.f32 1.442695, %v2520_v25 }
 0x45b   :  { %7622 = vpow2.f32 %v2587_v50  ;;  %v2589_v28 = vmul.f32 1.442695, %v2519_v21 }
 0x45c   :  { %2406 = vmax.xlane.f32.xlu0 %v2405_v38  ;;  %v2411_v38 = vsel %vm2320_vm3, %v9476_v40, -inf  ;;  %7624 = vpow2.f32 %v2591_v53 }
 0x45d   :  { %7626 = vpow2.f32 %v2589_v28 }
 0x45e   :  { %2430 = vmax.xlane.f32.xlu1 %v2429_v36  ;;  %7628 = vpow2.f32 %v2585_v12 }
 0x460   :  { %2415 = vmax.xlane.f32.xlu0 %v2414_v60  ;;  %v9524_v52 = vpop.eup %7618 }
 0x461   :  { %10903 = vst [vmem:[#allocation25_spill] sm:$0xff] %v9524_v52  ;;  %v2350_v53 = vpop.xlane.xlu0 %2349 }
 0x462   :  { %2709 = vadd.xlane.f32.xlu1 %v2708_v62 }
 0x464   :  { %2412 = vmax.xlane.f32.xlu0 %v2411_v38  ;;  %v9528_v34 = vpop.eup %7620 }
 0x465   :  { %10904 = vst [vmem:[#allocation26_spill] sm:$0xff] %v9528_v34  ;;  %v2711_v28 = vsel %vm2320_vm3, %v9528_v34, 0.0  ;;  %v2347_v12 = vpop.xlane.xlu0 %2346 }
 0x466   :  { %2439 = vmax.xlane.f32.xlu1 %v2438_v26  ;;  %v2714_v26 = vsel %vm2320_vm3, %v9524_v52, 0.0 }
 0x468   :  { %2706 = vadd.xlane.f32.xlu0 %v2705_v31  ;;  %v9514_v36 = vpop.f32.mrb[24].mxu1  ;;  %v9516_v22 = vpop.f32.mrb[48].mxu0 }
 0x469   :  { %10902 = vst [vmem:[#allocation24_spill] sm:$0xff] %v9516_v22  ;;  %v9518_v60 = vpop.f32.mrb[25].mxu1  ;;  %v2444_v50 = vsel %vm2320_vm3, %v9514_v36, -inf  ;;  %v9526_v25 = vpop.f32.mrb[49].mxu0 }
 0x46a   :  { %2436 = vmax.xlane.f32.xlu1 %v2435_v46  ;;  %v9538_v31 = vpop.eup %7622 }
 0x46b   :  { %10906 = vst [vmem:[#allocation28_spill] sm:$0xff] %v9538_v31  ;;  %v2720_v9 = vsel %vm2320_vm3, %v9538_v31, 0.0  ;;  %v9552_v1 = vpop.eup %7624 }
 0x46c   :  { %2445 = vmax.xlane.f32.xlu0 %v2444_v50  ;;  %v9530_v62 = vpop.f32.mrb[26].mxu1  ;;  %v9532_v38 = vpop.f32.mrb[50].mxu0  ;;  %10908 = vst [vmem:[#allocation30_spill] sm:$0xff] %v9552_v1  ;;  %v2726_v24 = vsel %vm2320_vm3, %v9552_v1, 0.0  ;;  %v2468_v1 = vsel %vm2320_vm3, %v9516_v22, -inf }
 0x46d   :  { %10905 = vst [vmem:[#allocation27_spill] sm:$0xff] %v9530_v62  ;;  %v9534_v21 = vpop.f32.mrb[27].mxu1  ;;  %v9540_v32 = vpop.f32.mrb[51].mxu0 }
 0x46e   :  { %2715 = vadd.xlane.f32.xlu1 %v2714_v26  ;;  %v2441_v26 = vsel %vm2320_vm3, %v9518_v60, -inf  ;;  %v9566_v7 = vpop.eup %7626 }
 0x46f   :  { %10910 = vst [vmem:[#allocation32_spill] sm:$0xff] %v9566_v7  ;;  %v9572_v59 = vpop.eup %7628  ;;  %v2723_v52 = vsel %vm2320_vm3, %v9566_v7, 0.0 }
 0x470   :  { %2712 = vadd.xlane.f32.xlu0 %v2711_v28  ;;  %v9544_v46 = vpop.f32.mrb[28].mxu1  ;;  %v9546_v50 = vpop.f32.mrb[52].mxu0  ;;  %v2717_v34 = vsel %vm2320_vm3, %v9572_v59, 0.0 }
 0x471   :  { %10907 = vst [vmem:[#allocation29_spill] sm:$0xff] %v9546_v50  ;;  %v9548_v41 = vpop.f32.mrb[29].mxu1  ;;  %v9554_v37 = vpop.f32.mrb[53].mxu0 }
 0x472   :  { %2721 = vadd.xlane.f32.xlu1 %v2720_v9  ;;  %v2450_v9 = vsel %vm2320_vm3, %v9530_v62, -inf  ;;  %v2447_v62 = vsel %vm2320_vm3, %v9534_v21, -inf }
 0x474   :  { %2442 = vmax.xlane.f32.xlu0 %v2441_v26  ;;  %v9558_v28 = vpop.f32.mrb[30].mxu1  ;;  %v9560_v27 = vpop.f32.mrb[54].mxu0 }
 0x475   :  { %10909 = vst [vmem:[#allocation31_spill] sm:$0xff] %v9560_v27  ;;  %v9562_v13 = vpop.f32.mrb[31].mxu1  ;;  %v9568_v31 = vpop.f32.mrb[55].mxu0 }
 0x476   :  { %2727 = vadd.xlane.f32.xlu1 %v2726_v24  ;;  %v2356_v26 = vpop.xlane.xlu0 %2355  ;;  %v2522_v24 = vsub.f32 %v9340_v29, %v2350_v53  ;;  %v2474_v29 = vsel %vm2320_vm3, %v9532_v38, -inf }
 0x477   :  { %v2524_v53 = vsub.f32 %v9346_v48, %v2356_v26  ;;  %v2480_v48 = vsel %vm2320_vm3, %v9546_v50, -inf }
 0x478   :  { %2451 = vmax.xlane.f32.xlu0 %v2450_v9  ;;  %v2465_v9 = vsel %vm2320_vm3, %v9526_v25, -inf  ;;  %v2595_v7 = vmul.f32 1.442695, %v2522_v24 }
 0x47a   :  { %2724 = vadd.xlane.f32.xlu1 %v2723_v52  ;;  %v2353_v0 = vpop.xlane.xlu0 %2352  ;;  %v2521_v52 = vsub.f32 %v9342_v4, %v2347_v12  ;;  %7630 = vpow2.f32 %v2595_v7  ;;  %v2471_v4 = vsel %vm2320_vm3, %v9540_v32, -inf }
 0x47c   :  { %2718 = vadd.xlane.f32.xlu0 %v2717_v34  ;;  %v2456_v34 = vsel %vm2320_vm3, %v9544_v46, -inf }
 0x47e   :  { %2469 = vmax.xlane.f32.xlu1 %v2468_v1  ;;  %v2362_v22 = vpop.xlane.xlu0 %2361  ;;  %v2593_v1 = vmul.f32 1.442695, %v2521_v52  ;;  %v2462_v52 = vsel %vm2320_vm3, %v9558_v28, -inf }
 0x47f   :  { %v2526_v12 = vsub.f32 %v9352_v10, %v2362_v22  ;;  %v2459_v10 = vsel %vm2320_vm3, %v9562_v13, -inf }
 0x480   :  { %2448 = vmax.xlane.f32.xlu0 %v2447_v62  ;;  %v2453_v62 = vsel %vm2320_vm3, %v9548_v41, -inf  ;;  %7632 = vpow2.f32 %v2593_v1 }
 0x481   :  { %v2603_v26 = vmul.f32 1.442695, %v2526_v12  ;;  %v2477_v12 = vsel %vm2320_vm3, %v9554_v37, -inf }
 0x482   :  { %2466 = vmax.xlane.f32.xlu1 %v2465_v9  ;;  %v2359_v7 = vpop.xlane.xlu0 %2358 }
 0x484   :  { %2457 = vmax.xlane.f32.xlu0 %v2456_v34  ;;  %v2599_v34 = vmul.f32 1.442695, %v2524_v53  ;;  %v9611_v22 = vpop.eup %7630  ;;  %v2523_v53 = vsub.f32 %v9348_v54, %v2353_v0  ;;  %v2486_v0 = vsel %vm2320_vm3, %v9560_v27, -inf }
 0x485   :  { %10912 = vst [vmem:[#allocation34_spill] sm:$0xff] %v9611_v22 }
 0x486   :  { %2475 = vmax.xlane.f32.xlu1 %v2474_v29  ;;  %7634 = vpow2.f32 %v2599_v34  ;;  %v2597_v34 = vmul.f32 1.442695, %v2523_v53  ;;  %v2483_v53 = vsel %vm2320_vm3, %v9568_v31, -inf }
 0x487   :  { %7636 = vpow2.f32 %v2603_v26 }
 0x488   :  { %2454 = vmax.xlane.f32.xlu0 %v2453_v62  ;;  %v2525_v62 = vsub.f32 %v9354_v14, %v2359_v7 }
 0x489   :  { %v9593_v24 = vpop.f32.mrb[32].mxu1 }
 0x48a   :  { %v9598_v9 = vpop.f32.mrb[33].mxu1  ;;  %2472 = vmax.xlane.f32.xlu1 %v2471_v4  ;;  %v2368_v4 = vpop.xlane.xlu0 %2367  ;;  %v2601_v14 = vmul.f32 1.442695, %v2525_v62 }
 0x48b   :  { %v9622_v50 = vpop.eup %7632 }
 0x48c   :  { %2463 = vmax.xlane.f32.xlu0 %v2462_v52  ;;  %7638 = vpow2.f32 %v2601_v14 }
 0x48d   :  { %v9602_v29 = vpop.f32.mrb[34].mxu1  ;;  %7640 = vpow2.f32 %v2597_v34 }
 0x48e   :  { %v9607_v1 = vpop.f32.mrb[35].mxu1  ;;  %2481 = vmax.xlane.f32.xlu1 %v2480_v48  ;;  %v2732_v48 = vsel %vm2320_vm3, %v9611_v22, 0.0  ;;  %v2365_v62 = vpop.xlane.xlu0 %2364 }
 0x48f   :  { %10911 = vst [vmem:[#allocation33_spill] sm:$0xff] %v9607_v1  ;;  %v2527_v27 = vsub.f32 %v9360_v19, %v2365_v62  ;;  %v2492_v19 = vsel %vm2320_vm3, %v9593_v24, -inf }
 0x490   :  { %2460 = vmax.xlane.f32.xlu0 %v2459_v10  ;;  %v2528_v10 = vsub.f32 %v9358_v6, %v2368_v4  ;;  %v2489_v6 = vsel %vm2320_vm3, %v9598_v9, -inf }
 0x491   :  { %v9614_v52 = vpop.f32.mrb[36].mxu1  ;;  %v2605_v34 = vmul.f32 1.442695, %v2527_v27 }
 0x492   :  { %10913 = vst [vmem:[#allocation35_spill] sm:$0xff] %v9614_v52  ;;  %v9618_v7 = vpop.f32.mrb[37].mxu1  ;;  %2478 = vmax.xlane.f32.xlu1 %v2477_v12  ;;  %v2729_v12 = vsel %vm2320_vm3, %v9622_v50, 0.0  ;;  %v2607_v22 = vmul.f32 1.442695, %v2528_v10 }
 0x493   :  { %10914 = vst [vmem:[#allocation36_spill] sm:$0xff] %v9618_v7 }
 0x494   :  { %2733 = vadd.xlane.f32.xlu0 %v2732_v48  ;;  %v9635_v48 = vpop.eup %7634  ;;  %7642 = vpow2.f32 %v2607_v22  ;;  %v2495_v22 = vsel %vm2320_vm3, %v9607_v1, -inf }
 0x495   :  { %v9624_v54 = vpop.f32.mrb[38].mxu1  ;;  %v9640_v4 = vpop.eup %7636  ;;  %v2738_v14 = vsel %vm2320_vm3, %v9635_v48, 0.0  ;;  %7644 = vpow2.f32 %v2605_v34 }
 0x496   :  { %10915 = vst [vmem:[#allocation37_spill] sm:$0xff] %v9624_v54  ;;  %v9629_v26 = vpop.f32.mrb[39].mxu1  ;;  %2487 = vmax.xlane.f32.xlu1 %v2486_v0  ;;  %v2744_v0 = vsel %vm2320_vm3, %v9640_v4, 0.0 }
 0x497   :  { %10916 = vst [vmem:[#allocation38_spill] sm:$0xff] %v9629_v26 }
 0x498   :  { %2730 = vadd.xlane.f32.xlu0 %v2729_v12  ;;  %v9646_v12 = vpop.eup %7638 }
 0x499   :  { %v9650_v10 = vpop.eup %7640  ;;  %v2741_v62 = vsel %vm2320_vm3, %v9646_v12, 0.0 }
 0x49a   :  { %2484 = vmax.xlane.f32.xlu1 %v2483_v53  ;;  %v2735_v27 = vsel %vm2320_vm3, %v9650_v10, 0.0 }
 0x49c   :  { %2490 = vmax.xlane.f32.xlu0 %v2489_v6  ;;  %v2498_v6 = vsel %vm2320_vm3, %v9602_v29, -inf }
 0x49e   :  { %2739 = vadd.xlane.f32.xlu1 %v2738_v14  ;;  %v9658_v53 = vpop.eup %7642 }
 0x49f   :  { %10917 = vst [vmem:[#allocation39_spill] sm:$0xff] %v9658_v53  ;;  %v2750_v14 = vsel %vm2320_vm3, %v9658_v53, 0.0  ;;  %v9664_v34 = vpop.eup %7644 }
 0x4a0   :  { %2745 = vadd.xlane.f32.xlu0 %v2744_v0  ;;  %10918 = vst [vmem:[#allocation40_spill] sm:$0xff] %v9664_v34  ;;  %v2504_v0 = vsel %vm2320_vm3, %v9614_v52, -inf }
 0x4a2   :  { %2493 = vmax.xlane.f32.xlu1 %v2492_v19  ;;  %v2747_v19 = vsel %vm2320_vm3, %v9664_v34, 0.0 }
 0x4a4   :  { %2742 = vadd.xlane.f32.xlu0 %v2741_v62  ;;  %v2510_v62 = vsel %vm2320_vm3, %v9624_v54, -inf }
 0x4a6   :  { %2736 = vadd.xlane.f32.xlu1 %v2735_v27  ;;  %v2501_v27 = vsel %vm2320_vm3, %v9618_v7, -inf }
 0x4a8   :  { %2496 = vmax.xlane.f32.xlu0 %v2495_v22  ;;  %v2507_v22 = vsel %vm2320_vm3, %v9629_v26, -inf }
 0x4aa   :  { %2499 = vmax.xlane.f32.xlu1 %v2498_v6 }
 0x4ac   :  { %2751 = vadd.xlane.f32.xlu0 %v2750_v14 }
 0x4ae   :  { %2505 = vmax.xlane.f32.xlu1 %v2504_v0 }
 0x4b0   :  { %2748 = vadd.xlane.f32.xlu0 %v2747_v19 }
 0x4b2   :  { %2511 = vmax.xlane.f32.xlu1 %v2510_v62 }
 0x4b4   :  { %2502 = vmax.xlane.f32.xlu0 %v2501_v27 }
 0x4b7   :  { %v2374_v6 = vpop.xlane.xlu1 %2373 }
 0x4b8   :  { %2508 = vmax.xlane.f32.xlu0 %v2507_v22  ;;  %v2530_v14 = vsub.f32 %v9384_v44, %v2374_v6 }
 0x4ba   :  { %v2611_v0 = vmul.f32 1.442695, %v2530_v14 }
 0x4bb   :  { %v2371_v52 = vpop.xlane.xlu1 %2370 }
 0x4bc   :  { %7646 = vpow2.f32 %v2611_v0  ;;  %v2529_v19 = vsub.f32 %v9386_v42, %v2371_v52 }
 0x4be   :  { %v2609_v1 = vmul.f32 1.442695, %v2529_v19 }
 0x4bf   :  { %v2380_v53 = vpop.xlane.xlu1 %2379 }
 0x4c0   :  { %7648 = vpow2.f32 %v2609_v1  ;;  %v2532_v62 = vsub.f32 %v9392_v17, %v2380_v53 }
 0x4c2   :  { %v2615_v54 = vmul.f32 1.442695, %v2532_v62 }
 0x4c3   :  { %v2377_v7 = vpop.xlane.xlu1 %2376 }
 0x4c4   :  { %7650 = vpow2.f32 %v2615_v54  ;;  %v2531_v27 = vsub.f32 %v9396_v2, %v2377_v7 }
 0x4c6   :  { %v9680_v26 = vpop.eup %7646  ;;  %v2613_v22 = vmul.f32 1.442695, %v2531_v27 }
 0x4c7   :  { %v2386_v34 = vpop.xlane.xlu1 %2385  ;;  %v2756_v44 = vsel %vm2320_vm3, %v9680_v26, 0.0 }
 0x4c8   :  { %7652 = vpow2.f32 %v2613_v22  ;;  %v2534_v42 = vsub.f32 %v9400_v8, %v2386_v34  ;;  %2757 = vadd.xlane.f32.xlu0 %v2756_v44 }
 0x4ca   :  { %v9685_v52 = vpop.eup %7648  ;;  %v2619_v1 = vmul.f32 1.442695, %v2534_v42 }
 0x4cb   :  { %v2383_v17 = vpop.xlane.xlu1 %2382  ;;  %v2753_v54 = vsel %vm2320_vm3, %v9685_v52, 0.0 }
 0x4cc   :  { %7654 = vpow2.f32 %v2619_v1  ;;  %v2533_v2 = vsub.f32 %v9402_v57, %v2383_v17  ;;  %2754 = vadd.xlane.f32.xlu1 %v2753_v54 }
 0x4ce   :  { %v9690_v7 = vpop.eup %7650  ;;  %v2617_v53 = vmul.f32 1.442695, %v2533_v2 }
 0x4cf   :  { %v2392_v6 = vpop.xlane.xlu1 %2391  ;;  %v2762_v14 = vsel %vm2320_vm3, %v9690_v7, 0.0 }
 0x4d0   :  { %7656 = vpow2.f32 %v2617_v53  ;;  %v2536_v8 = vsub.f32 %v9410_v56, %v2392_v6  ;;  %2763 = vadd.xlane.f32.xlu1 %v2762_v14 }
 0x4d2   :  { %v9695_v34 = vpop.eup %7652  ;;  %v2623_v0 = vmul.f32 1.442695, %v2536_v8 }
 0x4d3   :  { %v2389_v19 = vpop.xlane.xlu1 %2388  ;;  %v2759_v62 = vsel %vm2320_vm3, %v9695_v34, 0.0 }
 0x4d4   :  { %7658 = vpow2.f32 %v2623_v0  ;;  %v2535_v57 = vsub.f32 %v9412_v39, %v2389_v19  ;;  %2760 = vadd.xlane.f32.xlu1 %v2759_v62 }
 0x4d5   :  { %v2398_v27 = vpop.xlane.xlu0 %2397 }
 0x4d6   :  { %v9700_v22 = vpop.eup %7654  ;;  %v2621_v44 = vmul.f32 1.442695, %v2535_v57  ;;  %v2538_v42 = vsub.f32 %v9436_v55, %v2398_v27 }
 0x4d7   :  { %v9703_v1 = vpop.xlane.xlu1 %2421  ;;  %v2768_v56 = vsel %vm2320_vm3, %v9700_v22, 0.0 }
 0x4d8   :  { %7660 = vpow2.f32 %v2621_v44  ;;  %v2627_v17 = vmul.f32 1.442695, %v2538_v42  ;;  %2769 = vadd.xlane.f32.xlu0 %v2768_v56 }
 0x4d9   :  { %v2395_v54 = vpop.xlane.xlu0 %2394 }
 0x4da   :  { %v9707_v2 = vpop.eup %7656  ;;  %7662 = vpow2.f32 %v2627_v17  ;;  %v2537_v39 = vsub.f32 %v9438_v43, %v2395_v54 }
 0x4db   :  { %v2419_v53 = vpop.xlane.xlu1 %2418  ;;  %v2765_v6 = vsel %vm2320_vm3, %v9707_v2, 0.0 }
 0x4dc   :  { %v2625_v14 = vmul.f32 1.442695, %v2537_v39  ;;  %2766 = vadd.xlane.f32.xlu1 %v2765_v6 }
 0x4dd   :  { %v2404_v55 = vpop.xlane.xlu0 %2403 }
 0x4de   :  { %v9712_v8 = vpop.eup %7658  ;;  %7664 = vpow2.f32 %v2625_v14  ;;  %v2540_v0 = vsub.f32 %v9448_v16, %v2404_v55 }
 0x4df   :  { %v9715_v19 = vpop.xlane.xlu1 %2427  ;;  %v2774_v62 = vsel %vm2320_vm3, %v9712_v8, 0.0 }
 0x4e0   :  { %v2631_v57 = vmul.f32 1.442695, %v2540_v0  ;;  %2775 = vadd.xlane.f32.xlu0 %v2774_v62 }
 0x4e1   :  { %v2401_v43 = vpop.xlane.xlu0 %2400 }
 0x4e2   :  { %v9719_v27 = vpop.eup %7660  ;;  %7666 = vpow2.f32 %v2631_v57  ;;  %v2539_v44 = vsub.f32 %v9450_v47, %v2401_v43 }
 0x4e3   :  { %v2425_v42 = vpop.xlane.xlu1 %2424  ;;  %v2771_v56 = vsel %vm2320_vm3, %v9719_v27, 0.0 }
 0x4e4   :  { %v9724_v17 = vpop.eup %7662  ;;  %v2629_v16 = vmul.f32 1.442695, %v2539_v44  ;;  %2772 = vadd.xlane.f32.xlu1 %v2771_v56  ;;  %v2545_v56 = vsub.f32 %v9444_v49, %v2419_v53 }
 0x4e5   :  { %10919 = vst [vmem:[#allocation41_spill] sm:$0xff] %v9724_v17  ;;  %v2410_v54 = vpop.xlane.xlu0 %2409  ;;  %v2780_v39 = vsel %vm2320_vm3, %v9724_v17, 0.0 }
 0x4e6   :  { %7668 = vpow2.f32 %v2629_v16  ;;  %v2542_v6 = vsub.f32 %v9461_v20, %v2410_v54  ;;  %2781 = vadd.xlane.f32.xlu0 %v2780_v39 }
 0x4e7   :  { %v2434_v14 = vpop.xlane.xlu1 %2433 }
 0x4e8   :  { %v9729_v55 = vpop.eup %7664  ;;  %v2635_v47 = vmul.f32 1.442695, %v2542_v6 }
 0x4e9   :  { %v2407_v0 = vpop.xlane.xlu0 %2406  ;;  %v2777_v62 = vsel %vm2320_vm3, %v9729_v55, 0.0 }
 0x4ea   :  { %7670 = vpow2.f32 %v2635_v47  ;;  %v2541_v57 = vsub.f32 %v9463_v5, %v2407_v0  ;;  %2778 = vadd.xlane.f32.xlu1 %v2777_v62  ;;  %v2641_v47 = vmul.f32 1.442695, %v2545_v56  ;;  %v2547_v5 = vsub.f32 %v9457_v51, %v2425_v42 }
 0x4eb   :  { %v2431_v43 = vpop.xlane.xlu1 %2430  ;;  %v2546_v62 = vsub.f32 %v9442_v30, %v9703_v1  ;;  %v2548_v30 = vsub.f32 %v9455_v18, %v9715_v19 }
 0x4ec   :  { %v9734_v44 = vpop.eup %7666  ;;  %v2633_v16 = vmul.f32 1.442695, %v2541_v57  ;;  %v2549_v56 = vsub.f32 %v9469_v15, %v2431_v43 }
 0x4ed   :  { %v2416_v20 = vpop.xlane.xlu0 %2415  ;;  %v2786_v54 = vsel %vm2320_vm3, %v9734_v44, 0.0  ;;  %v2643_v42 = vmul.f32 1.442695, %v2546_v62  ;;  %v2647_v43 = vmul.f32 1.442695, %v2548_v30 }
 0x4ee   :  { %7672 = vpow2.f32 %v2633_v16  ;;  %v2544_v39 = vsub.f32 %v9474_v3, %v2416_v20  ;;  %2787 = vadd.xlane.f32.xlu0 %v2786_v54  ;;  %v2645_v20 = vmul.f32 1.442695, %v2547_v5  ;;  %v2550_v5 = vsub.f32 %v9467_v35, %v2434_v14 }
 0x4ef   :  { %v2710_v6 = vpop.xlane.xlu1 %2709 }
 0x4f0   :  { %v9740_v17 = vpop.eup %7668  ;;  %v2639_v0 = vmul.f32 1.442695, %v2544_v39 }
 0x4f1   :  { %v2413_v49 = vpop.xlane.xlu0 %2412  ;;  %v2783_v53 = vsel %vm2320_vm3, %v9740_v17, 0.0 }
 0x4f2   :  { %7674 = vpow2.f32 %v2639_v0  ;;  %v2543_v57 = vsub.f32 %v9476_v40, %v2413_v49  ;;  %2784 = vadd.xlane.f32.xlu1 %v2783_v53  ;;  %v2651_v53 = vmul.f32 1.442695, %v2550_v5 }
 0x4f3   :  { %v2440_v3 = vpop.xlane.xlu1 %2439  ;;  %7676 = vpow2.f32 %v2641_v47  ;;  %v2649_v47 = vmul.f32 1.442695, %v2549_v56 }
 0x4f4   :  { %v9748_v16 = vpop.eup %7670  ;;  %v2637_v51 = vmul.f32 1.442695, %v2543_v57  ;;  %7678 = vrcp.f32 %v2710_v6 }
 0x4f5   :  { %v2707_v1 = vpop.xlane.xlu0 %2706  ;;  %v2792_v54 = vsel %vm2320_vm3, %v9748_v16, 0.0 }
 0x4f6   :  { %7680 = vpow2.f32 %v2637_v51  ;;  %2793 = vadd.xlane.f32.xlu0 %v2792_v54 }
 0x4f7   :  { %7682 = vrcp.f32 %v2707_v1  ;;  %v2437_v40 = vpop.xlane.xlu1 %2436 }
 0x4f8   :  { %v9755_v39 = vpop.eup %7672  ;;  %7684 = vpow2.f32 %v2645_v20  ;;  %v2551_v15 = vsub.f32 %v9482_v11, %v2437_v40  ;;  %v2552_v11 = vsub.f32 %v9480_v45, %v2440_v3 }
 0x4f9   :  { %7686 = vpow2.f32 %v2643_v42  ;;  %v2446_v18 = vpop.xlane.xlu0 %2445  ;;  %v2789_v19 = vsel %vm2320_vm3, %v9755_v39, 0.0  ;;  %v7409_v42 = vunpack.i.h.bf16 %v9372_v33 }
 0x4fa   :  { %2790 = vadd.xlane.f32.xlu1 %v2789_v19  ;;  %7688 = vpow2.f32 %v2649_v47  ;;  %v2653_v62 = vmul.f32 1.442695, %v2551_v15  ;;  %v2554_v49 = vsub.f32 %v9514_v36, %v2446_v18  ;;  %v7408_v36 = vunpack.i.l.bf16 %v9372_v33 }
 0x4fb   :  { %v2716_v6 = vpop.xlane.xlu1 %2715  ;;  %7690 = vpow2.f32 %v2647_v43  ;;  %v2655_v3 = vmul.f32 1.442695, %v2552_v11  ;;  %v7419_v19 = vunpack.i.h.bf16 %v9374_v63 }
 0x4fc   :  { %v9761_v0 = vpop.eup %7674  ;;  %7692 = vrcp.f32 %v2716_v6  ;;  %v2659_v30 = vmul.f32 1.442695, %v2554_v49  ;;  %v7418_v6 = vunpack.i.l.bf16 %v9374_v63  ;;  %v6919_v49 = vpack.c.bf16 %v7409_v42, %v7408_v36 }
 0x4fd   :  { %v2713_v57 = vpop.xlane.xlu0 %2712  ;;  %v2798_v35 = vsel %vm2320_vm3, %v9761_v0, 0.0  ;;  %v9767_v14 = vpop.eup %7676 }
 0x4fe   :  { %2799 = vadd.xlane.f32.xlu0 %v2798_v35  ;;  %v7679_v20 = vpop.eup %7678  ;;  %7694 = vrcp.f32 %v2713_v57  ;;  %v2801_v54 = vsel %vm2320_vm3, %v9767_v14, 0.0  ;;  %v6923_v36 = vpack.c.bf16 %v7419_v19, %v7418_v6  ;;  %v10923_v19 = vld [vmem:[#allocation25_spill] sm:$0xff] }
 0x4ff   :  { %v2722_v56 = vpop.xlane.xlu1 %2721  ;;  %7696 = vpow2.f32 %v2653_v62  ;;  %v2962_v5 = vmul.f32 %v7679_v20, %v9497_v61  ;;  %v10920_v61 = vld [vmem:[#allocation27_spill] sm:$0xff] }
 0x500   :  { %v9769_v51 = vpop.eup %7680  ;;  %7698 = vpow2.f32 %v2651_v53 }
 0x501   :  { %v7683_v45 = vpop.eup %7682  ;;  %v2443_v1 = vpop.xlane.xlu0 %2442  ;;  %v2795_v40 = vsel %vm2320_vm3, %v9769_v51, 0.0  ;;  %7700 = vpow2.f32 %v2659_v30 }
 0x502   :  { %v9777_v47 = vpop.eup %7684  ;;  %v2553_v15 = vsub.f32 %v9518_v60, %v2443_v1  ;;  %2802 = vadd.xlane.f32.xlu0 %v2801_v54  ;;  %2796 = vadd.xlane.f32.xlu1 %v2795_v40  ;;  %v2961_v33 = vmul.f32 %v7683_v45, %v9506_v58  ;;  %7702 = vpow2.f32 %v2655_v3  ;;  %v10921_v45 = vld [vmem:[#allocation10_spill] sm:$0xff] }
 0x503   :  { %v9781_v43 = vpop.eup %7686  ;;  %v2728_v18 = vpop.xlane.xlu1 %2727  ;;  %v2807_v58 = vsel %vm2320_vm3, %v9777_v47, 0.0  ;;  %7704 = vrcp.f32 %v2722_v56  ;;  %v7429_v3 = vunpack.i.h.bf16 %v10921_v45 }
 0x504   :  { %v2657_v62 = vmul.f32 1.442695, %v2553_v15  ;;  %6371 = vmatprep.mubr.msk.f32.mxu0 %vm2320_vm3, %v2961_v33  ;;  %v9790_v53 = vpop.eup %7688  ;;  %v2804_v63 = vsel %vm2320_vm3, %v9781_v43, 0.0  ;;  %v10922_v15 = vld [vmem:[#allocation26_spill] sm:$0xff] }
 0x505   :  { %6372 = vmatmul.mubr.msk.f32.vlgmr.msra.gmra.mrb[56].mxu0 %vm2320_vm3, %v2962_v5  ;;  %v2452_v60 = vpop.xlane.xlu0 %2451  ;;  %v9796_v57 = vpop.eup %7690  ;;  %v2813_v54 = vsel %vm2320_vm3, %v9790_v53, 0.0 }
 0x506   :  { %6918 = vmatpush3.bf16.msra.mxu0 %v9282_v23  ;;  %v2556_v11 = vsub.f32 %v10920_v61, %v2452_v60  ;;  %2808 = vadd.xlane.f32.xlu0 %v2807_v58  ;;  %v7693_v20 = vpop.eup %7692  ;;  %7706 = vpow2.f32 %v2657_v62  ;;  %v7428_v23 = vunpack.i.l.bf16 %v10921_v45  ;;  %v2810_v56 = vsel %vm2320_vm3, %v9796_v57, 0.0  ;;  %v10924_v60 = vld [vmem:[#allocation3_spill] sm:$0xff] }
 0x507   :  { %6920 = vmatprep.subr.bf16.mxu0 %v6919_v49  ;;  %2805 = vadd.xlane.f32.xlu1 %v2804_v63  ;;  %v2725_v35 = vpop.xlane.xlu1 %2724  ;;  %v2964_v6 = vmul.f32 %v7693_v20, %v10923_v19  ;;  %v7444_v58 = vunpack.i.h.bf16 %v10924_v60 }
 0x508   :  { %v2663_v42 = vmul.f32 1.442695, %v2556_v11  ;;  %v7695_v30 = vpop.eup %7694  ;;  %7708 = vrcp.f32 %v2725_v35  ;;  %v6927_v11 = vpack.c.bf16 %v7429_v3, %v7428_v23 }
 0x509   :  { %v2719_v1 = vpop.xlane.xlu0 %2718  ;;  %v9802_v40 = vpop.eup %7696  ;;  %v2963_v33 = vmul.f32 %v7695_v30, %v10922_v15 }
 0x50a   :  { %7710 = vpow2.f32 %v2663_v42  ;;  %6922 = vmatpush3.bf16.msra.mxu0 %v6919_v49  ;;  %2814 = vadd.xlane.f32.xlu0 %v2813_v54  ;;  %v9807_v5 = vpop.eup %7698  ;;  %v7443_v49 = vunpack.i.l.bf16 %v10924_v60  ;;  %v2819_v63 = vsel %vm2320_vm3, %v9802_v40, 0.0 }
 0x50b   :  { %7712 = vrcp.f32 %v2719_v1  ;;  %6924 = vmatprep.subr.bf16.mxu0 %v6923_v36  ;;  %2811 = vadd.xlane.f32.xlu1 %v2810_v56  ;;  %v9810_v62 = vpop.xlane.xlu1 %2469  ;;  %v9818_v35 = vpop.eup %7700  ;;  %v2816_v42 = vsel %vm2320_vm3, %v9807_v5, 0.0 }
 0x50c   :  { %6374 = vmatprep.mubr.msk.f32.mxu0 %vm2320_vm3, %v2963_v33  ;;  %7714 = vrcp.f32 %v2728_v18  ;;  %v9823_v30 = vpop.eup %7702  ;;  %v9825_v54 = vpack.c.bf16 %v7444_v58, %v7443_v49  ;;  %v2828_v18 = vsel %vm2320_vm3, %v9818_v35, 0.0 }
 0x50d   :  { %6375 = vmatmul.mubr.msk.f32.gmra.mrb[58].mxu0 %vm2320_vm3, %v2964_v6  ;;  %v2449_v61 = vpop.xlane.xlu0 %2448  ;;  %v7705_v3 = vpop.eup %7704  ;;  %v2822_v56 = vsel %vm2320_vm3, %v9823_v30, 0.0 }
 0x50e   :  { %6926 = vmatpush3.bf16.msra.mxu0 %v6923_v36  ;;  %v2555_v20 = vsub.f32 %v9534_v21, %v2449_v61  ;;  %2820 = vadd.xlane.f32.xlu0 %v2819_v63  ;;  %v10925_v63 = vld [vmem:[#allocation28_spill] sm:$0xff] }
 0x50f   :  { %6928 = vmatprep.subr.bf16.mxu0 %v6927_v11  ;;  %2817 = vadd.xlane.f32.xlu1 %v2816_v42  ;;  %v2467_v45 = vpop.xlane.xlu1 %2466 }
 0x510   :  { %v2661_v1 = vmul.f32 1.442695, %v2555_v20  ;;  %v9829_v36 = vpop.eup %7706  ;;  %v2966_v20 = vmul.f32 %v7705_v3, %v10925_v63 }
 0x511   :  { %v2458_v23 = vpop.xlane.xlu0 %2457  ;;  %v2825_v61 = vsel %vm2320_vm3, %v9829_v36, 0.0 }
 0x512   :  { %7716 = vpow2.f32 %v2661_v1  ;;  %6930 = vmatpush3.bf16.msra.mxu0 %v6927_v11  ;;  %v2558_v21 = vsub.f32 %v9544_v46, %v2458_v23  ;;  %2829 = vadd.xlane.f32.xlu0 %v2828_v18  ;;  %v7709_v15 = vpop.eup %7708  ;;  %v2561_v23 = vsub.f32 %v9526_v25, %v2467_v45 }
 0x513   :  { %6948 = vmatprep.subr.bf16.mxu0 %v9825_v54  ;;  %2823 = vadd.xlane.f32.xlu1 %v2822_v56  ;;  %v2476_v33 = vpop.xlane.xlu1 %2475 }
 0x514   :  { %v9835_v19 = vpop.eup %7710  ;;  %v2667_v6 = vmul.f32 1.442695, %v2558_v21  ;;  %v10926_v21 = vld [vmem:[#allocation32_spill] sm:$0xff]  ;;  %v2673_v45 = vmul.f32 1.442695, %v2561_v23 }
 0x515   :  { %v7713_v60 = vpop.eup %7712  ;;  %v2455_v58 = vpop.xlane.xlu0 %2454  ;;  %v2834_v49 = vsel %vm2320_vm3, %v9835_v19, 0.0  ;;  %v2967_v56 = vmul.f32 %v7709_v15, %v10926_v21 }
 0x516   :  { %7718 = vpow2.f32 %v2667_v6  ;;  %v2557_v46 = vsub.f32 %v9548_v41, %v2455_v58  ;;  %2835 = vadd.xlane.f32.xlu0 %v2834_v49  ;;  %v2965_v11 = vmul.f32 %v7713_v60, %v9572_v59  ;;  %v7715_v1 = vpop.eup %7714  ;;  %v10927_v59 = vld [vmem:[#allocation24_spill] sm:$0xff]  ;;  %v10928_v60 = vld [vmem:[#allocation30_spill] sm:$0xff] }
 0x517   :  { %2826 = vadd.xlane.f32.xlu1 %v2825_v61  ;;  %v2473_v42 = vpop.xlane.xlu1 %2472  ;;  %v2562_v3 = vsub.f32 %v10927_v59, %v9810_v62  ;;  %v2968_v58 = vmul.f32 %v7715_v1, %v10928_v60  ;;  %v10929_v59 = vld [vmem:[#allocation29_spill] sm:$0xff] }
 0x518   :  { %v2665_v18 = vmul.f32 1.442695, %v2557_v46  ;;  %6377 = vmatprep.mubr.msk.f32.mxu0 %vm2320_vm3, %v2965_v11  ;;  %v2563_v46 = vsub.f32 %v9540_v32, %v2473_v42  ;;  %v2564_v42 = vsub.f32 %v9532_v38, %v2476_v33 }
 0x519   :  { %6378 = vmatmul.mubr.msk.f32.gmra.mrb[60].mxu0 %vm2320_vm3, %v2966_v20  ;;  %v2464_v41 = vpop.xlane.xlu0 %2463  ;;  %v2675_v62 = vmul.f32 1.442695, %v2562_v3 }
 0x51a   :  { %7720 = vpow2.f32 %v2665_v18  ;;  %v2560_v6 = vsub.f32 %v9558_v28, %v2464_v41  ;;  %6380 = vmatprep.mubr.msk.f32.mxu0 %vm2320_vm3, %v2967_v56  ;;  %v2677_v1 = vmul.f32 1.442695, %v2563_v46 }
 0x51b   :  { %v2482_v49 = vpop.xlane.xlu1 %2481 }
 0x51c   :  { %v9853_v25 = vpop.eup %7716  ;;  %v2671_v15 = vmul.f32 1.442695, %v2560_v6  ;;  %v2679_v6 = vmul.f32 1.442695, %v2564_v42  ;;  %v2566_v3 = vsub.f32 %v10929_v59, %v2482_v49  ;;  %v10931_v59 = vld [vmem:[#allocation8_spill] sm:$0xff] }
 0x51d   :  { %6381 = vmatmul.mubr.msk.f32.gmra.mrb[62].mxu0 %vm2320_vm3, %v2968_v58  ;;  %v2461_v61 = vpop.xlane.xlu0 %2460  ;;  %v2831_v28 = vsel %vm2320_vm3, %v9853_v25, 0.0  ;;  %v10930_v58 = vld [vmem:[#allocation31_spill] sm:$0xff] }
 0x51e   :  { %7722 = vpow2.f32 %v2671_v15  ;;  %v2559_v11 = vsub.f32 %v9562_v13, %v2461_v61  ;;  %2832 = vadd.xlane.f32.xlu1 %v2831_v28  ;;  %v2683_v15 = vmul.f32 1.442695, %v2566_v3  ;;  %v7454_v3 = vunpack.i.h.bf16 %v10931_v59 }
 0x51f   :  { %v2479_v63 = vpop.xlane.xlu1 %2478  ;;  %7724 = vpow2.f32 %v2673_v45 }
 0x520   :  { %v9860_v20 = vpop.eup %7718  ;;  %v2669_v23 = vmul.f32 1.442695, %v2559_v11  ;;  %v2565_v32 = vsub.f32 %v9554_v37, %v2479_v63 }
 0x521   :  { %v2734_v18 = vpop.xlane.xlu0 %2733  ;;  %v2840_v21 = vsel %vm2320_vm3, %v9860_v20, 0.0 }
 0x522   :  { %7726 = vpow2.f32 %v2669_v23  ;;  %2841 = vadd.xlane.f32.xlu0 %v2840_v21  ;;  %v2681_v41 = vmul.f32 1.442695, %v2565_v32 }
 0x523   :  { %7728 = vpow2.f32 %v2675_v62  ;;  %v2488_v13 = vpop.xlane.xlu1 %2487 }
 0x524   :  { %v9866_v56 = vpop.eup %7720  ;;  %7730 = vpow2.f32 %v2677_v1  ;;  %v2568_v45 = vsub.f32 %v10930_v58, %v2488_v13 }
 0x525   :  { %7732 = vrcp.f32 %v2734_v18  ;;  %v2731_v60 = vpop.xlane.xlu0 %2730  ;;  %v2837_v37 = vsel %vm2320_vm3, %v9866_v56, 0.0 }
 0x526   :  { %7734 = vrcp.f32 %v2731_v60  ;;  %2838 = vadd.xlane.f32.xlu1 %v2837_v37  ;;  %v2687_v23 = vmul.f32 1.442695, %v2568_v45  ;;  %v7453_v60 = vunpack.i.l.bf16 %v10931_v59 }
 0x527   :  { %v2485_v38 = vpop.xlane.xlu1 %2484  ;;  %7736 = vpow2.f32 %v2681_v41 }
 0x528   :  { %v9871_v33 = vpop.eup %7722  ;;  %v2567_v46 = vsub.f32 %v9568_v31, %v2485_v38  ;;  %7738 = vpow2.f32 %v2679_v6 }
 0x529   :  { %v2491_v61 = vpop.xlane.xlu0 %2490  ;;  %v2846_v49 = vsel %vm2320_vm3, %v9871_v33, 0.0  ;;  %v9877_v28 = vpop.eup %7724 }
 0x52a   :  { %v2685_v11 = vmul.f32 1.442695, %v2567_v46  ;;  %v2569_v62 = vsub.f32 %v9598_v9, %v2491_v61  ;;  %2847 = vadd.xlane.f32.xlu0 %v2846_v49  ;;  %v2849_v42 = vsel %vm2320_vm3, %v9877_v28, 0.0  ;;  %v10932_v61 = vld [vmem:[#allocation34_spill] sm:$0xff] }
 0x52b   :  { %v2740_v63 = vpop.xlane.xlu1 %2739 }
 0x52c   :  { %v9880_v1 = vpop.eup %7726  ;;  %7740 = vpow2.f32 %v2685_v11  ;;  %v2689_v13 = vmul.f32 1.442695, %v2569_v62 }
 0x52d   :  { %v9882_v32 = vpop.eup %7728  ;;  %7742 = vpow2.f32 %v2683_v15  ;;  %v2746_v31 = vpop.xlane.xlu0 %2745  ;;  %v2843_v18 = vsel %vm2320_vm3, %v9880_v1, 0.0 }
 0x52e   :  { %v9888_v21 = vpop.eup %7730  ;;  %2850 = vadd.xlane.f32.xlu0 %v2849_v42  ;;  %2844 = vadd.xlane.f32.xlu1 %v2843_v18  ;;  %7744 = vpow2.f32 %v2687_v23  ;;  %v2852_v45 = vsel %vm2320_vm3, %v9882_v32, 0.0 }
 0x52f   :  { %v7733_v9 = vpop.eup %7732  ;;  %v2494_v41 = vpop.xlane.xlu1 %2493  ;;  %7746 = vrcp.f32 %v2740_v63  ;;  %v2855_v58 = vsel %vm2320_vm3, %v9888_v21, 0.0 }
 0x530   :  { %v7735_v6 = vpop.eup %7734  ;;  %v2570_v37 = vsub.f32 %v9593_v24, %v2494_v41  ;;  %v2970_v49 = vmul.f32 %v7733_v9, %v10932_v61  ;;  %7748 = vpow2.f32 %v2689_v13  ;;  %v10933_v24 = vld [vmem:[#allocation17_spill] sm:$0xff] }
 0x531   :  { %v2743_v38 = vpop.xlane.xlu0 %2742  ;;  %v2969_v46 = vmul.f32 %v7735_v6, %v9622_v50  ;;  %v9898_v15 = vpop.eup %7736  ;;  %v7464_v63 = vunpack.i.h.bf16 %v10933_v24  ;;  %v7463_v23 = vunpack.i.l.bf16 %v10933_v24  ;;  %v6951_v50 = vpack.c.bf16 %v7454_v3, %v7453_v60  ;;  %v10934_v60 = vld [vmem:[#allocation23_spill] sm:$0xff] }
 0x532   :  { %v2691_v11 = vmul.f32 1.442695, %v2570_v37  ;;  %2856 = vadd.xlane.f32.xlu0 %v2855_v58  ;;  %2853 = vadd.xlane.f32.xlu1 %v2852_v45  ;;  %v9901_v62 = vpop.eup %7738  ;;  %7750 = vrcp.f32 %v2743_v38  ;;  %v2861_v13 = vsel %vm2320_vm3, %v9898_v15, 0.0  ;;  %v7509_v37 = vunpack.i.h.bf16 %v10934_v60 }
 0x533   :  { %6399 = vmatprep.mubr.msk.f32.mxu0 %vm2320_vm3, %v2969_v46  ;;  %v2737_v42 = vpop.xlane.xlu1 %2736  ;;  %v2858_v41 = vsel %vm2320_vm3, %v9901_v62, 0.0  ;;  %v6955_v3 = vpack.c.bf16 %v7464_v63, %v7463_v23  ;;  %v7508_v38 = vunpack.i.l.bf16 %v10934_v60  ;;  %v10935_v63 = vld [vmem:[#allocation9_spill] sm:$0xff] }
 0x534   :  { %7752 = vpow2.f32 %v2691_v11  ;;  %6400 = vmatmul.mubr.msk.f32.vlgmr.msra.gmra.mrb[64].mxu0 %vm2320_vm3, %v2970_v49  ;;  %v7479_v23 = vunpack.i.h.bf16 %v10935_v63 }
 0x535   :  { %6950 = vmatpush3.bf16.msra.mxu0 %v9825_v54  ;;  %7754 = vrcp.f32 %v2737_v42  ;;  %v9908_v18 = vpop.xlane.xlu0 %2496 }
 0x536   :  { %v9912_v9 = vpop.eup %7740  ;;  %6952 = vmatprep.subr.bf16.mxu0 %v6951_v50  ;;  %2862 = vadd.xlane.f32.xlu0 %v2861_v13  ;;  %7756 = vrcp.f32 %v2746_v31  ;;  %v7478_v31 = vunpack.i.l.bf16 %v10935_v63  ;;  %v10938_v63 = vld [vmem:[#allocation40_spill] sm:$0xff] }
 0x537   :  { %v9916_v6 = vpop.eup %7742  ;;  %2859 = vadd.xlane.f32.xlu1 %v2858_v41  ;;  %v2500_v59 = vpop.xlane.xlu1 %2499  ;;  %v2867_v54 = vsel %vm2320_vm3, %v9912_v9, 0.0 }
 0x538   :  { %v2572_v58 = vsub.f32 %v9602_v29, %v2500_v59  ;;  %v9923_v46 = vpop.eup %7744  ;;  %v2864_v49 = vsel %vm2320_vm3, %v9916_v6, 0.0  ;;  %v6959_v29 = vpack.c.bf16 %v7509_v37, %v7508_v38  ;;  %v9937_v60 = vpack.c.bf16 %v7479_v23, %v7478_v31 }
 0x539   :  { %6954 = vmatpush3.bf16.msra.mxu0 %v6951_v50  ;;  %v2752_v45 = vpop.xlane.xlu0 %2751  ;;  %v7747_v11 = vpop.eup %7746  ;;  %v2870_v41 = vsel %vm2320_vm3, %v9923_v46, 0.0 }
 0x53a   :  { %v2695_v61 = vmul.f32 1.442695, %v2572_v58  ;;  %6956 = vmatprep.subr.bf16.mxu0 %v6955_v3  ;;  %2868 = vadd.xlane.f32.xlu0 %v2867_v54  ;;  %v9927_v24 = vpop.eup %7748 }
 0x53b   :  { %2865 = vadd.xlane.f32.xlu1 %v2864_v49  ;;  %v2873_v58 = vsel %vm2320_vm3, %v9927_v24, 0.0 }
 0x53c   :  { %7758 = vpow2.f32 %v2695_v61  ;;  %v7751_v42 = vpop.eup %7750 }
 0x53d   :  { %7760 = vrcp.f32 %v2752_v45  ;;  %6958 = vmatpush3.bf16.msra.mxu0 %v6955_v3  ;;  %v2749_v50 = vpop.xlane.xlu0 %2748  ;;  %v2972_v3 = vmul.f32 %v7747_v11, %v9635_v48  ;;  %v2973_v45 = vmul.f32 %v7751_v42, %v9646_v12  ;;  %v10939_v12 = vld [vmem:[#allocation39_spill] sm:$0xff] }
 0x53e   :  { %v9931_v13 = vpop.eup %7752  ;;  %7762 = vrcp.f32 %v2749_v50  ;;  %6960 = vmatprep.subr.bf16.mxu0 %v6959_v29  ;;  %v10940_v50 = vld [vmem:[#allocation12_spill] sm:$0xff] }
 0x53f   :  { %10936 = vst [vmem:[#allocation27_spill] sm:$0xff] %v9931_v13  ;;  %v7755_v59 = vpop.eup %7754  ;;  %2871 = vadd.xlane.f32.xlu1 %v2870_v41  ;;  %v2876_v54 = vsel %vm2320_vm3, %v9931_v13, 0.0 }
 0x540   :  { %2877 = vadd.xlane.f32.xlu0 %v2876_v54  ;;  %v2971_v37 = vmul.f32 %v7755_v59, %v9650_v10  ;;  %v7757_v38 = vpop.eup %7756 }
 0x541   :  { %6962 = vmatpush3.bf16.msra.mxu0 %v6959_v29  ;;  %v2974_v10 = vmul.f32 %v7757_v38, %v9640_v4  ;;  %v2503_v29 = vpop.xlane.xlu0 %2502  ;;  %v2506_v4 = vpop.xlane.xlu1 %2505  ;;  %v10942_v38 = vld [vmem:[#allocation33_spill] sm:$0xff] }
 0x542   :  { %6980 = vmatprep.subr.bf16.mxu0 %v9937_v60  ;;  %6402 = vmatprep.mubr.msk.f32.mxu0 %vm2320_vm3, %v2971_v37 }
 0x543   :  { %2874 = vadd.xlane.f32.xlu1 %v2873_v58  ;;  %6403 = vmatmul.mubr.msk.f32.gmra.mrb[66].mxu0 %vm2320_vm3, %v2972_v3  ;;  %v10941_v3 = vld [vmem:[#allocation19_spill] sm:$0xff]  ;;  %v2571_v58 = vsub.f32 %v10942_v38, %v9908_v18 }
 0x544   :  { %6405 = vmatprep.mubr.msk.f32.mxu0 %vm2320_vm3, %v2973_v45 }
 0x545   :  { %v2509_v42 = vpop.xlane.xlu0 %2508  ;;  %v2512_v41 = vpop.xlane.xlu1 %2511 }
 0x546   :  { %v9949_v61 = vpop.eup %7758 }
 0x547   :  { %10937 = vst [vmem:[#allocation10_spill] sm:$0xff] %v9949_v61  ;;  %v7761_v48 = vpop.eup %7760  ;;  %6406 = vmatmul.mubr.msk.f32.gmra.mrb[68].mxu0 %vm2320_vm3, %v2974_v10  ;;  %v2882_v49 = vsel %vm2320_vm3, %v9949_v61, 0.0 }
 0x548   :  { %v7763_v11 = vpop.eup %7762  ;;  %2883 = vadd.xlane.f32.xlu0 %v2882_v49  ;;  %v2976_v31 = vmul.f32 %v7761_v48, %v10939_v12  ;;  %v10943_v48 = vld [vmem:[#allocation4_spill] sm:$0xff] }
 0x549   :  { %v2975_v23 = vmul.f32 %v7763_v11, %v10938_v63  ;;  %v7459_v49 = vunpack.i.h.bf16 %v10943_v48  ;;  %v7458_v11 = vunpack.i.l.bf16 %v10943_v48  ;;  %v10947_v48 = vld [vmem:[#allocation38_spill] sm:$0xff] }
 0x54a   :  { %v2575_v13 = vsub.f32 %v10947_v48, %v2509_v42 }
 0x54b   :  { %6408 = vmatprep.mubr.msk.f32.mxu0 %vm2320_vm3, %v2975_v23  ;;  %v2693_v23 = vmul.f32 1.442695, %v2571_v58  ;;  %v6967_v18 = vpack.c.bf16 %v7459_v49, %v7458_v11  ;;  %v10949_v49 = vld [vmem:[#allocation14_spill] sm:$0xff] }
 0x54c   :  { %6409 = vmatmul.mubr.msk.f32.gmra.mrb[70].mxu0 %vm2320_vm3, %v2976_v31  ;;  %v10944_v31 = vld [vmem:[#allocation36_spill] sm:$0xff]  ;;  %v7474_v11 = vunpack.i.h.bf16 %v10949_v49 }
 0x554   :  { %7516 = vrot.lane.b32.xlu1 %v10940_v50, %s7956_s26  ;;  %v2573_v50 = vsub.f32 %v10944_v31, %v2503_v29  ;;  %v10950_v31 = vld [vmem:[#allocation37_spill] sm:$0xff] }
 0x555   :  { %v2758_v59 = vpop.xlane.xlu0 %2757 }
 0x556   :  { %7764 = vrcp.f32 %v2758_v59 }
 0x559   :  { %v2755_v54 = vpop.xlane.xlu1 %2754 }
 0x55a   :  { %7766 = vrcp.f32 %v2755_v54 }
 0x55d   :  { %v2764_v37 = vpop.xlane.xlu1 %2763 }
 0x55e   :  { %7511 = vrot.lane.b32.xlu0 %v10941_v3, %s7956_s26  ;;  %7768 = vrcp.f32 %v2764_v37  ;;  %v10945_v3 = vld [vmem:[#allocation35_spill] sm:$0xff] }
 0x55f   :  { %v2574_v61 = vsub.f32 %v10945_v3, %v2506_v4  ;;  %v10946_v37 = vld [vmem:[#allocation11_spill] sm:$0xff] }
 0x560   :  { %v7765_v10 = vpop.eup %7764  ;;  %v7469_v38 = vunpack.i.h.bf16 %v10946_v37 }
 0x561   :  { %v2761_v45 = vpop.xlane.xlu1 %2760  ;;  %v2978_v59 = vmul.f32 %v7765_v10, %v9680_v26  ;;  %v2697_v26 = vmul.f32 1.442695, %v2573_v50  ;;  %v2699_v58 = vmul.f32 1.442695, %v2574_v61  ;;  %v10951_v61 = vld [vmem:[#allocation7_spill] sm:$0xff] }
 0x562   :  { %7770 = vrcp.f32 %v2761_v45  ;;  %v7468_v45 = vunpack.i.l.bf16 %v10946_v37  ;;  %v7484_v3 = vunpack.i.h.bf16 %v10951_v61  ;;  %v7483_v37 = vunpack.i.l.bf16 %v10951_v61 }
 0x563   :  { %7772 = vpow2.f32 %v2693_v23 }
 0x564   :  { %v7767_v63 = vpop.eup %7766  ;;  %v6971_v23 = vpack.c.bf16 %v7469_v38, %v7468_v45  ;;  %v9987_v48 = vpack.c.bf16 %v7484_v3, %v7483_v37  ;;  %v10952_v3 = vld [vmem:[#allocation5_spill] sm:$0xff] }
 0x565   :  { %v2977_v12 = vmul.f32 %v7767_v63, %v9685_v52  ;;  %v2770_v54 = vpop.xlane.xlu0 %2769  ;;  %v10948_v52 = vld [vmem:[#allocation6_spill] sm:$0xff]  ;;  %v7473_v63 = vunpack.i.l.bf16 %v10949_v49  ;;  %v7489_v37 = vunpack.i.h.bf16 %v10952_v3 }
 0x566   :  { %7774 = vrcp.f32 %v2770_v54 }
 0x567   :  { %6427 = vmatprep.mubr.msk.f32.mxu1 %vm2320_vm3, %v2977_v12  ;;  %v2701_v12 = vmul.f32 1.442695, %v2575_v13  ;;  %v6975_v13 = vpack.c.bf16 %v7474_v11, %v7473_v63 }
 0x568   :  { %6428 = vmatmul.mubr.msk.f32.vlgmr.msra.gmra.mrb[40].mxu1 %vm2320_vm3, %v2978_v59  ;;  %v7769_v4 = vpop.eup %7768  ;;  %v2576_v59 = vsub.f32 %v10950_v31, %v2512_v41 }
 0x569   :  { %6966 = vmatpush3.bf16.msra.mxu1 %v10948_v52  ;;  %v2767_v29 = vpop.xlane.xlu1 %2766  ;;  %v2980_v50 = vmul.f32 %v7769_v4, %v9690_v7 }
 0x56a   :  { %6968 = vmatprep.subr.bf16.mxu1 %v6967_v18  ;;  %7776 = vrcp.f32 %v2767_v29 }
 0x56b   :  { %7778 = vpow2.f32 %v2697_v26 }
 0x56c   :  { %v7771_v10 = vpop.eup %7770  ;;  %7780 = vpow2.f32 %v2699_v58 }
 0x56d   :  { %6970 = vmatpush3.bf16.msra.mxu1 %v6967_v18  ;;  %v2979_v42 = vmul.f32 %v7771_v10, %v9695_v34  ;;  %v2776_v54 = vpop.xlane.xlu0 %2775  ;;  %7782 = vpow2.f32 %v2701_v12  ;;  %v9985_v41 = vpop.eup %7772  ;;  %v2703_v18 = vmul.f32 1.442695, %v2576_v59 }
 0x56e   :  { %6972 = vmatprep.subr.bf16.mxu1 %v6971_v23  ;;  %7784 = vrcp.f32 %v2776_v54  ;;  %v2879_v26 = vsel %vm2320_vm3, %v9985_v41, 0.0 }
 0x56f   :  { %6430 = vmatprep.mubr.msk.f32.mxu1 %vm2320_vm3, %v2979_v42 }
 0x570   :  { %6431 = vmatmul.mubr.msk.f32.gmra.mrb[42].mxu1 %vm2320_vm3, %v2980_v50  ;;  %v7775_v7 = vpop.eup %7774 }
 0x571   :  { %6974 = vmatpush3.bf16.msra.mxu1 %v6971_v23  ;;  %v2773_v34 = vpop.xlane.xlu1 %2772  ;;  %v2982_v29 = vmul.f32 %v7775_v7, %v9700_v22 }
 0x572   :  { %6976 = vmatprep.subr.bf16.mxu1 %v6975_v13  ;;  %7786 = vrcp.f32 %v2773_v34  ;;  %v10953_v34 = vld [vmem:[#allocation41_spill] sm:$0xff] }
 0x573   :  { %v2782_v45 = vpop.xlane.xlu0 %2781  ;;  %7788 = vpow2.f32 %v2703_v18 }
 0x574   :  { %v7777_v38 = vpop.eup %7776  ;;  %7790 = vrcp.f32 %v2782_v45 }
 0x575   :  { %6978 = vmatpush3.bf16.msra.mxu1 %v6975_v13  ;;  %v2981_v52 = vmul.f32 %v7777_v38, %v9707_v2  ;;  %v9995_v58 = vpop.eup %7778  ;;  %v10954_v38 = vld [vmem:[#allocation21_spill] sm:$0xff] }
 0x576   :  { %6996 = vmatprep.subr.bf16.mxu1 %v9987_v48  ;;  %v9998_v10 = vpop.eup %7780  ;;  %v2885_v22 = vsel %vm2320_vm3, %v9995_v58, 0.0  ;;  %v7499_v45 = vunpack.i.h.bf16 %v10954_v38 }
 0x577   :  { %v2779_v4 = vpop.xlane.xlu1 %2778  ;;  %6433 = vmatprep.mubr.msk.f32.mxu1 %vm2320_vm3, %v2981_v52  ;;  %v10000_v2 = vpop.eup %7782  ;;  %v2888_v12 = vsel %vm2320_vm3, %v9998_v10, 0.0  ;;  %v7498_v52 = vunpack.i.l.bf16 %v10954_v38 }
 0x578   :  { %2880 = vadd.xlane.f32.xlu1 %v2879_v26  ;;  %7792 = vrcp.f32 %v2779_v4  ;;  %6434 = vmatmul.mubr.msk.f32.gmra.mrb[44].mxu1 %vm2320_vm3, %v2982_v29  ;;  %v7785_v49 = vpop.eup %7784  ;;  %v2891_v31 = vsel %vm2320_vm3, %v10000_v2, 0.0 }
 0x579   :  { %v2984_v42 = vmul.f32 %v7785_v49, %v9712_v8  ;;  %v6987_v49 = vpack.c.bf16 %v7499_v45, %v7498_v52 }
 0x57b   :  { %v2788_v63 = vpop.xlane.xlu0 %2787 }
 0x57c   :  { %v7787_v11 = vpop.eup %7786  ;;  %2886 = vadd.xlane.f32.xlu1 %v2885_v22  ;;  %7794 = vrcp.f32 %v2788_v63 }
 0x57d   :  { %2889 = vadd.xlane.f32.xlu0 %v2888_v12  ;;  %v2983_v23 = vmul.f32 %v7787_v11, %v9719_v27  ;;  %v10011_v54 = vpop.eup %7788  ;;  %v7488_v27 = vunpack.i.l.bf16 %v10952_v3 }
 0x57e   :  { %v7791_v50 = vpop.eup %7790  ;;  %v2894_v8 = vsel %vm2320_vm3, %v10011_v54, 0.0 }
 0x57f   :  { %v2785_v59 = vpop.xlane.xlu1 %2784  ;;  %6436 = vmatprep.mubr.msk.f32.mxu1 %vm2320_vm3, %v2983_v23  ;;  %v2986_v18 = vmul.f32 %v7791_v50, %v10953_v34  ;;  %v6983_v29 = vpack.c.bf16 %v7489_v37, %v7488_v27  ;;  %v10957_v37 = vld [vmem:[#allocation16_spill] sm:$0xff] }
 0x580   :  { %2892 = vadd.xlane.f32.xlu1 %v2891_v31  ;;  %7796 = vrcp.f32 %v2785_v59  ;;  %6437 = vmatmul.mubr.msk.f32.gmra.mrb[46].mxu1 %vm2320_vm3, %v2984_v42  ;;  %v10955_v59 = vld [vmem:[#allocation13_spill] sm:$0xff] }
 0x582   :  { %v7793_v61 = vpop.eup %7792 }
 0x583   :  { %v2985_v13 = vmul.f32 %v7793_v61, %v9729_v55  ;;  %v2794_v7 = vpop.xlane.xlu0 %2793  ;;  %v10956_v61 = vld [vmem:[#allocation15_spill] sm:$0xff] }
 0x584   :  { %2895 = vadd.xlane.f32.xlu1 %v2894_v8  ;;  %7798 = vrcp.f32 %v2794_v7 }
 0x585   :  { %6455 = vmatprep.mubr.msk.f32.mxu0 %vm2320_vm3, %v2985_v13 }
 0x586   :  { %6456 = vmatmul.mubr.msk.f32.vlgmr.msra.gmra.mrb[72].mxu0 %vm2320_vm3, %v2986_v18  ;;  %v7795_v55 = vpop.eup %7794 }
 0x587   :  { %6982 = vmatpush3.bf16.msra.mxu0 %v9937_v60  ;;  %v2791_v26 = vpop.xlane.xlu1 %2790  ;;  %v2988_v63 = vmul.f32 %v7795_v55, %v9734_v44 }
 0x588   :  { %6984 = vmatprep.subr.bf16.mxu0 %v6983_v29  ;;  %7800 = vrcp.f32 %v2791_v26 }
 0x58a   :  { %v7797_v4 = vpop.eup %7796 }
 0x58b   :  { %6986 = vmatpush3.bf16.msra.mxu0 %v6983_v29  ;;  %v2800_v22 = vpop.xlane.xlu0 %2799  ;;  %v2987_v11 = vmul.f32 %v7797_v4, %v9740_v17  ;;  %v10959_v29 = vld [vmem:[#allocation20_spill] sm:$0xff] }
 0x58c   :  { %6988 = vmatprep.subr.bf16.mxu0 %v6987_v49  ;;  %7802 = vrcp.f32 %v2800_v22  ;;  %v7494_v26 = vunpack.i.h.bf16 %v10959_v29  ;;  %v7493_v55 = vunpack.i.l.bf16 %v10959_v29 }
 0x58d   :  { %6458 = vmatprep.mubr.msk.f32.mxu0 %vm2320_vm3, %v2987_v11  ;;  %v10960_v11 = vld [vmem:[#allocation22_spill] sm:$0xff] }
 0x58e   :  { %6459 = vmatmul.mubr.msk.f32.gmra.mrb[74].mxu0 %vm2320_vm3, %v2988_v63  ;;  %v7799_v23 = vpop.eup %7798  ;;  %v7504_v63 = vunpack.i.h.bf16 %v10960_v11 }
 0x58f   :  { %6990 = vmatpush3.bf16.msra.mxu0 %v6987_v49  ;;  %v2803_v60 = vpop.xlane.xlu0 %2802  ;;  %v2797_v12 = vpop.xlane.xlu1 %2796  ;;  %v2990_v50 = vmul.f32 %v7799_v23, %v9748_v16 }
 0x590   :  { %7804 = vrcp.f32 %v2803_v60  ;;  %v6999_v60 = vpack.c.bf16 %v7494_v26, %v7493_v55 }
 0x591   :  { %7806 = vrcp.f32 %v2797_v12 }
 0x592   :  { %v7801_v42 = vpop.eup %7800 }
 0x593   :  { %v2809_v31 = vpop.xlane.xlu0 %2808  ;;  %7521 = vrot.lane.b32.xlu0 %v10955_v59, %s7956_s26  ;;  %v2989_v17 = vmul.f32 %v7801_v42, %v9755_v39  ;;  %v10958_v39 = vld [vmem:[#allocation18_spill] sm:$0xff] }
 0x594   :  { %7808 = vrcp.f32 %v2809_v31  ;;  %v2806_v44 = vpop.xlane.xlu1 %2805 }
 0x595   :  { %7810 = vrcp.f32 %v2806_v44  ;;  %7526 = vrot.lane.b32.xlu1 %v10956_v61, %s7956_s26  ;;  %6461 = vmatprep.mubr.msk.f32.mxu0 %vm2320_vm3, %v2989_v17 }
 0x596   :  { %6462 = vmatmul.mubr.msk.f32.gmra.mrb[76].mxu0 %vm2320_vm3, %v2990_v50  ;;  %v7803_v8 = vpop.eup %7802 }
 0x597   :  { %v2815_v3 = vpop.xlane.xlu0 %2814  ;;  %7531 = vrot.lane.b32.xlu0 %v10957_v37, %s7956_s26  ;;  %v2992_v45 = vmul.f32 %v7803_v8, %v9761_v0  ;;  %v7503_v0 = vunpack.i.l.bf16 %v10960_v11 }
 0x598   :  { %7812 = vrcp.f32 %v2815_v3  ;;  %v2812_v27 = vpop.xlane.xlu1 %2811 }
 0x599   :  { %7814 = vrcp.f32 %v2812_v27  ;;  %7536 = vrot.lane.b32.xlu1 %v10958_v39, %s7956_s26  ;;  %v7003_v31 = vpack.c.bf16 %v7504_v63, %v7503_v0 }
 0x59a   :  { %v7805_v16 = vpop.eup %7804 }
 0x59b   :  { %v7807_v13 = vpop.eup %7806  ;;  %v2821_v34 = vpop.xlane.xlu0 %2820  ;;  %v2993_v18 = vmul.f32 %v7805_v16, %v9767_v14 }
 0x59c   :  { %7816 = vrcp.f32 %v2821_v34  ;;  %v2818_v7 = vpop.xlane.xlu1 %2817  ;;  %v2991_v38 = vmul.f32 %v7807_v13, %v9769_v51 }
 0x59d   :  { %7818 = vrcp.f32 %v2818_v7  ;;  %6483 = vmatprep.mubr.msk.f32.mxu1 %vm2320_vm3, %v2993_v18 }
 0x59e   :  { %v7809_v52 = vpop.eup %7808  ;;  %6464 = vmatprep.mubr.msk.f32.mxu0 %vm2320_vm3, %v2991_v38 }
 0x59f   :  { %v7811_v4 = vpop.eup %7810  ;;  %6465 = vmatmul.mubr.msk.f32.gmra.mrb[78].mxu0 %vm2320_vm3, %v2992_v45  ;;  %v2995_v14 = vmul.f32 %v7809_v52, %v9777_v47  ;;  %v2830_v44 = vpop.xlane.xlu0 %2829 }
 0x5a0   :  { %v2994_v49 = vmul.f32 %v7811_v4, %v9781_v43  ;;  %v2824_v51 = vpop.xlane.xlu1 %2823 }
 0x5a1   :  { %7820 = vrcp.f32 %v2824_v51 }
 0x5a2   :  { %v7813_v22 = vpop.eup %7812  ;;  %6484 = vmatmul.mubr.msk.f32.vlgmr.msra.gmra.mrb[48].mxu1 %vm2320_vm3, %v2994_v49 }
 0x5a3   :  { %v7815_v12 = vpop.eup %7814  ;;  %6998 = vmatpush3.bf16.msra.mxu1 %v9987_v48  ;;  %6486 = vmatprep.mubr.msk.f32.mxu1 %vm2320_vm3, %v2995_v14  ;;  %v2997_v23 = vmul.f32 %v7813_v22, %v9790_v53  ;;  %v2836_v61 = vpop.xlane.xlu0 %2835 }
 0x5a4   :  { %7000 = vmatprep.subr.bf16.mxu1 %v6999_v60  ;;  %v2827_v47 = vpop.xlane.xlu1 %2826  ;;  %v2996_v43 = vmul.f32 %v7815_v12, %v9796_v57 }
 0x5a5   :  { %7822 = vrcp.f32 %v2827_v47 }
 0x5a6   :  { %v7817_v42 = vpop.eup %7816  ;;  %6487 = vmatmul.mubr.msk.f32.gmra.mrb[50].mxu1 %vm2320_vm3, %v2996_v43 }
 0x5a7   :  { %v7819_v59 = vpop.eup %7818  ;;  %7002 = vmatpush3.bf16.msra.mxu1 %v6999_v60  ;;  %6489 = vmatprep.mubr.msk.f32.mxu1 %vm2320_vm3, %v2997_v23  ;;  %v2999_v17 = vmul.f32 %v7817_v42, %v9802_v40  ;;  %v4493_v40 = vld [vmem:[%s10808_s2 + $0x10] sm:$0xff] }
 0x5a8   :  { %7004 = vmatprep.subr.bf16.mxu1 %v7003_v31  ;;  %v2998_v48 = vmul.f32 %v7819_v59, %v9807_v5  ;;  %v4494_v5 = vld [vmem:[%s10808_s2 + $0x18] sm:$0xff] }
 0x5a9   :  { %v7545_v8 = vpack.i.bf16 %v4494_v5, %v4493_v40 }
 0x5aa   :  { %6490 = vmatmul.mubr.msk.f32.gmra.mrb[52].mxu1 %vm2320_vm3, %v2998_v48 }
 0x5ab   :  { %v7821_v53 = vpop.eup %7820  ;;  %7006 = vmatpush3.bf16.msra.mxu1 %v7003_v31  ;;  %6492 = vmatprep.mubr.msk.f32.mxu1 %vm2320_vm3, %v2999_v17  ;;  %v2833_v37 = vpop.xlane.xlu1 %2832 }
 0x5ac   :  { %v3000_v57 = vmul.f32 %v7821_v53, %v9823_v30  ;;  %v4491_v30 = vld [vmem:[%s10808_s2] sm:$0xff]  ;;  %7546 = vrot.lane.b32.xlu1 %v7545_v8, %s7957_s11 }
 0x5ae   :  { %6493 = vmatmul.mubr.msk.f32.gmra.mrb[54].mxu1 %vm2320_vm3, %v3000_v57 }
 0x5af   :  { %v7823_v50 = vpop.eup %7822  ;;  %v2842_v27 = vpop.xlane.xlu0 %2841 }
 0x5b0   :  { %v3001_v3 = vmul.f32 %v7823_v50, %v9829_v36  ;;  %v4492_v36 = vld [vmem:[%s10808_s2 + $0x8] sm:$0xff]  ;;  %s7958_s2 = smov 8  }
 0x5b1   :  { %v7540_v39 = vpack.i.bf16 %v4492_v36, %v4491_v30 }
 0x5b2   :  { %6511 = vmatprep.mubr.msk.f32.mxu0 %vm2320_vm3, %v3001_v3 }
 0x5b3   :  { %7541 = vrot.lane.b32.xlu0 %v7540_v39, %s7957_s11  ;;  %v2839_v16 = vpop.xlane.xlu1 %2838 }
 0x5b7   :  { %v2848_v13 = vpop.xlane.xlu0 %2847 }
 0x5bb   :  { %v2851_v34 = vpop.xlane.xlu0 %2850  ;;  %v2845_v18 = vpop.xlane.xlu1 %2844 }
 0x5bc   :  { %7824 = vrcp.f32 %v2851_v34 }
 0x5bf   :  { %v2854_v7 = vpop.xlane.xlu1 %2853  ;;  %v2857_v38 = vpop.xlane.xlu0 %2856 }
 0x5c0   :  { %7826 = vrcp.f32 %v2854_v7 }
 0x5c1   :  { %7828 = vrcp.f32 %v2857_v38 }
 0x5c2   :  { %7830 = vrcp.f32 %v2830_v44 }
 0x5c3   :  { %v2863_v29 = vpop.xlane.xlu0 %2862 }
 0x5c4   :  { %v2860_v45 = vpop.xlane.xlu1 %2859 }
 0x5c5   :  { %7832 = vrcp.f32 %v2860_v45 }
 0x5c6   :  { %v7825_v52 = vpop.eup %7824  ;;  %7834 = vrcp.f32 %v2863_v29 }
 0x5c7   :  { %v3009_v26 = vmul.f32 %v7825_v52, %v9877_v28  ;;  %v2869_v14 = vpop.xlane.xlu0 %2868  ;;  %7836 = vrcp.f32 %v2833_v37 }
 0x5c8   :  { %v2866_v55 = vpop.xlane.xlu1 %2865  ;;  %7838 = vrcp.f32 %v2836_v61 }
 0x5c9   :  { %6539 = vmatprep.mubr.msk.f32.mxu1 %vm2320_vm3, %v3009_v26  ;;  %7840 = vrcp.f32 %v2866_v55 }
 0x5ca   :  { %7842 = vrcp.f32 %v2869_v14  ;;  %v7827_v60 = vpop.eup %7826 }
 0x5cb   :  { %7844 = vrcp.f32 %v2839_v16  ;;  %v7829_v23 = vpop.eup %7828  ;;  %v3010_v17 = vmul.f32 %v7827_v60, %v9882_v32 }
 0x5cc   :  { %v2872_v4 = vpop.xlane.xlu1 %2871  ;;  %v7831_v59 = vpop.eup %7830  ;;  %v3011_v53 = vmul.f32 %v7829_v23, %v9888_v21 }
 0x5cd   :  { %v10082_v51 = vpop.xlane.xlu0 %2877  ;;  %7846 = vrcp.f32 %v2872_v4  ;;  %v3002_v32 = vmul.f32 %v7831_v59, %v9818_v35 }
 0x5ce   :  { %7848 = vrcp.f32 %v2842_v27 }
 0x5cf   :  { %v7833_v48 = vpop.eup %7832  ;;  %7850 = vrcp.f32 %v2845_v18 }
 0x5d0   :  { %v2875_v49 = vpop.xlane.xlu1 %2874  ;;  %v7835_v57 = vpop.eup %7834  ;;  %7852 = vrcp.f32 %v2848_v13  ;;  %v3012_v3 = vmul.f32 %v7833_v48, %v9901_v62 }
 0x5d1   :  { %v7837_v50 = vpop.eup %7836  ;;  %7854 = vrcp.f32 %v2875_v49  ;;  %v3013_v21 = vmul.f32 %v7835_v57, %v9898_v15 }
 0x5d2   :  { %v7839_v61 = vpop.eup %7838  ;;  %v3003_v27 = vmul.f32 %v7837_v50, %v9853_v25  ;;  %7856 = vrcp.f32 %v10082_v51 }
 0x5d3   :  { %v7841_v40 = vpop.eup %7840  ;;  %v3004_v15 = vmul.f32 %v7839_v61, %v9835_v19 }
 0x5d4   :  { %v7517_v22 = vpop.permute.xlu1 %7516  ;;  %v7843_v30 = vpop.eup %7842  ;;  %v3014_v35 = vmul.f32 %v7841_v40, %v9916_v6 }
 0x5d5   :  { %v7519_v11 = vunpack.i.h.bf16 %v7517_v22  ;;  %v7518_v63 = vunpack.i.l.bf16 %v7517_v22  ;;  %v10084_v0 = vpop.xlane.xlu0 %2883  ;;  %v7845_v8 = vpop.eup %7844  ;;  %v3015_v36 = vmul.f32 %v7843_v30, %v9912_v9 }
 0x5d6   :  { %v3005_v16 = vmul.f32 %v7845_v8, %v9866_v56 }
 0x5d7   :  { %v7007_v28 = vpack.c.bf16 %v7519_v11, %v7518_v63  ;;  %v7847_v62 = vpop.eup %7846 }
 0x5d8   :  { %v10086_v12 = vpop.f32.mrb[56].mxu0  ;;  %v7849_v39 = vpop.eup %7848  ;;  %v3016_v13 = vmul.f32 %v7847_v62, %v9923_v46 }
 0x5d9   :  { %v10088_v47 = vpop.f32.mrb[57].mxu0  ;;  %7008 = vmatprep.subr.bf16.mxu1 %v7007_v28  ;;  %v7512_v43 = vpop.permute.xlu0 %7511  ;;  %v3006_v6 = vmul.f32 %v7849_v39, %v9860_v20 }
 0x5da   :  { %7010 = vmatpush3.bf16.msra.mxu1 %v7007_v28  ;;  %v7514_v42 = vunpack.i.h.bf16 %v7512_v43  ;;  %v7513_v31 = vunpack.i.l.bf16 %v7512_v43  ;;  %v7851_v25 = vpop.eup %7850 }
 0x5db   :  { %v7853_v34 = vpop.eup %7852  ;;  %v3007_v19 = vmul.f32 %v7851_v25, %v9880_v1 }
 0x5dc   :  { %v6991_v44 = vpack.c.bf16 %v7514_v42, %v7513_v31  ;;  %v7855_v9 = vpop.eup %7854  ;;  %v3008_v18 = vmul.f32 %v7853_v34, %v9871_v33 }
 0x5dd   :  { %6540 = vmatmul.mubr.msk.f32.vlgmr.msra.gmra.mrb[56].mxu1 %vm2320_vm3, %v3010_v17  ;;  %v3017_v46 = vmul.f32 %v7855_v9, %v9927_v24 }
 0x5de   :  { %6542 = vmatprep.mubr.msk.f32.mxu1 %vm2320_vm3, %v3011_v53  ;;  %6992 = vmatprep.subr.bf16.mxu0 %v6991_v44 }
 0x5df   :  { %6994 = vmatpush3.bf16.msra.mxu0 %v6991_v44 }
 0x5e0   :  { %v10096_v5 = vpop.f32.mrb[58].mxu0 }
 0x5e1   :  { %v10099_v37 = vpop.f32.mrb[59].mxu0  ;;  %6543 = vmatmul.mubr.msk.f32.gmra.mrb[58].mxu1 %vm2320_vm3, %v3012_v3  ;;  %v7857_v3 = vpop.eup %7856 }
 0x5e2   :  { %6545 = vmatprep.mubr.msk.f32.mxu1 %vm2320_vm3, %v3013_v21  ;;  %6512 = vmatmul.mubr.msk.f32.vlgmr.msra.gmra.mrb[80].mxu0 %vm2320_vm3, %v3002_v32  ;;  %v10961_v32 = vld [vmem:[#allocation27_spill] sm:$0xff] }
 0x5e3   :  { %6514 = vmatprep.mubr.msk.f32.mxu0 %vm2320_vm3, %v3003_v27 }
 0x5e5   :  { %6546 = vmatmul.mubr.msk.f32.gmra.mrb[60].mxu1 %vm2320_vm3, %v3014_v35  ;;  %v10962_v35 = vld [vmem:[#allocation10_spill] sm:$0xff] }
 0x5e6   :  { %6548 = vmatprep.mubr.msk.f32.mxu1 %vm2320_vm3, %v3015_v36  ;;  %6515 = vmatmul.mubr.msk.f32.gmra.mrb[82].mxu0 %vm2320_vm3, %v3004_v15 }
 0x5e7   :  { %6517 = vmatprep.mubr.msk.f32.mxu0 %vm2320_vm3, %v3005_v16 }
 0x5e9   :  { %6549 = vmatmul.mubr.msk.f32.gmra.mrb[62].mxu1 %vm2320_vm3, %v3016_v13 }
 0x5ea   :  { %6518 = vmatmul.mubr.msk.f32.gmra.mrb[84].mxu0 %vm2320_vm3, %v3006_v6 }
 0x5eb   :  { %6520 = vmatprep.mubr.msk.f32.mxu0 %vm2320_vm3, %v3007_v19 }
 0x5ec   :  { %v10120_v56 = vpop.f32.mrb[60].mxu0 }
 0x5ed   :  { %v10123_v7 = vpop.f32.mrb[61].mxu0 }
 0x5ee   :  { %6521 = vmatmul.mubr.msk.f32.gmra.mrb[86].mxu0 %vm2320_vm3, %v3008_v18 }
 0x5ef   :  { %6567 = vmatprep.mubr.msk.f32.mxu0 %vm2320_vm3, %v3017_v46 }
 0x5f0   :  { %v10128_v20 = vpop.f32.mrb[62].mxu0 }
 0x5f1   :  { %v10130_v1 = vpop.f32.mrb[63].mxu0 }
 0x605   :  { %v2881_v38 = vpop.xlane.xlu1 %2880 }
 0x606   :  { %7858 = vrcp.f32 %v2881_v38 }
 0x607   :  { %v10132_v45 = vpop.f32.mrb[64].mxu0  ;;  %7860 = vrcp.f32 %v10084_v0  ;;  %v3018_v0 = vmul.f32 %v7857_v3, %v10961_v32 }
 0x608   :  { %v10134_v52 = vpop.f32.mrb[65].mxu0 }
 0x609   :  { %v2887_v29 = vpop.xlane.xlu1 %2886 }
 0x60a   :  { %v2890_v26 = vpop.xlane.xlu0 %2889  ;;  %7862 = vrcp.f32 %v2887_v29 }
 0x60b   :  { %7864 = vrcp.f32 %v2890_v26 }
 0x60d   :  { %v2893_v33 = vpop.xlane.xlu1 %2892 }
 0x60e   :  { %v7522_v55 = vpop.permute.xlu0 %7521  ;;  %7866 = vrcp.f32 %v2893_v33 }
 0x60f   :  { %v7524_v4 = vunpack.i.h.bf16 %v7522_v55  ;;  %v7523_v14 = vunpack.i.l.bf16 %v7522_v55 }
 0x610   :  { %v7859_v40 = vpop.eup %7858 }
 0x611   :  { %v7011_v24 = vpack.c.bf16 %v7524_v4, %v7523_v14  ;;  %v2896_v49 = vpop.xlane.xlu1 %2895  ;;  %v7861_v21 = vpop.eup %7860  ;;  %v3019_v30 = vmul.f32 %v7859_v40, %v9985_v41 }
 0x612   :  { %v7532_v22 = vpop.permute.xlu0 %7531  ;;  %7868 = vrcp.f32 %v2896_v49  ;;  %v3020_v62 = vmul.f32 %v7861_v21, %v10962_v35 }
 0x613   :  { %7012 = vmatprep.subr.bf16.mxu0 %v7011_v24  ;;  %v7534_v63 = vunpack.i.h.bf16 %v7532_v22  ;;  %v7533_v28 = vunpack.i.l.bf16 %v7532_v22 }
 0x614   :  { %7014 = vmatpush3.bf16.msra.mxu0 %v7011_v24  ;;  %v7863_v27 = vpop.eup %7862 }
 0x615   :  { %v7527_v11 = vpop.permute.xlu1 %7526  ;;  %v7019_v17 = vpack.c.bf16 %v7534_v63, %v7533_v28  ;;  %v7865_v16 = vpop.eup %7864  ;;  %v3021_v25 = vmul.f32 %v7863_v27, %v9995_v58 }
 0x616   :  { %v7529_v60 = vunpack.i.h.bf16 %v7527_v11  ;;  %v7528_v23 = vunpack.i.l.bf16 %v7527_v11  ;;  %v10136_v43 = vpop.f32.mrb[66].mxu0  ;;  %v3022_v9 = vmul.f32 %v7865_v16, %v9998_v10 }
 0x617   :  { %v10139_v42 = vpop.f32.mrb[67].mxu0 }
 0x618   :  { %v7015_v31 = vpack.c.bf16 %v7529_v60, %v7528_v23  ;;  %v7867_v34 = vpop.eup %7866 }
 0x619   :  { %v7537_v59 = vpop.permute.xlu1 %7536  ;;  %v3023_v46 = vmul.f32 %v7867_v34, %v10000_v2 }
 0x61a   :  { %v7539_v48 = vunpack.i.h.bf16 %v7537_v59  ;;  %v7538_v44 = vunpack.i.l.bf16 %v7537_v59  ;;  %7016 = vmatprep.subr.bf16.mxu0 %v7015_v31  ;;  %v10141_v53 = vpop.f32.mrb[68].mxu0 }
 0x61b   :  { %7018 = vmatpush3.bf16.msra.mxu0 %v7015_v31  ;;  %v10144_v57 = vpop.f32.mrb[69].mxu0 }
 0x61c   :  { %7020 = vmatprep.subr.bf16.mxu0 %v7019_v17  ;;  %v7023_v50 = vpack.c.bf16 %v7539_v48, %v7538_v44  ;;  %v7869_v18 = vpop.eup %7868 }
 0x61d   :  { %v3024_v58 = vmul.f32 %v7869_v18, %v10011_v54 }
 0x61e   :  { %v7547_v8 = vpop.permute.xlu1 %7546 }
 0x61f   :  { %7022 = vmatpush3.bf16.msra.mxu0 %v7019_v17  ;;  %v10146_v51 = vpop.f32.mrb[70].mxu0  ;;  %v7549_v36 = vunpack.i.h.bf16 %v7547_v8  ;;  %v7548_v15 = vunpack.i.l.bf16 %v7547_v8 }
 0x620   :  { %7024 = vmatprep.subr.bf16.mxu0 %v7023_v50  ;;  %v10148_v61 = vpop.f32.mrb[71].mxu0 }
 0x621   :  { %v7031_v41 = vpack.c.bf16 %v7549_v36, %v7548_v15 }
 0x623   :  { %7026 = vmatpush3.bf16.msra.mxu0 %v7023_v50 }
 0x625   :  { %v7542_v39 = vpop.permute.xlu0 %7541 }
 0x626   :  { %6568 = vmatmul.mubr.msk.f32.vlgmr.msra.gmra.mrb[88].mxu0 %vm2320_vm3, %v3018_v0  ;;  %v7544_v13 = vunpack.i.h.bf16 %v7542_v39  ;;  %v7543_v6 = vunpack.i.l.bf16 %v7542_v39 }
 0x627   :  { %6570 = vmatprep.mubr.msk.f32.mxu0 %vm2320_vm3, %v3019_v30 }
 0x628   :  { %v7027_v19 = vpack.c.bf16 %v7544_v13, %v7543_v6 }
 0x62a   :  { %6571 = vmatmul.mubr.msk.f32.gmra.mrb[90].mxu0 %vm2320_vm3, %v3020_v62  ;;  %7028 = vmatprep.subr.bf16.mxu1 %v7027_v19 }
 0x62b   :  { %6573 = vmatprep.mubr.msk.f32.mxu0 %vm2320_vm3, %v3021_v25  ;;  %7030 = vmatpush3.bf16.msra.mxu1 %v7027_v19 }
 0x62c   :  { %7032 = vmatprep.subr.bf16.mxu1 %v7031_v41 }
 0x62e   :  { %6574 = vmatmul.mubr.msk.f32.gmra.mrb[92].mxu0 %vm2320_vm3, %v3022_v9 }
 0x62f   :  { %6576 = vmatprep.mubr.msk.f32.mxu0 %vm2320_vm3, %v3023_v46  ;;  %7034 = vmatpush3.bf16.msra.mxu1 %v7031_v41 }
 0x632   :  { %6577 = vmatmul.mubr.msk.f32.gmra.mrb[94].mxu0 %vm2320_vm3, %v3024_v58 }
 0x63b   :  { %v6429_v38 = vpop.f32.mrb[40].mxu1 }
 0x63c   :  { %4267 = vrot.lane.b32.xlu1 %v6429_v38, %s7958_s2  ;;  %v3445_v10 = vpop.f32.mrb[41].mxu1 }
 0x63d   :  { %4265 = vrot.lane.b32.xlu0 %v3445_v10, %s7958_s2 }
 0x643   :  { %v6432_v2 = vpop.f32.mrb[42].mxu1 }
 0x644   :  { %4271 = vrot.lane.b32.xlu1 %v6432_v2, %s7958_s2  ;;  %v3455_v29 = vpop.f32.mrb[43].mxu1 }
 0x645   :  { %4269 = vrot.lane.b32.xlu0 %v3455_v29, %s7958_s2 }
 0x64b   :  { %v6435_v26 = vpop.f32.mrb[44].mxu1 }
 0x64c   :  { %4275 = vrot.lane.b32.xlu1 %v6435_v26, %s7958_s2  ;;  %v3465_v54 = vpop.f32.mrb[45].mxu1 }
 0x64d   :  { %4273 = vrot.lane.b32.xlu0 %v3465_v54, %s7958_s2 }
 0x653   :  { %v6438_v33 = vpop.f32.mrb[46].mxu1 }
 0x654   :  { %4279 = vrot.lane.b32.xlu1 %v6438_v33, %s7958_s2  ;;  %v3475_v55 = vpop.f32.mrb[47].mxu1 }
 0x655   :  { %4277 = vrot.lane.b32.xlu0 %v3475_v55, %s7958_s2 }
 0x659   :  { %v6457_v4 = vpop.f32.mrb[72].mxu0 }
 0x65a   :  { %4283 = vrot.lane.b32.xlu1 %v6457_v4, %s7958_s2  ;;  %v3598_v14 = vpop.f32.mrb[73].mxu0 }
 0x65b   :  { %4281 = vrot.lane.b32.xlu0 %v3598_v14, %s7958_s2 }
 0x661   :  { %v6460_v24 = vpop.f32.mrb[74].mxu0 }
 0x662   :  { %4287 = vrot.lane.b32.xlu1 %v6460_v24, %s7958_s2  ;;  %v3608_v49 = vpop.f32.mrb[75].mxu0 }
 0x663   :  { %4285 = vrot.lane.b32.xlu0 %v3608_v49, %s7958_s2 }
 0x669   :  { %v6463_v22 = vpop.f32.mrb[76].mxu0 }
 0x66a   :  { %4291 = vrot.lane.b32.xlu1 %v6463_v22, %s7958_s2  ;;  %v3618_v11 = vpop.f32.mrb[77].mxu0 }
 0x66b   :  { %4289 = vrot.lane.b32.xlu0 %v3618_v11, %s7958_s2 }
 0x672   :  { %v6466_v63 = vpop.f32.mrb[78].mxu0 }
 0x673   :  { %4295 = vrot.lane.b32.xlu1 %v6466_v63, %s7958_s2  ;;  %v3628_v28 = vpop.f32.mrb[79].mxu0 }
 0x674   :  { %4293 = vrot.lane.b32.xlu0 %v3628_v28, %s7958_s2 }
 0x675   :  { %v6485_v60 = vpop.f32.mrb[48].mxu1 }
 0x676   :  { %v3751_v23 = vpop.f32.mrb[49].mxu1 }
 0x677   :  { %4331 = vrot.lane.b32.xlu1 %v6485_v60, %s7959_s12 }
 0x678   :  { %4329 = vrot.lane.b32.xlu0 %v3751_v23, %s7959_s12 }
 0x679   :  { %v6488_v31 = vpop.f32.mrb[50].mxu1 }
 0x67a   :  { %v3761_v59 = vpop.f32.mrb[51].mxu1 }
 0x67b   :  { %4335 = vrot.lane.b32.xlu1 %v6488_v31, %s7959_s12 }
 0x67c   :  { %4333 = vrot.lane.b32.xlu0 %v3761_v59, %s7959_s12 }
 0x67d   :  { %v6491_v17 = vpop.f32.mrb[52].mxu1 }
 0x67e   :  { %v3771_v48 = vpop.f32.mrb[53].mxu1 }
 0x67f   :  { %4339 = vrot.lane.b32.xlu1 %v6491_v17, %s7959_s12 }
 0x680   :  { %4337 = vrot.lane.b32.xlu0 %v3771_v48, %s7959_s12 }
 0x681   :  { %v6494_v44 = vpop.f32.mrb[54].mxu1 }
 0x682   :  { %v3781_v50 = vpop.f32.mrb[55].mxu1 }
 0x683   :  { %4343 = vrot.lane.b32.xlu1 %v6494_v44, %s7959_s12 }
 0x684   :  { %4341 = vrot.lane.b32.xlu0 %v3781_v50, %s7959_s12 }
 0x6ae   :  { %v10190_v62 = vpop.permute.xlu1 %4267 }
 0x6af   :  { %v10193_v15 = vpop.permute.xlu0 %4265 }
 0x6b0   :  { %v6541_v3 = vpop.f32.mrb[56].mxu1 }
 0x6b1   :  { %v4057_v40 = vpop.f32.mrb[57].mxu1 }
 0x6b4   :  { %v6544_v32 = vpop.f32.mrb[58].mxu1 }
 0x6b5   :  { %v4067_v0 = vpop.f32.mrb[59].mxu1  ;;  %v6513_v21 = vpop.f32.mrb[80].mxu0 }
 0x6b6   :  { %4347 = vrot.lane.b32.xlu1 %v6513_v21, %s7959_s12  ;;  %v3904_v30 = vpop.f32.mrb[81].mxu0  ;;  %v10196_v13 = vpop.permute.xlu1 %4271 }
 0x6b7   :  { %4345 = vrot.lane.b32.xlu0 %v3904_v30, %s7959_s12  ;;  %v10199_v34 = vpop.permute.xlu0 %4269 }
 0x6b8   :  { %v6547_v27 = vpop.f32.mrb[60].mxu1 }
 0x6b9   :  { %v4077_v8 = vpop.f32.mrb[61].mxu1  ;;  %v6516_v35 = vpop.f32.mrb[82].mxu0 }
 0x6ba   :  { %4351 = vrot.lane.b32.xlu1 %v6516_v35, %s7959_s12  ;;  %v3914_v36 = vpop.f32.mrb[83].mxu0 }
 0x6bb   :  { %4349 = vrot.lane.b32.xlu0 %v3914_v36, %s7959_s12 }
 0x6bc   :  { %v6550_v39 = vpop.f32.mrb[62].mxu1 }
 0x6bd   :  { %v4087_v16 = vpop.f32.mrb[63].mxu1  ;;  %v6519_v25 = vpop.f32.mrb[84].mxu0 }
 0x6be   :  { %4355 = vrot.lane.b32.xlu1 %v6519_v25, %s7959_s12  ;;  %v3924_v6 = vpop.f32.mrb[85].mxu0  ;;  %v10202_v19 = vpop.permute.xlu1 %4275 }
 0x6bf   :  { %4353 = vrot.lane.b32.xlu0 %v3924_v6, %s7959_s12  ;;  %v10205_v18 = vpop.permute.xlu0 %4273 }
 0x6c1   :  { %v6522_v41 = vpop.f32.mrb[86].mxu0 }
 0x6c2   :  { %4359 = vrot.lane.b32.xlu1 %v6522_v41, %s7959_s12  ;;  %v3934_v9 = vpop.f32.mrb[87].mxu0 }
 0x6c3   :  { %4357 = vrot.lane.b32.xlu0 %v3934_v9, %s7959_s12 }
 0x6c6   :  { %v10208_v46 = vpop.permute.xlu1 %4279  ;;  %4395 = vrot.lane.b32.xlu1 %v6541_v3, %s7960_s1 }
 0x6c7   :  { %v10211_v58 = vpop.permute.xlu0 %4277  ;;  %4393 = vrot.lane.b32.xlu0 %v4057_v40, %s7960_s1 }
 0x6ca   :  { %4399 = vrot.lane.b32.xlu1 %v6544_v32, %s7960_s1 }
 0x6cb   :  { %4397 = vrot.lane.b32.xlu0 %v4067_v0, %s7960_s1 }
 0x6cc   :  { %v4284_v38 = vpop.permute.xlu1 %4283 }
 0x6cd   :  { %v4450_v10 = vsel %vm1111_vm1, %v10132_v45, %v4284_v38  ;;  %v4282_v2 = vpop.permute.xlu0 %4281  ;;  %v4441_v38 = vsel %vm1111_vm1, %v10088_v47, %v10193_v15  ;;  %v4443_v47 = vsel %vm1111_vm1, %v10099_v37, %v10199_v34  ;;  %v4445_v37 = vsel %vm1111_vm1, %v10123_v7, %v10205_v18 }
 0x6ce   :  { %v4449_v29 = vsel %vm1111_vm1, %v10134_v52, %v4282_v2  ;;  %4403 = vrot.lane.b32.xlu1 %v6547_v27, %s7960_s1  ;;  %v4442_v2 = vsel %vm1111_vm1, %v10086_v12, %v10190_v62  ;;  %v4444_v12 = vsel %vm1111_vm1, %v10096_v5, %v10196_v13  ;;  %v4446_v5 = vsel %vm1111_vm1, %v10120_v56, %v10202_v19 }
 0x6cf   :  { %4401 = vrot.lane.b32.xlu0 %v4077_v8, %s7960_s1  ;;  %v4447_v7 = vsel %vm1111_vm1, %v10130_v1, %v10211_v58  ;;  %v4448_v56 = vsel %vm1111_vm1, %v10128_v20, %v10208_v46 }
 0x6d2   :  { %4407 = vrot.lane.b32.xlu1 %v6550_v39, %s7960_s1 }
 0x6d3   :  { %4405 = vrot.lane.b32.xlu0 %v4087_v16, %s7960_s1 }
 0x6d4   :  { %v4288_v26 = vpop.permute.xlu1 %4287 }
 0x6d5   :  { %v4452_v54 = vsel %vm1111_vm1, %v10136_v43, %v4288_v26  ;;  %v4286_v33 = vpop.permute.xlu0 %4285 }
 0x6d6   :  { %v4451_v45 = vsel %vm1111_vm1, %v10139_v42, %v4286_v33 }
 0x6dc   :  { %v4292_v55 = vpop.permute.xlu1 %4291 }
 0x6dd   :  { %v4454_v52 = vsel %vm1111_vm1, %v10141_v53, %v4292_v55  ;;  %v4290_v4 = vpop.permute.xlu0 %4289 }
 0x6de   :  { %v4453_v14 = vsel %vm1111_vm1, %v10144_v57, %v4290_v4 }
 0x6e5   :  { %v4296_v24 = vpop.permute.xlu1 %4295 }
 0x6e6   :  { %v4456_v49 = vsel %vm1111_vm1, %v10146_v51, %v4296_v24  ;;  %v4294_v22 = vpop.permute.xlu0 %4293 }
 0x6e7   :  { %v4455_v43 = vsel %vm1111_vm1, %v10148_v61, %v4294_v22 }
 0x6e9   :  { %v4332_v60 = vpop.permute.xlu1 %4331 }
 0x6ea   :  { %v4330_v23 = vpop.permute.xlu0 %4329 }
 0x6ed   :  { %v4336_v31 = vpop.permute.xlu1 %4335 }
 0x6ee   :  { %v4334_v59 = vpop.permute.xlu0 %4333 }
 0x6ef   :  { %v4460_v62 = vsel %vm4457_vm4, %v4443_v47, %v4334_v59  ;;  %v7938_v47 = vld [vmem:[%s10806_s0 + $0x10] sm:$0xff] }
 0x6f1   :  { %v4340_v17 = vpop.permute.xlu1 %4339 }
 0x6f2   :  { %v4338_v48 = vpop.permute.xlu0 %4337 }
 0x6f3   :  { %v4462_v13 = vsel %vm4457_vm4, %v4445_v37, %v4338_v48 }
 0x6f5   :  { %v4344_v44 = vpop.permute.xlu1 %4343 }
 0x6f6   :  { %v4342_v50 = vpop.permute.xlu0 %4341 }
 0x6f7   :  { %v4464_v19 = vsel %vm4457_vm4, %v4447_v7, %v4342_v50  ;;  %v7942_v7 = vld [vmem:[%s10806_s0 + $0x30] sm:$0xff] }
 0x6f9   :  { %v6569_v11 = vpop.f32.mrb[88].mxu0 }
 0x6fa   :  { %v4210_v63 = vpop.f32.mrb[89].mxu0  ;;  %4411 = vrot.lane.b32.xlu1 %v6569_v11, %s7960_s1 }
 0x6fb   :  { %4409 = vrot.lane.b32.xlu0 %v4210_v63, %s7960_s1  ;;  %v4465_v63 = vsel %vm4457_vm4, %v4448_v56, %v4344_v44 }
 0x6fd   :  { %v6572_v42 = vpop.f32.mrb[90].mxu0 }
 0x6fe   :  { %v4220_v53 = vpop.f32.mrb[91].mxu0  ;;  %4415 = vrot.lane.b32.xlu1 %v6572_v42, %s7960_s1 }
 0x6ff   :  { %4413 = vrot.lane.b32.xlu0 %v4220_v53, %s7960_s1 }
 0x701   :  { %v6575_v57 = vpop.f32.mrb[92].mxu0 }
 0x702   :  { %v4230_v28 = vpop.f32.mrb[93].mxu0  ;;  %4419 = vrot.lane.b32.xlu1 %v6575_v57, %s7960_s1 }
 0x703   :  { %4417 = vrot.lane.b32.xlu0 %v4230_v28, %s7960_s1 }
 0x705   :  { %v6578_v51 = vpop.f32.mrb[94].mxu0 }
 0x706   :  { %v4240_v61 = vpop.f32.mrb[95].mxu0  ;;  %4423 = vrot.lane.b32.xlu1 %v6578_v51, %s7960_s1 }
 0x707   :  { %4421 = vrot.lane.b32.xlu0 %v4240_v61, %s7960_s1 }
 0x728   :  { %v4348_v3 = vpop.permute.xlu1 %4347 }
 0x729   :  { %v4467_v40 = vsel %vm4457_vm4, %v4450_v10, %v4348_v3  ;;  %v4346_v32 = vpop.permute.xlu0 %4345  ;;  %v10963_v3 = vld [vmem:[#allocation2_spill] sm:$0xff] }
 0x72a   :  { %v4466_v0 = vsel %vm4457_vm4, %v4449_v29, %v4346_v32  ;;  %v4458_v29 = vsel %vm4457_vm4, %v4441_v38, %v4330_v23  ;;  %v10329_v32 = vld [vmem:[%s10809_s5] sm:$0xff] }
 0x72c   :  { %v4352_v21 = vpop.permute.xlu1 %4351 }
 0x72d   :  { %v4469_v30 = vsel %vm4457_vm4, %v4452_v54, %v4352_v21  ;;  %v4350_v27 = vpop.permute.xlu0 %4349  ;;  %v4459_v54 = vsel %vm4457_vm4, %v4442_v2, %v4332_v60  ;;  %v7937_v2 = vld [vmem:[%s10806_s0 + $0x18] sm:$0xff] }
 0x72e   :  { %v4468_v8 = vsel %vm4457_vm4, %v4451_v45, %v4350_v27 }
 0x730   :  { %v4356_v35 = vpop.permute.xlu1 %4355 }
 0x731   :  { %v10249_v36 = vsel %vm4457_vm4, %v4454_v52, %v4356_v35  ;;  %v4354_v39 = vpop.permute.xlu0 %4353  ;;  %v4461_v52 = vsel %vm4457_vm4, %v4444_v12, %v4336_v31  ;;  %v7935_v35 = vld [vmem:[%s10806_s0 + $0x8] sm:$0xff] }
 0x732   :  { %v4470_v16 = vsel %vm4457_vm4, %v4453_v14, %v4354_v39  ;;  %v7936_v39 = vld [vmem:[%s10806_s0] sm:$0xff] }
 0x734   :  { %v4360_v25 = vpop.permute.xlu1 %4359 }
 0x735   :  { %v10253_v6 = vsel %vm4457_vm4, %v4456_v49, %v4360_v25  ;;  %v4358_v41 = vpop.permute.xlu0 %4357  ;;  %v4463_v49 = vsel %vm4457_vm4, %v4446_v5, %v4340_v17 }
 0x736   :  { %v10256_v9 = vsel %vm4457_vm4, %v4455_v43, %v4358_v41 }
 0x738   :  { %v4396_v10 = vpop.permute.xlu1 %4395 }
 0x739   :  { %v4394_v26 = vpop.permute.xlu0 %4393  ;;  %v4476_v45 = vsel %vm4474_vm5, %v4459_v54, %v4396_v10 }
 0x73a   :  { %v4475_v33 = vsel %vm4474_vm5, %v4458_v29, %v4394_v26 }
 0x73b   :  { %6587 = vmatprep.mubr.msk.f32.mxu1 %vm56_vm0, %v4475_v33 }
 0x73c   :  { %6588 = vmatmul.mubr.msk.f32.vlgmr.msra.gmra.mrb[64].mxu1 %vm56_vm0, %v4476_v45  ;;  %v4400_v15 = vpop.permute.xlu1 %4399 }
 0x73d   :  { %v4398_v55 = vpop.permute.xlu0 %4397  ;;  %v4478_v14 = vsel %vm4474_vm5, %v4461_v52, %v4400_v15 }
 0x73e   :  { %v4477_v4 = vsel %vm4474_vm5, %v4460_v62, %v4398_v55  ;;  %v7939_v62 = vld [vmem:[%s10806_s0 + $0x28] sm:$0xff] }
 0x73f   :  { %6590 = vmatprep.mubr.msk.f32.mxu1 %vm56_vm0, %v4477_v4 }
 0x740   :  { %6591 = vmatmul.mubr.msk.f32.gmra.mrb[66].mxu1 %vm56_vm0, %v4478_v14  ;;  %v4404_v34 = vpop.permute.xlu1 %4403 }
 0x741   :  { %v4402_v24 = vpop.permute.xlu0 %4401  ;;  %v4480_v43 = vsel %vm4474_vm5, %v4463_v49, %v4404_v34  ;;  %v7940_v34 = vld [vmem:[%s10806_s0 + $0x20] sm:$0xff]  ;;  %v7941_v49 = vld [vmem:[%s10806_s0 + $0x38] sm:$0xff] }
 0x742   :  { %v4479_v22 = vsel %vm4474_vm5, %v4462_v13, %v4402_v24 }
 0x743   :  { %6593 = vmatprep.mubr.msk.f32.mxu1 %vm56_vm0, %v4479_v22 }
 0x744   :  { %6594 = vmatmul.mubr.msk.f32.gmra.mrb[68].mxu1 %vm56_vm0, %v4480_v43  ;;  %v4408_v18 = vpop.permute.xlu1 %4407 }
 0x745   :  { %v4406_v11 = vpop.permute.xlu0 %4405  ;;  %v4482_v53 = vsel %vm4474_vm5, %v4465_v63, %v4408_v18 }
 0x746   :  { %v4481_v42 = vsel %vm4474_vm5, %v4464_v19, %v4406_v11 }
 0x747   :  { %6596 = vmatprep.mubr.msk.f32.mxu1 %vm56_vm0, %v4481_v42 }
 0x748   :  { %6597 = vmatmul.mubr.msk.f32.gmra.mrb[70].mxu1 %vm56_vm0, %v4482_v53 }
 0x76c   :  { %v4412_v1 = vpop.permute.xlu1 %4411 }
 0x76d   :  { %v4410_v58 = vpop.permute.xlu0 %4409  ;;  %v4484_v28 = vsel %vm4474_vm5, %v4467_v40, %v4412_v1  ;;  %v4497_v40 = vsub.s32 2, %v10963_v3  ;;  %v7943_v1 = vld [vmem:[%s10806_s0 + $0x48] sm:$0xff] }
 0x76e   :  { %v4483_v57 = vsel %vm4474_vm5, %v4466_v0, %v4410_v58 }
 0x76f   :  { %6599 = vmatprep.mubr.msk.f32.mxu1 %vm56_vm0, %v4483_v57  ;;  %v10332_v0 = vrot.slane %v10329_v32, %v4497_v40  ;;  %v7944_v57 = vld [vmem:[%s10806_s0 + $0x40] sm:$0xff] }
 0x770   :  { %v4416_v20 = vpop.permute.xlu1 %4415  ;;  %6600 = vmatmul.mubr.msk.f32.gmra.mrb[72].mxu1 %vm56_vm0, %v4484_v28 }
 0x771   :  { %v4414_v46 = vpop.permute.xlu0 %4413  ;;  %v4486_v61 = vsel %vm4474_vm5, %v4469_v30, %v4416_v20 }
 0x772   :  { %v4485_v51 = vsel %vm4474_vm5, %v4468_v8, %v4414_v46 }
 0x773   :  { %6602 = vmatprep.mubr.msk.f32.mxu1 %vm56_vm0, %v4485_v51 }
 0x774   :  { %v4420_v60 = vpop.permute.xlu1 %4419  ;;  %6603 = vmatmul.mubr.msk.f32.gmra.mrb[74].mxu1 %vm56_vm0, %v4486_v61 }
 0x775   :  { %v4418_v23 = vpop.permute.xlu0 %4417  ;;  %v4488_v59 = vsel %vm4474_vm5, %v10249_v36, %v4420_v60 }
 0x776   :  { %v4487_v31 = vsel %vm4474_vm5, %v4470_v16, %v4418_v23 }
 0x777   :  { %6605 = vmatprep.mubr.msk.f32.mxu1 %vm56_vm0, %v4487_v31  ;;  %v7945_v31 = vld [vmem:[%s10806_s0 + $0x58] sm:$0xff] }
 0x778   :  { %v4424_v17 = vpop.permute.xlu1 %4423  ;;  %6606 = vmatmul.mubr.msk.f32.gmra.mrb[76].mxu1 %vm56_vm0, %v4488_v59 }
 0x779   :  { %v4422_v48 = vpop.permute.xlu0 %4421  ;;  %v4490_v50 = vsel %vm4474_vm5, %v10253_v6, %v4424_v17  ;;  %v7946_v17 = vld [vmem:[%s10806_s0 + $0x50] sm:$0xff] }
 0x77a   :  { %v4489_v44 = vsel %vm4474_vm5, %v10256_v9, %v4422_v48 }
 0x77b   :  { %6608 = vmatprep.mubr.msk.f32.mxu1 %vm56_vm0, %v4489_v44 }
 0x77c   :  { %6609 = vmatmul.mubr.msk.f32.gmra.mrb[78].mxu1 %vm56_vm0, %v4490_v50 }
 0x80f   :  { %v6589_v21 = vpop.f32.mrb[64].mxu1 }
 0x810   :  { %v4635_v30 = vadd.f32 %v6589_v21, %v10332_v0  ;;  %v4629_v27 = vpop.f32.mrb[65].mxu1 }
 0x811   :  { %v4630_v8 = vadd.f32 %v4629_v27, %v10332_v0 }
 0x812   :  { %v10339_v36 = vadd.f32 %v7935_v35, %v4635_v30 }
 0x813   :  { %v10344_v16 = vadd.f32 %v7936_v39, %v4630_v8  ;;  %v6592_v25 = vpop.f32.mrb[66].mxu1  ;;  %v7947_v8 = vld [vmem:[%s10806_s0 + $0x68] sm:$0xff]  ;;  %v7948_v39 = vld [vmem:[%s10806_s0 + $0x60] sm:$0xff] }
 0x814   :  { %v4645_v6 = vadd.f32 %v6592_v25, %v10332_v0  ;;  %v4639_v41 = vpop.f32.mrb[67].mxu1  ;;  %v4727_v9 = vsel %vm56_vm0, %v10339_v36, 0.0 }
 0x815   :  { %v4640_v38 = vadd.f32 %v4639_v41, %v10332_v0  ;;  %4728 = vadd.xlane.f32.xlu1 %v4727_v9  ;;  %v4724_v10 = vsel %vm56_vm0, %v10344_v16, 0.0 }
 0x816   :  { %v10355_v29 = vadd.f32 %v7937_v2, %v4645_v6  ;;  %4725 = vadd.xlane.f32.xlu0 %v4724_v10 }
 0x817   :  { %v6595_v26 = vpop.f32.mrb[68].mxu1  ;;  %v10363_v15 = vadd.f32 %v7938_v47, %v4640_v38 }
 0x818   :  { %v4655_v54 = vadd.f32 %v6595_v26, %v10332_v0  ;;  %v4649_v33 = vpop.f32.mrb[69].mxu1  ;;  %v4733_v45 = vsel %vm56_vm0, %v10355_v29, 0.0  ;;  %v7949_v26 = vld [vmem:[%s10806_s0 + $0x78] sm:$0xff] }
 0x819   :  { %v4650_v12 = vadd.f32 %v4649_v33, %v10332_v0  ;;  %v4730_v24 = vsel %vm56_vm0, %v10363_v15, 0.0  ;;  %v7950_v33 = vld [vmem:[%s10806_s0 + $0x70] sm:$0xff] }
 0x81a   :  { %v10369_v55 = vadd.f32 %v7939_v62, %v4655_v54  ;;  %4734 = vadd.xlane.f32.xlu0 %v4733_v45 }
 0x81b   :  { %v6598_v52 = vpop.f32.mrb[70].mxu1  ;;  %v10377_v5 = vadd.f32 %v7940_v34, %v4650_v12 }
 0x81c   :  { %v4665_v4 = vadd.f32 %v6598_v52, %v10332_v0  ;;  %v4659_v14 = vpop.f32.mrb[71].mxu1  ;;  %v4739_v37 = vsel %vm56_vm0, %v10369_v55, 0.0 }
 0x81d   :  { %v4660_v13 = vadd.f32 %v4659_v14, %v10332_v0  ;;  %4740 = vadd.xlane.f32.xlu1 %v4739_v37  ;;  %v4736_v56 = vsel %vm56_vm0, %v10377_v5, 0.0 }
 0x81e   :  { %v10385_v22 = vadd.f32 %v7941_v49, %v4665_v4  ;;  %4731 = vadd.xlane.f32.xlu0 %v4730_v24 }
 0x81f   :  { %v10392_v18 = vadd.f32 %v7942_v7, %v4660_v13 }
 0x820   :  { %v4745_v43 = vsel %vm56_vm0, %v10385_v22, 0.0 }
 0x821   :  { %4746 = vadd.xlane.f32.xlu1 %v4745_v43  ;;  %v4742_v19 = vsel %vm56_vm0, %v10392_v18, 0.0 }
 0x822   :  { %4737 = vadd.xlane.f32.xlu0 %v4736_v56 }
 0x826   :  { %4743 = vadd.xlane.f32.xlu0 %v4742_v19 }
 0x843   :  { %v6601_v11 = vpop.f32.mrb[72].mxu1 }
 0x844   :  { %v4675_v63 = vadd.f32 %v6601_v11, %v10332_v0  ;;  %v4669_v42 = vpop.f32.mrb[73].mxu1 }
 0x845   :  { %v4670_v53 = vadd.f32 %v4669_v42, %v10332_v0 }
 0x846   :  { %v10403_v58 = vadd.f32 %v7943_v1, %v4675_v63 }
 0x847   :  { %v10408_v28 = vadd.f32 %v7944_v57, %v4670_v53  ;;  %v6604_v20 = vpop.f32.mrb[74].mxu1 }
 0x848   :  { %v4685_v46 = vadd.f32 %v6604_v20, %v10332_v0  ;;  %v4679_v51 = vpop.f32.mrb[75].mxu1  ;;  %v4751_v61 = vsel %vm56_vm0, %v10403_v58, 0.0 }
 0x849   :  { %v4680_v60 = vadd.f32 %v4679_v51, %v10332_v0  ;;  %4752 = vadd.xlane.f32.xlu1 %v4751_v61  ;;  %v4748_v23 = vsel %vm56_vm0, %v10408_v28, 0.0 }
 0x84a   :  { %v10419_v59 = vadd.f32 %v7945_v31, %v4685_v46  ;;  %4749 = vadd.xlane.f32.xlu0 %v4748_v23 }
 0x84b   :  { %v10424_v48 = vadd.f32 %v7946_v17, %v4680_v60  ;;  %v6607_v44 = vpop.f32.mrb[76].mxu1 }
 0x84c   :  { %v4695_v50 = vadd.f32 %v6607_v44, %v10332_v0  ;;  %v4689_v40 = vpop.f32.mrb[77].mxu1  ;;  %v4757_v21 = vsel %vm56_vm0, %v10419_v59, 0.0 }
 0x84d   :  { %v4690_v30 = vadd.f32 %v4689_v40, %v10332_v0  ;;  %4758 = vadd.xlane.f32.xlu1 %v4757_v21  ;;  %v4754_v27 = vsel %vm56_vm0, %v10424_v48, 0.0 }
 0x84e   :  { %v10435_v35 = vadd.f32 %v7947_v8, %v4695_v50  ;;  %4755 = vadd.xlane.f32.xlu0 %v4754_v27 }
 0x84f   :  { %v10440_v25 = vadd.f32 %v7948_v39, %v4690_v30  ;;  %v6610_v6 = vpop.f32.mrb[78].mxu1 }
 0x850   :  { %v4705_v41 = vadd.f32 %v6610_v6, %v10332_v0  ;;  %v4699_v9 = vpop.f32.mrb[79].mxu1  ;;  %v4763_v38 = vsel %vm56_vm0, %v10435_v35, 0.0 }
 0x851   :  { %v4700_v10 = vadd.f32 %v4699_v9, %v10332_v0  ;;  %4764 = vadd.xlane.f32.xlu1 %v4763_v38  ;;  %v4760_v2 = vsel %vm56_vm0, %v10440_v25, 0.0 }
 0x852   :  { %v10451_v54 = vadd.f32 %v7949_v26, %v4705_v41  ;;  %4761 = vadd.xlane.f32.xlu0 %v4760_v2  ;;  %v4973_v2 = vld [vmem:[%s10810_s3 + $0x8] sm:$0xff] }
 0x853   :  { %v10456_v45 = vadd.f32 %v7950_v33, %v4700_v10  ;;  %v4972_v10 = vld [vmem:[%s10810_s3] sm:$0xff]  ;;  %v4974_v33 = vld [vmem:[%s10810_s3 + $0x10] sm:$0xff] }
 0x854   :  { %v4769_v0 = vsel %vm56_vm0, %v10451_v54, 0.0  ;;  %v7035_v26 = vpack.c.bf16 %v4973_v2, %v4972_v10 }
 0x855   :  { %4770 = vadd.xlane.f32.xlu1 %v4769_v0  ;;  %v4766_v47 = vsel %vm56_vm0, %v10456_v45, 0.0  ;;  %v4975_v0 = vld [vmem:[%s10810_s3 + $0x18] sm:$0xff] }
 0x856   :  { %4767 = vadd.xlane.f32.xlu0 %v4766_v47  ;;  %7036 = vmatprep.subr.bf16.mxu0 %v7035_v26  ;;  %v7039_v47 = vpack.c.bf16 %v4975_v0, %v4974_v33 }
 0x857   :  { %7038 = vmatpush3.bf16.msra.mxu0 %v7035_v26 }
 0x858   :  { %7040 = vmatprep.subr.bf16.mxu0 %v7039_v47 }
 0x85b   :  { %7042 = vmatpush3.bf16.msra.mxu0 %v7039_v47 }
 0x8a2   :  { %v4729_v12 = vpop.xlane.xlu1 %4728 }
 0x8a3   :  { %v4773_v62 = vmul.f32 0.03125, %v4729_v12  ;;  %v4726_v52 = vpop.xlane.xlu0 %4725 }
 0x8a4   :  { %v4772_v4 = vmul.f32 0.03125, %v4726_v52 }
 0x8a5   :  { %v10463_v14 = vsub.f32 %v10339_v36, %v4773_v62 }
 0x8a6   :  { %v10466_v37 = vsub.f32 %v10344_v16, %v4772_v4 }
 0x8a7   :  { %v4735_v34 = vpop.xlane.xlu0 %4734  ;;  %v4805_v13 = vmul.f32 %v10463_v14, %v10463_v14 }
 0x8a8   :  { %v4775_v24 = vmul.f32 0.03125, %v4735_v34  ;;  %v4804_v49 = vmul.f32 %v10466_v37, %v10466_v37 }
 0x8a9   :  { %v4823_v43 = vsel %vm56_vm0, %v4805_v13, 0.0 }
 0x8aa   :  { %v10474_v7 = vsub.f32 %v10355_v29, %v4775_v24  ;;  %v4741_v56 = vpop.xlane.xlu1 %4740  ;;  %4824 = vadd.xlane.f32.xlu1 %v4823_v43  ;;  %v4820_v19 = vsel %vm56_vm0, %v4804_v49, 0.0 }
 0x8ab   :  { %v4777_v11 = vmul.f32 0.03125, %v4741_v56  ;;  %4821 = vadd.xlane.f32.xlu0 %v4820_v19  ;;  %v4732_v63 = vpop.xlane.xlu0 %4731 }
 0x8ac   :  { %v4774_v42 = vmul.f32 0.03125, %v4732_v63  ;;  %v4807_v53 = vmul.f32 %v10474_v7, %v10474_v7 }
 0x8ad   :  { %v10480_v1 = vsub.f32 %v10369_v55, %v4777_v11 }
 0x8ae   :  { %v10483_v57 = vsub.f32 %v10363_v15, %v4774_v42  ;;  %v4747_v20 = vpop.xlane.xlu1 %4746  ;;  %v4829_v46 = vsel %vm56_vm0, %v4807_v53, 0.0 }
 0x8af   :  { %v4779_v51 = vmul.f32 0.03125, %v4747_v20  ;;  %4830 = vadd.xlane.f32.xlu1 %v4829_v46  ;;  %v4738_v61 = vpop.xlane.xlu0 %4737  ;;  %v4809_v60 = vmul.f32 %v10480_v1, %v10480_v1 }
 0x8b0   :  { %v4776_v23 = vmul.f32 0.03125, %v4738_v61  ;;  %v4806_v31 = vmul.f32 %v10483_v57, %v10483_v57 }
 0x8b1   :  { %v10491_v17 = vsub.f32 %v10385_v22, %v4779_v51  ;;  %v4835_v44 = vsel %vm56_vm0, %v4809_v60, 0.0 }
 0x8b2   :  { %v10495_v50 = vsub.f32 %v10377_v5, %v4776_v23  ;;  %v4826_v40 = vsel %vm56_vm0, %v4806_v31, 0.0 }
 0x8b3   :  { %4836 = vadd.xlane.f32.xlu1 %v4835_v44  ;;  %4827 = vadd.xlane.f32.xlu0 %v4826_v40  ;;  %v4744_v21 = vpop.xlane.xlu0 %4743  ;;  %v4811_v30 = vmul.f32 %v10491_v17, %v10491_v17 }
 0x8b4   :  { %v4778_v27 = vmul.f32 0.03125, %v4744_v21  ;;  %v4808_v8 = vmul.f32 %v10495_v50, %v10495_v50 }
 0x8b5   :  { %v4841_v39 = vsel %vm56_vm0, %v4811_v30, 0.0 }
 0x8b6   :  { %v10504_v6 = vsub.f32 %v10392_v18, %v4778_v27  ;;  %v4832_v41 = vsel %vm56_vm0, %v4808_v8, 0.0 }
 0x8b7   :  { %4842 = vadd.xlane.f32.xlu1 %v4841_v39  ;;  %4833 = vadd.xlane.f32.xlu0 %v4832_v41 }
 0x8b8   :  { %v4810_v9 = vmul.f32 %v10504_v6, %v10504_v6 }
 0x8ba   :  { %v4838_v38 = vsel %vm56_vm0, %v4810_v9, 0.0 }
 0x8bb   :  { %4839 = vadd.xlane.f32.xlu0 %v4838_v38 }
 0x8d6   :  { %v4753_v12 = vpop.xlane.xlu1 %4752 }
 0x8d7   :  { %v4781_v62 = vmul.f32 0.03125, %v4753_v12  ;;  %v4750_v52 = vpop.xlane.xlu0 %4749 }
 0x8d8   :  { %v4780_v4 = vmul.f32 0.03125, %v4750_v52  ;;  %v5254_v52 = vld [vmem:[%s10811_s4] sm:$0xff] }
 0x8d9   :  { %v10523_v34 = vsub.f32 %v10403_v58, %v4781_v62 }
 0x8da   :  { %v10526_v13 = vsub.f32 %v10408_v28, %v4780_v4  ;;  %v4759_v24 = vpop.xlane.xlu1 %4758  ;;  %v5255_v4 = vld [vmem:[%s10811_s4 + $0x8] sm:$0xff] }
 0x8db   :  { %v4783_v49 = vmul.f32 0.03125, %v4759_v24  ;;  %v4756_v43 = vpop.xlane.xlu0 %4755  ;;  %v4813_v56 = vmul.f32 %v10523_v34, %v10523_v34  ;;  %v5256_v24 = vld [vmem:[%s10811_s4 + $0x10] sm:$0xff] }
 0x8dc   :  { %v4782_v19 = vmul.f32 0.03125, %v4756_v43  ;;  %v4812_v11 = vmul.f32 %v10526_v13, %v10526_v13  ;;  %v5257_v43 = vld [vmem:[%s10811_s4 + $0x18] sm:$0xff] }
 0x8dd   :  { %v10533_v63 = vsub.f32 %v10419_v59, %v4783_v49  ;;  %v4847_v42 = vsel %vm56_vm0, %v4813_v56, 0.0  ;;  %v7043_v49 = vpack.c.bf16 %v5255_v4, %v5254_v52  ;;  %v10582_v56 = vpack.c.bf16 %v5257_v43, %v5256_v24 }
 0x8de   :  { %v10537_v53 = vsub.f32 %v10424_v48, %v4782_v19  ;;  %v4765_v20 = vpop.xlane.xlu1 %4764  ;;  %4848 = vadd.xlane.f32.xlu1 %v4847_v42  ;;  %v4844_v46 = vsel %vm56_vm0, %v4812_v11, 0.0  ;;  %v5258_v19 = vld [vmem:[%s10811_s4 + $0x20] sm:$0xff]  ;;  %v5259_v11 = vld [vmem:[%s10811_s4 + $0x28] sm:$0xff] }
 0x8df   :  { %v4785_v51 = vmul.f32 0.03125, %v4765_v20  ;;  %4845 = vadd.xlane.f32.xlu0 %v4844_v46  ;;  %v4762_v61 = vpop.xlane.xlu0 %4761  ;;  %v4815_v60 = vmul.f32 %v10533_v63, %v10533_v63  ;;  %7044 = vmatprep.subr.bf16.mxu0 %v7043_v49  ;;  %v10591_v42 = vpack.c.bf16 %v5259_v11, %v5258_v19 }
 0x8e0   :  { %v4784_v23 = vmul.f32 0.03125, %v4762_v61  ;;  %v4814_v31 = vmul.f32 %v10537_v53, %v10537_v53  ;;  %7075 = vmatprep.subr.bf16.mxu1 %v7043_v49 }
 0x8e1   :  { %v10545_v44 = vsub.f32 %v10435_v35, %v4785_v51  ;;  %v4853_v40 = vsel %vm56_vm0, %v4815_v60, 0.0  ;;  %7083 = vmatpush3.bf16.msra.mxu1 %v7043_v49 }
 0x8e2   :  { %v10549_v21 = vsub.f32 %v10440_v25, %v4784_v23  ;;  %v4771_v30 = vpop.xlane.xlu1 %4770  ;;  %4854 = vadd.xlane.f32.xlu1 %v4853_v40  ;;  %v4850_v27 = vsel %vm56_vm0, %v4814_v31, 0.0  ;;  %7076 = vmatprep.subr.bf16.mxu1 %v10582_v56 }
 0x8e3   :  { %v4787_v8 = vmul.f32 0.03125, %v4771_v30  ;;  %4851 = vadd.xlane.f32.xlu0 %v4850_v27  ;;  %v4768_v39 = vpop.xlane.xlu0 %4767  ;;  %v4817_v41 = vmul.f32 %v10545_v44, %v10545_v44 }
 0x8e4   :  { %v4786_v9 = vmul.f32 0.03125, %v4768_v39  ;;  %v4816_v38 = vmul.f32 %v10549_v21, %v10549_v21  ;;  %v4934_v39 = vsub.s32 3, %v10963_v3 }
 0x8e5   :  { %v10557_v10 = vsub.f32 %v10451_v54, %v4787_v8  ;;  %v4859_v2 = vsel %vm56_vm0, %v4817_v41, 0.0  ;;  %7084 = vmatpush3.bf16.msra.mxu1 %v10582_v56 }
 0x8e6   :  { %v10561_v26 = vsub.f32 %v10456_v45, %v4786_v9  ;;  %4860 = vadd.xlane.f32.xlu1 %v4859_v2  ;;  %v4856_v33 = vsel %vm56_vm0, %v4816_v38, 0.0  ;;  %7077 = vmatprep.subr.bf16.mxu1 %v10591_v42 }
 0x8e7   :  { %4857 = vadd.xlane.f32.xlu0 %v4856_v33  ;;  %v4819_v0 = vmul.f32 %v10557_v10, %v10557_v10  ;;  %v4954_v33 = vsub.s32 4, %v10963_v3 }
 0x8e8   :  { %v4818_v47 = vmul.f32 %v10561_v26, %v10561_v26 }
 0x8e9   :  { %v4865_v12 = vsel %vm56_vm0, %v4819_v0, 0.0  ;;  %7085 = vmatpush3.bf16.msra.mxu1 %v10591_v42 }
 0x8ea   :  { %4866 = vadd.xlane.f32.xlu1 %v4865_v12  ;;  %v4862_v62 = vsel %vm56_vm0, %v4818_v47, 0.0  ;;  %v10599_v12 = vrot.slane %v10329_v32, %v4934_v39 }
 0x8eb   :  { %4863 = vadd.xlane.f32.xlu0 %v4862_v62 }
 0x937   :  { %v4825_v20 = vpop.xlane.xlu1 %4824 }
 0x938   :  { %v4869_v46 = vmul.f32 0.03125, %v4825_v20  ;;  %v4822_v51 = vpop.xlane.xlu0 %4821  ;;  %v10603_v20 = vrot.slane %v10329_v32, %v4954_v33 }
 0x939   :  { %v4868_v61 = vmul.f32 0.03125, %v4822_v51 }
 0x93a   :  { %v4885_v60 = vadd.f32 1e-05, %v4869_v46 }
 0x93b   :  { %v4884_v23 = vadd.f32 1e-05, %v4868_v61 }
 0x93c   :  { %7870 = vrsqrt.f32 %v4885_v60  ;;  %v4831_v31 = vpop.xlane.xlu1 %4830 }
 0x93d   :  { %7872 = vrsqrt.f32 %v4884_v23  ;;  %v4871_v40 = vmul.f32 0.03125, %v4831_v31 }
 0x93f   :  { %v4887_v30 = vadd.f32 1e-05, %v4871_v40 }
 0x940   :  { %v4837_v27 = vpop.xlane.xlu1 %4836  ;;  %v4828_v8 = vpop.xlane.xlu0 %4827 }
 0x941   :  { %7874 = vrsqrt.f32 %v4887_v30  ;;  %v4873_v41 = vmul.f32 0.03125, %v4837_v27  ;;  %v4870_v9 = vmul.f32 0.03125, %v4828_v8 }
 0x943   :  { %v4889_v38 = vadd.f32 1e-05, %v4873_v41  ;;  %v4886_v2 = vadd.f32 1e-05, %v4870_v9 }
 0x944   :  { %v4843_v0 = vpop.xlane.xlu1 %4842  ;;  %v4834_v47 = vpop.xlane.xlu0 %4833 }
 0x945   :  { %7876 = vrsqrt.f32 %v4889_v38  ;;  %v4875_v62 = vmul.f32 0.03125, %v4843_v0  ;;  %v4872_v52 = vmul.f32 0.03125, %v4834_v47 }
 0x946   :  { %v7871_v4 = vpop.eup %7870  ;;  %7878 = vrsqrt.f32 %v4886_v2 }
 0x947   :  { %v7873_v24 = vpop.eup %7872  ;;  %v4917_v43 = vmul.f32 %v7871_v4, %v10463_v14  ;;  %v4891_v19 = vadd.f32 1e-05, %v4875_v62  ;;  %v4888_v11 = vadd.f32 1e-05, %v4872_v52 }
 0x948   :  { %v4840_v46 = vpop.xlane.xlu0 %4839  ;;  %v4916_v51 = vmul.f32 %v7873_v24, %v10466_v37 }
 0x949   :  { %v4937_v61 = vmul.f32 %v10599_v12, %v4917_v43  ;;  %7880 = vrsqrt.f32 %v4891_v19  ;;  %v4874_v60 = vmul.f32 0.03125, %v4840_v46 }
 0x94a   :  { %7882 = vrsqrt.f32 %v4888_v11  ;;  %v4936_v23 = vmul.f32 %v10599_v12, %v4916_v51 }
 0x94b   :  { %v7875_v31 = vpop.eup %7874  ;;  %v4890_v40 = vadd.f32 1e-05, %v4874_v60  ;;  %v4957_v14 = vadd.f32 %v10603_v20, %v4937_v61 }
 0x94c   :  { %v4956_v30 = vadd.f32 %v10603_v20, %v4936_v23  ;;  %v4919_v27 = vmul.f32 %v7875_v31, %v10474_v7 }
 0x94d   :  { %7884 = vrsqrt.f32 %v4890_v40 }
 0x94e   :  { %6619 = vmatprep.mubr.msk.f32.mxu0 %vm56_vm0, %v4956_v30  ;;  %v4939_v41 = vmul.f32 %v10599_v12, %v4919_v27 }
 0x94f   :  { %v7877_v8 = vpop.eup %7876  ;;  %6620 = vmatmul.mubr.msk.f32.vlgmr.msra.gmra.mrb[96].mxu0 %vm56_vm0, %v4957_v14 }
 0x950   :  { %v7879_v37 = vpop.eup %7878  ;;  %7046 = vmatpush3.bf16.msra.mxu0 %v7043_v49  ;;  %v4921_v9 = vmul.f32 %v7877_v8, %v10480_v1 }
 0x951   :  { %v4918_v39 = vmul.f32 %v7879_v37, %v10483_v57  ;;  %7048 = vmatprep.subr.bf16.mxu0 %v10582_v56  ;;  %v4959_v57 = vadd.f32 %v10603_v20, %v4939_v41 }
 0x952   :  { %v4941_v49 = vmul.f32 %v10599_v12, %v4921_v9 }
 0x953   :  { %v7881_v38 = vpop.eup %7880  ;;  %v4938_v2 = vmul.f32 %v10599_v12, %v4918_v39 }
 0x954   :  { %v7883_v33 = vpop.eup %7882  ;;  %7050 = vmatpush3.bf16.msra.mxu0 %v10582_v56  ;;  %v4923_v47 = vmul.f32 %v7881_v38, %v10491_v17 }
 0x955   :  { %v4958_v7 = vadd.f32 %v10603_v20, %v4938_v2  ;;  %v4920_v0 = vmul.f32 %v7883_v33, %v10495_v50  ;;  %7052 = vmatprep.subr.bf16.mxu0 %v10591_v42  ;;  %v4961_v50 = vadd.f32 %v10603_v20, %v4941_v49 }
 0x956   :  { %v4943_v24 = vmul.f32 %v10599_v12, %v4923_v47 }
 0x957   :  { %v7885_v62 = vpop.eup %7884  ;;  %6622 = vmatprep.mubr.msk.f32.mxu0 %vm56_vm0, %v4958_v7  ;;  %v4940_v1 = vmul.f32 %v10599_v12, %v4920_v0 }
 0x958   :  { %6623 = vmatmul.mubr.msk.f32.gmra.mrb[98].mxu0 %vm56_vm0, %v4959_v57  ;;  %v4922_v56 = vmul.f32 %v7885_v62, %v10504_v6  ;;  %v4963_v6 = vadd.f32 %v10603_v20, %v4943_v24 }
 0x959   :  { %v4960_v52 = vadd.f32 %v10603_v20, %v4940_v1  ;;  %7054 = vmatpush3.bf16.msra.mxu0 %v10591_v42 }
 0x95a   :  { %v4942_v4 = vmul.f32 %v10599_v12, %v4922_v56 }
 0x95b   :  { %6625 = vmatprep.mubr.msk.f32.mxu0 %vm56_vm0, %v4960_v52 }
 0x95c   :  { %6626 = vmatmul.mubr.msk.f32.gmra.mrb[100].mxu0 %vm56_vm0, %v4961_v50  ;;  %v4962_v17 = vadd.f32 %v10603_v20, %v4942_v4 }
 0x95e   :  { %6628 = vmatprep.mubr.msk.f32.mxu0 %vm56_vm0, %v4962_v17 }
 0x960   :  { %6629 = vmatmul.mubr.msk.f32.gmra.mrb[102].mxu0 %vm56_vm0, %v4963_v6 }
 0x96b   :  { %v4849_v43 = vpop.xlane.xlu1 %4848 }
 0x96c   :  { %v4877_v42 = vmul.f32 0.03125, %v4849_v43  ;;  %v4846_v19 = vpop.xlane.xlu0 %4845 }
 0x96d   :  { %v4876_v11 = vmul.f32 0.03125, %v4846_v19 }
 0x96e   :  { %v4893_v46 = vadd.f32 1e-05, %v4877_v42 }
 0x96f   :  { %v4892_v51 = vadd.f32 1e-05, %v4876_v11  ;;  %v4855_v61 = vpop.xlane.xlu1 %4854 }
 0x970   :  { %7886 = vrsqrt.f32 %v4893_v46  ;;  %v4879_v60 = vmul.f32 0.03125, %v4855_v61  ;;  %v4852_v23 = vpop.xlane.xlu0 %4851 }
 0x971   :  { %7888 = vrsqrt.f32 %v4892_v51  ;;  %v4878_v31 = vmul.f32 0.03125, %v4852_v23 }
 0x972   :  { %v4895_v40 = vadd.f32 1e-05, %v4879_v60 }
 0x973   :  { %v4894_v30 = vadd.f32 1e-05, %v4878_v31  ;;  %v4861_v14 = vpop.xlane.xlu1 %4860 }
 0x974   :  { %7890 = vrsqrt.f32 %v4895_v40  ;;  %v4881_v27 = vmul.f32 0.03125, %v4861_v14  ;;  %v4858_v8 = vpop.xlane.xlu0 %4857 }
 0x975   :  { %7892 = vrsqrt.f32 %v4894_v30  ;;  %v4880_v37 = vmul.f32 0.03125, %v4858_v8 }
 0x976   :  { %v4897_v39 = vadd.f32 1e-05, %v4881_v27 }
 0x977   :  { %v4896_v41 = vadd.f32 1e-05, %v4880_v37  ;;  %v4867_v9 = vpop.xlane.xlu1 %4866 }
 0x978   :  { %7894 = vrsqrt.f32 %v4897_v39  ;;  %v4883_v38 = vmul.f32 0.03125, %v4867_v9  ;;  %v4864_v2 = vpop.xlane.xlu0 %4863  ;;  %v5264_v39 = vld [vmem:[%s10811_s4 + $0x50] sm:$0xff] }
 0x979   :  { %7896 = vrsqrt.f32 %v4896_v41  ;;  %v4882_v33 = vmul.f32 0.03125, %v4864_v2  ;;  %v5265_v41 = vld [vmem:[%s10811_s4 + $0x58] sm:$0xff]  ;;  %v5267_v2 = vld [vmem:[%s10811_s4 + $0x68] sm:$0xff] }
 0x97a   :  { %v7887_v7 = vpop.eup %7886  ;;  %v4899_v0 = vadd.f32 1e-05, %v4883_v38  ;;  %v7063_v9 = vpack.c.bf16 %v5265_v41, %v5264_v39  ;;  %v5266_v38 = vld [vmem:[%s10811_s4 + $0x60] sm:$0xff] }
 0x97b   :  { %v7889_v57 = vpop.eup %7888  ;;  %v4898_v49 = vadd.f32 1e-05, %v4882_v33  ;;  %v4925_v47 = vmul.f32 %v7887_v7, %v10523_v34  ;;  %v7067_v33 = vpack.c.bf16 %v5267_v2, %v5266_v38  ;;  %v5268_v7 = vld [vmem:[%s10811_s4 + $0x70] sm:$0xff] }
 0x97c   :  { %7898 = vrsqrt.f32 %v4899_v0  ;;  %v4924_v62 = vmul.f32 %v7889_v57, %v10526_v13  ;;  %v5269_v0 = vld [vmem:[%s10811_s4 + $0x78] sm:$0xff] }
 0x97d   :  { %7900 = vrsqrt.f32 %v4898_v49  ;;  %v4945_v1 = vmul.f32 %v10599_v12, %v4925_v47  ;;  %v7071_v57 = vpack.c.bf16 %v5269_v0, %v5268_v7  ;;  %v4978_v49 = vsub.s32 6, %v10963_v3 }
 0x97e   :  { %v7891_v56 = vpop.eup %7890  ;;  %v4944_v52 = vmul.f32 %v10599_v12, %v4924_v62 }
 0x97f   :  { %v7893_v50 = vpop.eup %7892  ;;  %v4927_v4 = vmul.f32 %v7891_v56, %v10533_v63  ;;  %v4965_v6 = vadd.f32 %v10603_v20, %v4945_v1  ;;  %v10704_v47 = vrot.slane %v10329_v32, %v4978_v49 }
 0x980   :  { %v4964_v24 = vadd.f32 %v10603_v20, %v4944_v52  ;;  %v4926_v17 = vmul.f32 %v7893_v50, %v10537_v53 }
 0x981   :  { %v4947_v34 = vmul.f32 %v10599_v12, %v4927_v4 }
 0x982   :  { %v7895_v43 = vpop.eup %7894  ;;  %6631 = vmatprep.mubr.msk.f32.mxu0 %vm56_vm0, %v4964_v24  ;;  %v4946_v13 = vmul.f32 %v10599_v12, %v4926_v17 }
 0x983   :  { %v7897_v42 = vpop.eup %7896  ;;  %6632 = vmatmul.mubr.msk.f32.gmra.mrb[104].mxu0 %vm56_vm0, %v4965_v6  ;;  %v4929_v19 = vmul.f32 %v7895_v43, %v10545_v44  ;;  %v4967_v53 = vadd.f32 %v10603_v20, %v4947_v34 }
 0x984   :  { %v4966_v63 = vadd.f32 %v10603_v20, %v4946_v13  ;;  %v4928_v11 = vmul.f32 %v7897_v42, %v10549_v21 }
 0x985   :  { %v4949_v46 = vmul.f32 %v10599_v12, %v4929_v19 }
 0x986   :  { %v7899_v51 = vpop.eup %7898  ;;  %6634 = vmatprep.mubr.msk.f32.mxu0 %vm56_vm0, %v4966_v63  ;;  %v4948_v61 = vmul.f32 %v10599_v12, %v4928_v11 }
 0x987   :  { %v7901_v60 = vpop.eup %7900  ;;  %6635 = vmatmul.mubr.msk.f32.gmra.mrb[106].mxu0 %vm56_vm0, %v4967_v53  ;;  %v4931_v23 = vmul.f32 %v7899_v51, %v10557_v10  ;;  %v4969_v21 = vadd.f32 %v10603_v20, %v4949_v46  ;;  %v5260_v10 = vld [vmem:[%s10811_s4 + $0x30] sm:$0xff] }
 0x988   :  { %v4968_v44 = vadd.f32 %v10603_v20, %v4948_v61  ;;  %v4930_v31 = vmul.f32 %v7901_v60, %v10561_v26  ;;  %v5261_v26 = vld [vmem:[%s10811_s4 + $0x38] sm:$0xff] }
 0x989   :  { %v4951_v40 = vmul.f32 %v10599_v12, %v4931_v23  ;;  %v7055_v8 = vpack.c.bf16 %v5261_v26, %v5260_v10 }
 0x98a   :  { %6637 = vmatprep.mubr.msk.f32.mxu0 %vm56_vm0, %v4968_v44  ;;  %v4950_v30 = vmul.f32 %v10599_v12, %v4930_v31  ;;  %v5262_v12 = vld [vmem:[%s10811_s4 + $0x40] sm:$0xff] }
 0x98b   :  { %6638 = vmatmul.mubr.msk.f32.gmra.mrb[108].mxu0 %vm56_vm0, %v4969_v21  ;;  %v4971_v27 = vadd.f32 %v10603_v20, %v4951_v40  ;;  %7056 = vmatprep.subr.bf16.mxu0 %v7055_v8 }
 0x98c   :  { %v4970_v14 = vadd.f32 %v10603_v20, %v4950_v30  ;;  %7078 = vmatprep.subr.bf16.mxu1 %v7055_v8  ;;  %7058 = vmatpush3.bf16.msra.mxu0 %v7055_v8  ;;  %v5263_v20 = vld [vmem:[%s10811_s4 + $0x48] sm:$0xff] }
 0x98d   :  { %7086 = vmatpush3.bf16.msra.mxu1 %v7055_v8  ;;  %v7059_v37 = vpack.c.bf16 %v5263_v20, %v5262_v12 }
 0x98e   :  { %6640 = vmatprep.mubr.msk.f32.mxu0 %vm56_vm0, %v4970_v14 }
 0x98f   :  { %6641 = vmatmul.mubr.msk.f32.gmra.mrb[110].mxu0 %vm56_vm0, %v4971_v27  ;;  %7060 = vmatprep.subr.bf16.mxu0 %v7059_v37 }
 0x990   :  { %7079 = vmatprep.subr.bf16.mxu1 %v7059_v37  ;;  %7062 = vmatpush3.bf16.msra.mxu0 %v7059_v37 }
 0x991   :  { %7087 = vmatpush3.bf16.msra.mxu1 %v7059_v37  ;;  %7064 = vmatprep.subr.bf16.mxu0 %v7063_v9 }
 0x992   :  { %7080 = vmatprep.subr.bf16.mxu1 %v7063_v9 }
 0x994   :  { %7066 = vmatpush3.bf16.msra.mxu0 %v7063_v9 }
 0x995   :  { %7088 = vmatpush3.bf16.msra.mxu1 %v7063_v9  ;;  %7068 = vmatprep.subr.bf16.mxu0 %v7067_v33 }
 0x996   :  { %7081 = vmatprep.subr.bf16.mxu1 %v7067_v33 }
 0x998   :  { %7070 = vmatpush3.bf16.msra.mxu0 %v7067_v33 }
 0x999   :  { %7089 = vmatpush3.bf16.msra.mxu1 %v7067_v33  ;;  %7072 = vmatprep.subr.bf16.mxu0 %v7071_v57 }
 0x99a   :  { %7082 = vmatprep.subr.bf16.mxu1 %v7071_v57 }
 0x99c   :  { %7074 = vmatpush3.bf16.msra.mxu0 %v7071_v57 }
 0x99d   :  { %7090 = vmatpush3.bf16.msra.mxu1 %v7071_v57 }
 0xa22   :  { %v6621_v62 = vpop.f32.mrb[96].mxu0 }
 0xa23   :  { %v5100_v1 = vadd.f32 %v6621_v62, %v10704_v47  ;;  %v5094_v56 = vpop.f32.mrb[97].mxu0 }
 0xa24   :  { %v5095_v52 = vadd.f32 %v5094_v56, %v10704_v47 }
 0xa25   :  { %v5191_v50 = vmul.f32 0.70710677, %v5100_v1  ;;  %v5174_v31 = vmul.f32 0.5, %v5100_v1 }
 0xa26   :  { %v5190_v4 = vmul.f32 0.70710677, %v5095_v52  ;;  %v5173_v61 = vmul.f32 0.5, %v5095_v52 }
 0xa27   :  { %7902 = verf.f32 %v5191_v50 }
 0xa28   :  { %7904 = verf.f32 %v5190_v4 }
 0xa2b   :  { %v6624_v24 = vpop.f32.mrb[98].mxu0 }
 0xa2c   :  { %v5110_v17 = vadd.f32 %v6624_v24, %v10704_v47  ;;  %v5104_v6 = vpop.f32.mrb[99].mxu0 }
 0xa2d   :  { %v5105_v34 = vadd.f32 %v5104_v6, %v10704_v47 }
 0xa2e   :  { %v5193_v43 = vmul.f32 0.70710677, %v5110_v17  ;;  %v5176_v41 = vmul.f32 0.5, %v5110_v17 }
 0xa2f   :  { %v5192_v13 = vmul.f32 0.70710677, %v5105_v34  ;;  %v6627_v32 = vpop.f32.mrb[100].mxu0  ;;  %v5175_v37 = vmul.f32 0.5, %v5105_v34 }
 0xa30   :  { %7906 = verf.f32 %v5193_v43  ;;  %v5120_v42 = vadd.f32 %v6627_v32, %v10704_v47  ;;  %v5114_v19 = vpop.f32.mrb[101].mxu0 }
 0xa31   :  { %v7903_v63 = vpop.eup %7902  ;;  %7908 = verf.f32 %v5192_v13  ;;  %v5115_v11 = vadd.f32 %v5114_v19, %v10704_v47 }
 0xa32   :  { %v7905_v53 = vpop.eup %7904  ;;  %v5223_v46 = vadd.f32 1.0, %v7903_v63  ;;  %v5195_v51 = vmul.f32 0.70710677, %v5120_v42  ;;  %v5178_v49 = vmul.f32 0.5, %v5120_v42 }
 0xa33   :  { %v5222_v60 = vadd.f32 1.0, %v7905_v53  ;;  %v5194_v23 = vmul.f32 0.70710677, %v5115_v11  ;;  %v6630_v44 = vpop.f32.mrb[102].mxu0  ;;  %v5177_v0 = vmul.f32 0.5, %v5115_v11 }
 0xa34   :  { %7910 = verf.f32 %v5195_v51  ;;  %v5130_v21 = vadd.f32 %v6630_v44, %v10704_v47  ;;  %v5124_v40 = vpop.f32.mrb[103].mxu0  ;;  %v5239_v27 = vmul.f32 %v5223_v46, %v5174_v31 }
 0xa35   :  { %7912 = verf.f32 %v5194_v23  ;;  %v5125_v30 = vadd.f32 %v5124_v40, %v10704_v47  ;;  %v5238_v14 = vmul.f32 %v5222_v60, %v5173_v61 }
 0xa36   :  { %v5197_v10 = vmul.f32 0.70710677, %v5130_v21  ;;  %v5180_v6 = vmul.f32 0.5, %v5130_v21 }
 0xa37   :  { %v5196_v26 = vmul.f32 0.70710677, %v5125_v30  ;;  %6675 = vmatprep.mubr.f32.mxu0 %v5238_v14  ;;  %v5179_v4 = vmul.f32 0.5, %v5125_v30 }
 0xa38   :  { %7914 = verf.f32 %v5197_v10  ;;  %6676 = vmatmul.mubr.f32.vlgmr.msra.gmra.mrb[112].mxu0 %v5239_v27 }
 0xa39   :  { %7916 = verf.f32 %v5196_v26 }
 0xa3a   :  { %v7907_v8 = vpop.eup %7906 }
 0xa3b   :  { %v7909_v12 = vpop.eup %7908  ;;  %v5225_v20 = vadd.f32 1.0, %v7907_v8 }
 0xa3c   :  { %v5224_v39 = vadd.f32 1.0, %v7909_v12 }
 0xa3d   :  { %v5241_v7 = vmul.f32 %v5225_v20, %v5176_v41 }
 0xa3e   :  { %v7911_v9 = vpop.eup %7910  ;;  %v5240_v38 = vmul.f32 %v5224_v39, %v5175_v37 }
 0xa3f   :  { %v7913_v2 = vpop.eup %7912  ;;  %v5227_v33 = vadd.f32 1.0, %v7911_v9 }
 0xa40   :  { %v5226_v57 = vadd.f32 1.0, %v7913_v2  ;;  %6678 = vmatprep.mubr.f32.mxu0 %v5240_v38 }
 0xa41   :  { %6679 = vmatmul.mubr.f32.gmra.mrb[114].mxu0 %v5241_v7  ;;  %v5243_v50 = vmul.f32 %v5227_v33, %v5178_v49 }
 0xa42   :  { %v7915_v62 = vpop.eup %7914  ;;  %v5242_v1 = vmul.f32 %v5226_v57, %v5177_v0 }
 0xa43   :  { %v7917_v56 = vpop.eup %7916  ;;  %v5229_v52 = vadd.f32 1.0, %v7915_v62 }
 0xa44   :  { %v5228_v24 = vadd.f32 1.0, %v7917_v56  ;;  %6681 = vmatprep.mubr.f32.mxu0 %v5242_v1 }
 0xa45   :  { %6682 = vmatmul.mubr.f32.gmra.mrb[116].mxu0 %v5243_v50  ;;  %v5245_v34 = vmul.f32 %v5229_v52, %v5180_v6 }
 0xa46   :  { %v5244_v17 = vmul.f32 %v5228_v24, %v5179_v4 }
 0xa48   :  { %6684 = vmatprep.mubr.f32.mxu1 %v5244_v17 }
 0xa49   :  { %6685 = vmatmul.mubr.f32.vlgmr.msra.gmra.mrb[80].mxu1 %v5245_v34 }
 0xa56   :  { %v6633_v43 = vpop.f32.mrb[104].mxu0 }
 0xa57   :  { %v5140_v13 = vadd.f32 %v6633_v43, %v10704_v47  ;;  %v5134_v32 = vpop.f32.mrb[105].mxu0 }
 0xa58   :  { %v5135_v42 = vadd.f32 %v5134_v32, %v10704_v47 }
 0xa59   :  { %v5199_v19 = vmul.f32 0.70710677, %v5140_v13  ;;  %v5182_v38 = vmul.f32 0.5, %v5140_v13 }
 0xa5a   :  { %v5198_v63 = vmul.f32 0.70710677, %v5135_v42  ;;  %v6636_v11 = vpop.f32.mrb[106].mxu0  ;;  %v5181_v41 = vmul.f32 0.5, %v5135_v42 }
 0xa5b   :  { %7918 = verf.f32 %v5199_v19  ;;  %v5150_v53 = vadd.f32 %v6636_v11, %v10704_v47  ;;  %v5144_v46 = vpop.f32.mrb[107].mxu0 }
 0xa5c   :  { %7920 = verf.f32 %v5198_v63  ;;  %v5145_v51 = vadd.f32 %v5144_v46, %v10704_v47 }
 0xa5d   :  { %v5201_v61 = vmul.f32 0.70710677, %v5150_v53  ;;  %v5184_v1 = vmul.f32 0.5, %v5150_v53 }
 0xa5e   :  { %v5200_v60 = vmul.f32 0.70710677, %v5145_v51  ;;  %v6639_v23 = vpop.f32.mrb[108].mxu0  ;;  %v5183_v49 = vmul.f32 0.5, %v5145_v51  ;;  %v5272_v51 = vsub.s32 5, %v10963_v3 }
 0xa5f   :  { %7922 = verf.f32 %v5201_v61  ;;  %v5160_v44 = vadd.f32 %v6639_v23, %v10704_v47  ;;  %v5154_v31 = vpop.f32.mrb[109].mxu0  ;;  %v7951_v61 = vld [vmem:[%s10809_s5] sm:$0xff] }
 0xa60   :  { %7924 = verf.f32 %v5200_v60  ;;  %v5155_v21 = vadd.f32 %v5154_v31, %v10704_v47  ;;  %v5273_v60 = vrot.slane %v7951_v61, %v5272_v51 }
 0xa61   :  { %v5203_v40 = vmul.f32 0.70710677, %v5160_v44  ;;  %v5186_v17 = vmul.f32 0.5, %v5160_v44 }
 0xa62   :  { %v5202_v30 = vmul.f32 0.70710677, %v5155_v21  ;;  %v6642_v14 = vpop.f32.mrb[110].mxu0  ;;  %v5185_v24 = vmul.f32 0.5, %v5155_v21 }
 0xa63   :  { %7926 = verf.f32 %v5203_v40  ;;  %v5170_v27 = vadd.f32 %v6642_v14, %v10704_v47  ;;  %v5164_v10 = vpop.f32.mrb[111].mxu0 }
 0xa64   :  { %7928 = verf.f32 %v5202_v30  ;;  %v5165_v26 = vadd.f32 %v5164_v10, %v10704_v47 }
 0xa65   :  { %v7919_v8 = vpop.eup %7918  ;;  %v5205_v12 = vmul.f32 0.70710677, %v5170_v27  ;;  %v5188_v11 = vmul.f32 0.5, %v5170_v27 }
 0xa66   :  { %v7921_v20 = vpop.eup %7920  ;;  %v5231_v37 = vadd.f32 1.0, %v7919_v8  ;;  %v5204_v39 = vmul.f32 0.70710677, %v5165_v26  ;;  %v5187_v19 = vmul.f32 0.5, %v5165_v26 }
 0xa67   :  { %v5230_v9 = vadd.f32 1.0, %v7921_v20  ;;  %7930 = verf.f32 %v5205_v12 }
 0xa68   :  { %7932 = verf.f32 %v5204_v39  ;;  %v5247_v57 = vmul.f32 %v5231_v37, %v5182_v38 }
 0xa69   :  { %v7923_v2 = vpop.eup %7922  ;;  %v5246_v33 = vmul.f32 %v5230_v9, %v5181_v41 }
 0xa6a   :  { %v7925_v7 = vpop.eup %7924  ;;  %v5233_v0 = vadd.f32 1.0, %v7923_v2 }
 0xa6b   :  { %v5232_v62 = vadd.f32 1.0, %v7925_v7  ;;  %6687 = vmatprep.mubr.f32.mxu1 %v5246_v33 }
 0xa6c   :  { %6688 = vmatmul.mubr.f32.gmra.mrb[82].mxu1 %v5247_v57  ;;  %v5249_v4 = vmul.f32 %v5233_v0, %v5184_v1 }
 0xa6d   :  { %v7927_v47 = vpop.eup %7926  ;;  %v5248_v56 = vmul.f32 %v5232_v62, %v5183_v49 }
 0xa6e   :  { %v7929_v52 = vpop.eup %7928  ;;  %v5235_v50 = vadd.f32 1.0, %v7927_v47 }
 0xa6f   :  { %v5234_v6 = vadd.f32 1.0, %v7929_v52  ;;  %6690 = vmatprep.mubr.f32.mxu1 %v5248_v56 }
 0xa70   :  { %6691 = vmatmul.mubr.f32.gmra.mrb[84].mxu1 %v5249_v4  ;;  %v5251_v42 = vmul.f32 %v5235_v50, %v5186_v17 }
 0xa71   :  { %v7931_v34 = vpop.eup %7930  ;;  %v5250_v43 = vmul.f32 %v5234_v6, %v5185_v24 }
 0xa72   :  { %v7933_v13 = vpop.eup %7932  ;;  %v5237_v32 = vadd.f32 1.0, %v7931_v34 }
 0xa73   :  { %v5236_v63 = vadd.f32 1.0, %v7933_v13  ;;  %6693 = vmatprep.mubr.f32.mxu1 %v5250_v43 }
 0xa74   :  { %6694 = vmatmul.mubr.f32.gmra.mrb[86].mxu1 %v5251_v42  ;;  %v5253_v46 = vmul.f32 %v5237_v32, %v5188_v11 }
 0xa75   :  { %v5252_v53 = vmul.f32 %v5236_v63, %v5187_v19 }
 0xa77   :  { %6696 = vmatprep.mubr.f32.mxu1 %v5252_v53 }
 0xa78   :  { %6697 = vmatmul.mubr.f32.gmra.mrb[88].mxu1 %v5253_v46 }
 0xb0b   :  { %v6677_v23 = vpop.f32.mrb[112].mxu0 }
 0xb0c   :  { %v5346_v44 = vadd.f32 %v6677_v23, %v5273_v60  ;;  %v5340_v31 = vpop.f32.mrb[113].mxu0 }
 0xb0d   :  { %v5341_v21 = vadd.f32 %v5340_v31, %v5273_v60 }
 0xb0e   :  { %v5420_v40 = vadd.f32 %v5346_v44, %v10339_v36 }
 0xb0f   :  { %v5419_v30 = vadd.f32 %v5341_v21, %v10344_v16 }
 0xb10   :  { %5436 = vst.msk [vmem:[%s10812_s6 + $0x8] sm:$0xff] %vm56_vm0, %v5420_v40 }
 0xb11   :  { %5435 = vst.msk [vmem:[%s10812_s6] sm:$0xff] %vm56_vm0, %v5419_v30 }
 0xb14   :  { %v6680_v3 = vpop.f32.mrb[114].mxu0 }
 0xb15   :  { %v5356_v14 = vadd.f32 %v6680_v3, %v5273_v60  ;;  %v5350_v27 = vpop.f32.mrb[115].mxu0 }
 0xb16   :  { %v5351_v10 = vadd.f32 %v5350_v27, %v5273_v60 }
 0xb17   :  { %v5422_v26 = vadd.f32 %v5356_v14, %v10355_v29 }
 0xb18   :  { %v5421_v36 = vadd.f32 %v5351_v10, %v10363_v15  ;;  %v6683_v8 = vpop.f32.mrb[116].mxu0 }
 0xb19   :  { %5438 = vst.msk [vmem:[%s10812_s6 + $0x18] sm:$0xff] %vm56_vm0, %v5422_v26  ;;  %v5366_v16 = vadd.f32 %v6683_v8, %v5273_v60  ;;  %v5360_v12 = vpop.f32.mrb[117].mxu0 }
 0xb1a   :  { %5437 = vst.msk [vmem:[%s10812_s6 + $0x10] sm:$0xff] %vm56_vm0, %v5421_v36  ;;  %v5361_v20 = vadd.f32 %v5360_v12, %v5273_v60 }
 0xb1b   :  { %v5424_v37 = vadd.f32 %v5366_v16, %v10369_v55 }
 0xb1c   :  { %v5423_v29 = vadd.f32 %v5361_v20, %v10377_v5  ;;  %v6686_v39 = vpop.f32.mrb[80].mxu1 }
 0xb1d   :  { %5440 = vst.msk [vmem:[%s10812_s6 + $0x28] sm:$0xff] %vm56_vm0, %v5424_v37  ;;  %v5376_v15 = vadd.f32 %v6686_v39, %v5273_v60  ;;  %v5370_v41 = vpop.f32.mrb[81].mxu1 }
 0xb1e   :  { %5439 = vst.msk [vmem:[%s10812_s6 + $0x20] sm:$0xff] %vm56_vm0, %v5423_v29  ;;  %v5371_v9 = vadd.f32 %v5370_v41, %v5273_v60 }
 0xb1f   :  { %v5426_v38 = vadd.f32 %v5376_v15, %v10385_v22 }
 0xb20   :  { %v5425_v55 = vadd.f32 %v5371_v9, %v10392_v18 }
 0xb21   :  { %5442 = vst.msk [vmem:[%s10812_s6 + $0x38] sm:$0xff] %vm56_vm0, %v5426_v38 }
 0xb22   :  { %5441 = vst.msk [vmem:[%s10812_s6 + $0x30] sm:$0xff] %vm56_vm0, %v5425_v55 }
 0xb3f   :  { %v6689_v5 = vpop.f32.mrb[82].mxu1 }
 0xb40   :  { %v5386_v2 = vadd.f32 %v6689_v5, %v5273_v60  ;;  %v5380_v33 = vpop.f32.mrb[83].mxu1 }
 0xb41   :  { %v5381_v7 = vadd.f32 %v5380_v33, %v5273_v60 }
 0xb42   :  { %v5428_v0 = vadd.f32 %v5386_v2, %v10403_v58 }
 0xb43   :  { %v5427_v22 = vadd.f32 %v5381_v7, %v10408_v28  ;;  %v6692_v57 = vpop.f32.mrb[84].mxu1 }
 0xb44   :  { %5444 = vst.msk [vmem:[%s10812_s6 + $0x48] sm:$0xff] %vm56_vm0, %v5428_v0  ;;  %v5396_v18 = vadd.f32 %v6692_v57, %v5273_v60  ;;  %v5390_v49 = vpop.f32.mrb[85].mxu1 }
 0xb45   :  { %5443 = vst.msk [vmem:[%s10812_s6 + $0x40] sm:$0xff] %vm56_vm0, %v5427_v22  ;;  %v5391_v62 = vadd.f32 %v5390_v49, %v5273_v60 }
 0xb46   :  { %v5430_v1 = vadd.f32 %v5396_v18, %v10419_v59 }
 0xb47   :  { %v5429_v58 = vadd.f32 %v5391_v62, %v10424_v48  ;;  %v6695_v47 = vpop.f32.mrb[86].mxu1 }
 0xb48   :  { %5446 = vst.msk [vmem:[%s10812_s6 + $0x58] sm:$0xff] %vm56_vm0, %v5430_v1  ;;  %v5406_v28 = vadd.f32 %v6695_v47, %v5273_v60  ;;  %v5400_v56 = vpop.f32.mrb[87].mxu1 }
 0xb49   :  { %5445 = vst.msk [vmem:[%s10812_s6 + $0x50] sm:$0xff] %vm56_vm0, %v5429_v58  ;;  %v5401_v52 = vadd.f32 %v5400_v56, %v5273_v60 }
 0xb4a   :  { %v5432_v50 = vadd.f32 %v5406_v28, %v10435_v35 }
 0xb4b   :  { %v5431_v59 = vadd.f32 %v5401_v52, %v10440_v25  ;;  %v6698_v4 = vpop.f32.mrb[88].mxu1 }
 0xb4c   :  { %5448 = vst.msk [vmem:[%s10812_s6 + $0x68] sm:$0xff] %vm56_vm0, %v5432_v50  ;;  %v5416_v48 = vadd.f32 %v6698_v4, %v5273_v60  ;;  %v5410_v24 = vpop.f32.mrb[89].mxu1 }
 0xb4d   :  { %5447 = vst.msk [vmem:[%s10812_s6 + $0x60] sm:$0xff] %vm56_vm0, %v5431_v59  ;;  %v5411_v6 = vadd.f32 %v5410_v24, %v5273_v60 }
 0xb4e   :  { %v5434_v17 = vadd.f32 %v5416_v48, %v10451_v54 }
 0xb4f   :  { %v5433_v35 = vadd.f32 %v5411_v6, %v10456_v45 }
 0xb50   :  { %5450 = vst.msk [vmem:[%s10812_s6 + $0x78] sm:$0xff] %vm56_vm0, %v5434_v17 }
 0xb51   :  { %5449 = vst.msk [vmem:[%s10812_s6 + $0x70] sm:$0xff] %vm56_vm0, %v5433_v35 }

</bundles_post_ra>
